<compile_context>
chip_gen: v5e
topology: v5e:2x2
jax: 0.10.0
libtpu: 0.0.40
codegen_flags: <defaults>
</compile_context>

<pallas_src>
import functools
import numpy as np
import jax
import jax.numpy as jnp
from jax.experimental import pallas as pl
from jax.experimental.pallas import tpu as pltpu

MXU_DTYPE = jnp.bfloat16   # MXU operand dtype; accumulation stays f32
LN_EPS = 1e-5


def _layernorm(z, gamma, beta, eps=LN_EPS):
    """LayerNorm over the last dim with f32 statistics."""
    mu = jnp.mean(z, axis=-1, keepdims=True)
    zc = z - mu
    var = jnp.mean(zc * zc, axis=-1, keepdims=True)
    return zc * jax.lax.rsqrt(var + eps) * gamma + beta


# ---------------------------------------------------------------------------
# Fused kernel
# ---------------------------------------------------------------------------

def _fused_forward_kernel(x_ref, w_ref, p_ref, out_ref, *,
                          num_layers, nhead, d_model, dim_ff, seq_len,
                          batch_tile, eps):
    D, dff, S, Bt, nh = d_model, dim_ff, seq_len, batch_tile, nhead
    hd = D // nh
    R = Bt * S
    scale = 1.0 / float(np.sqrt(hd))
    f32 = jnp.float32
    bf = lambda a: a.astype(MXU_DTYPE)

    # -- static offsets into the two packed parameter slabs --
    n_ff2 = dff // D                               # ff2 stored as n_ff2 (D, D) chunks
    per_layer_w = 3 * D + D + dff + n_ff2 * D
    w_off_layer = lambda l: D + l * per_layer_w
    w_off_head1 = D + num_layers * per_layer_w
    w_off_head2 = w_off_head1 + D
    p_row_layer = lambda l: S + l * 8
    p_row_head1 = S + num_layers * 8
    p_row_head2 = p_row_head1 + 1

    # ---- embedding + positional encoding (PE row already contains embed_b) ----
    x = x_ref[0].reshape(R, D)                                     # (R, D) f32
    h = jnp.dot(bf(x), w_ref[:, 0:D], preferred_element_type=f32)  # (R, D)
    pe = p_ref[0:S, 0:D]                                           # (S, D)
    h = (h.reshape(Bt, S, D) + pe).reshape(R, D)

    def split_heads(t):
        """(R, D) f32 -> (nhead*Bt, S, hd) bf16, head-major along axis 0."""
        t = t.reshape(Bt, S, D)
        return jnp.concatenate(
            [t[:, :, i * hd:(i + 1) * hd] for i in range(nh)],
            axis=0).astype(MXU_DTYPE)

    # ---- transformer encoder layers (post-norm, ReLU FFN, dropout = id) ----
    for l in range(num_layers):
        c0 = w_off_layer(l)
        w_qkv = w_ref[:, c0:c0 + 3 * D]
        w_out = w_ref[:, c0 + 3 * D:c0 + 4 * D]
        w_ff1 = w_ref[:, c0 + 4 * D:c0 + 4 * D + dff]
        c_ff2 = c0 + 4 * D + dff

        r0 = p_row_layer(l)
        b_qkv = p_ref[r0 + 0:r0 + 1, 0:3 * D]
        b_out = p_ref[r0 + 1:r0 + 2, 0:D]
        g1    = p_ref[r0 + 2:r0 + 3, 0:D]
        be1   = p_ref[r0 + 3:r0 + 4, 0:D]
        b_ff1 = p_ref[r0 + 4:r0 + 5, 0:dff]
        b_ff2 = p_ref[r0 + 5:r0 + 6, 0:D]
        g2    = p_ref[r0 + 6:r0 + 7, 0:D]
        be2   = p_ref[r0 + 7:r0 + 8, 0:D]

        # --- multi-head self-attention (heads batched, single out-proj) ---
        qkv = jnp.dot(bf(h), w_qkv, preferred_element_type=f32) + b_qkv  # (R, 3D)
        q = qkv[:, 0:D] * scale             # hoisted 1/sqrt(hd): one lane-dense mul
        k = qkv[:, D:2 * D]
        v = qkv[:, 2 * D:3 * D]
        q3, k3, v3 = split_heads(q), split_heads(k), split_heads(v)

        s = jnp.einsum('bqd,bkd->bqk', q3, k3,
                       preferred_element_type=f32)                 # (nh*Bt, S, S)
        m = jnp.max(s, axis=-1, keepdims=True)
        p = jnp.exp(s - m)
        p = p * pl.reciprocal(jnp.sum(p, axis=-1, keepdims=True), approx=True)
        o3 = jnp.einsum('bqk,bkd->bqd', bf(p), v3,
                        preferred_element_type=f32)                # (nh*Bt, S, hd)
        o = jnp.concatenate([o3[i * Bt:(i + 1) * Bt] for i in range(nh)],
                            axis=-1)                               # (Bt, S, D)
        o = bf(o.reshape(R, D))
        attn = jnp.dot(o, w_out, preferred_element_type=f32) + b_out
        h = _layernorm(h + attn, g1, be1, eps)

        # --- feed-forward (ReLU); ff2 consumed split-K over packed chunks ---
        ff = jnp.dot(bf(h), w_ff1, preferred_element_type=f32) + b_ff1
        ff = bf(jnp.maximum(ff, 0.0))        # early bf16 cast of largest live value
        f2 = b_ff2
        for c in range(n_ff2):
            f2 = f2 + jnp.dot(ff[:, c * D:(c + 1) * D],
                              w_ref[:, c_ff2 + c * D:c_ff2 + (c + 1) * D],
                              preferred_element_type=f32)
        h = _layernorm(h + f2, g2, be2, eps)

    # ---- pool the last token of each sequence, then the small MLP head ----
    pooled = jnp.concatenate([h[(b + 1) * S - 1:(b + 1) * S, :] for b in range(Bt)],
                             axis=0)                               # (Bt, D)
    y = jnp.dot(bf(pooled), w_ref[:, w_off_head1:w_off_head1 + D],
                preferred_element_type=f32)
    y = jnp.maximum(y + p_ref[p_row_head1:p_row_head1 + 1, 0:D], 0.0)
    y = jnp.dot(bf(y), w_ref[:, w_off_head2:w_off_head2 + D],
                preferred_element_type=f32)
    y = y + p_ref[p_row_head2:p_row_head2 + 1, 0:D]
    out_ref[0] = y                                                 # lane 0 = prediction


# ---------------------------------------------------------------------------
# Parameter construction + packing
# ---------------------------------------------------------------------------

def make_pe(max_len, d_model):
    pos = np.arange(max_len, dtype=np.float64)[:, None]
    div = np.exp(np.arange(0, d_model, 2, dtype=np.float64)
                 * -(np.log(10000.0) / d_model))
    pe = np.zeros((max_len, d_model), np.float32)
    pe[:, 0::2] = np.sin(pos * div)
    pe[:, 1::2] = np.cos(pos * div)
    return jnp.asarray(pe)


def init_params(key, feature_dim, d_model, nhead, num_layers, dim_ff):
    state = {"key": key}

    def nxt():
        state["key"], sub = jax.random.split(state["key"])
        return sub

    w = lambda shape: 0.05 * jax.random.normal(nxt(), shape, jnp.float32)
    b = lambda n: 0.05 * jax.random.normal(nxt(), (n,), jnp.float32)

    params = {
        "embed_w": w((feature_dim, d_model)), "embed_b": b(d_model),
        "head1_w": w((d_model, 64)), "head1_b": b(64),
        "head2_w": w((64, 1)), "head2_b": b(1),
        "layers": [],
    }
    for _ in range(num_layers):
        params["layers"].append({
            "in_proj_w": w((d_model, 3 * d_model)), "in_proj_b": b(3 * d_model),
            "out_proj_w": w((d_model, d_model)), "out_proj_b": b(d_model),
            "ln1_g": jnp.ones((d_model,), jnp.float32), "ln1_b": b(d_model),
            "ff1_w": w((d_model, dim_ff)), "ff1_b": b(dim_ff),
            "ff2_w": w((dim_ff, d_model)), "ff2_b": b(d_model),
            "ln2_g": jnp.ones((d_model,), jnp.float32), "ln2_b": b(d_model),
        })
    return params


def pack_params(params, seq_len):
    """Collapse all parameters into ONE bf16 weight slab and ONE f32 slab."""
    D = params["embed_w"].shape[1]
    dff = params["layers"][0]["ff1_w"].shape[1]
    PW = 3 * D

    def pad2(a, rows, cols):
        a = jnp.asarray(a, jnp.float32)
        return jnp.zeros((rows, cols), jnp.float32).at[:a.shape[0], :a.shape[1]].set(a)

    # bf16 weight slab, all blocks have D rows (feature dim of x is padded to D)
    blocks = [pad2(params["embed_w"], D, D)]
    for lyr in params["layers"]:
        blocks += [jnp.asarray(lyr["in_proj_w"], jnp.float32),
                   jnp.asarray(lyr["out_proj_w"], jnp.float32),
                   jnp.asarray(lyr["ff1_w"], jnp.float32)]
        ff2 = jnp.asarray(lyr["ff2_w"], jnp.float32)
        blocks += [ff2[c * D:(c + 1) * D] for c in range(dff // D)]
    blocks += [pad2(params["head1_w"], D, D), pad2(params["head2_w"], D, D)]
    W = jnp.concatenate(blocks, axis=1).astype(MXU_DTYPE)          # (D, 384+1024*L+256)

    # f32 slab: PE (+embed bias) rows, then one row per bias / LN vector
    rows = [pad2(make_pe(seq_len, D) + params["embed_b"][None, :], seq_len, PW)]
    for lyr in params["layers"]:
        for name in ("in_proj_b", "out_proj_b", "ln1_g", "ln1_b",
                     "ff1_b", "ff2_b", "ln2_g", "ln2_b"):
            rows.append(pad2(lyr[name][None, :], 1, PW))
    rows.append(pad2(params["head1_b"][None, :], 1, PW))
    rows.append(pad2(params["head2_b"][None, :], 1, PW))
    P = jnp.concatenate(rows, axis=0)                              # (S + 8L + 2, 3D)
    return W, P


# ---------------------------------------------------------------------------
# Forward pass: one fused pallas_call
# ---------------------------------------------------------------------------

def stock_transformer_forward(x, params, *, nhead, batch_tile=None):
    """x: (B, S, feature_dim) -> (B,)."""
    B, S, F = x.shape
    D = params["embed_w"].shape[1]
    dff = params["layers"][0]["ff1_w"].shape[1]
    L = len(params["layers"])
    assert D % nhead == 0 and dff % D == 0 and dff <= 3 * D and F <= D

    # Row-tile: ~128 rows per program (v5e MXU width).  For B=2/S=8 this folds
    # the whole batch into one program; for larger B it yields >=2 "parallel"
    # programs so v7x's two TensorCores are both used.
    if batch_tile is None:
        batch_tile = max(1, min(B, max(1, 128 // S)))
    Bt = batch_tile
    NP = -(-B // Bt)
    B_pad = NP * Bt

    # Pad features to D (lane-dense embed operand) and batch to a tile multiple.
    x_p = jnp.zeros((B_pad, S, D), jnp.float32).at[:B, :, :F].set(
        jnp.asarray(x, jnp.float32))
    x_p = x_p.reshape(NP, Bt, S, D)

    W, P = pack_params(params, S)    # exactly 2 parameter DMAs into the kernel

    kernel = functools.partial(
        _fused_forward_kernel, num_layers=L, nhead=nhead, d_model=D,
        dim_ff=dff, seq_len=S, batch_tile=Bt, eps=LN_EPS)

    out = pl.pallas_call(
        kernel,
        out_shape=jax.ShapeDtypeStruct((NP, Bt, D), jnp.float32),
        grid=(NP,),
        in_specs=[
            pl.BlockSpec((1, Bt, S, D), lambda b: (b, 0, 0, 0)),   # activations
            pl.BlockSpec(W.shape, lambda b: (0, 0)),               # bf16 weight slab
            pl.BlockSpec(P.shape, lambda b: (0, 0)),               # f32 bias/LN/PE slab
        ],
        out_specs=pl.BlockSpec((1, Bt, D), lambda b: (b, 0, 0)),
        compiler_params=pltpu.CompilerParams(
            dimension_semantics=("parallel",)),
        # TODO(synk): on v7x with a much larger model, add
        # pipeline_mode=pl.Buffered(1) to the constant-index weight specs and
        # an explicit vmem_limit_bytes; irrelevant at ~0.7 MB of weights.
    )(x_p, W, P)

    return out.reshape(B_pad, D)[:B, 0]


# ---------------------------------------------------------------------------
# Pure-JAX reference (same mixed precision) for a correctness check
# ---------------------------------------------------------------------------

def reference_forward(x, params, nhead):
    f32 = jnp.float32
    bf = lambda a: a.astype(MXU_DTYPE)
    wc = lambda w: jnp.asarray(w, f32).astype(MXU_DTYPE)
    B, S, F = x.shape
    D = params["embed_w"].shape[1]
    hd = D // nhead
    scale = 1.0 / float(np.sqrt(hd))

    h = jnp.einsum('bsf,fd->bsd', bf(x), wc(params["embed_w"]),
                   preferred_element_type=f32)
    h = h + params["embed_b"] + make_pe(S, D)[None]
    for lyr in params["layers"]:
        qkv = jnp.einsum('bsd,de->bse', bf(h), wc(lyr["in_proj_w"]),
                         preferred_element_type=f32) + lyr["in_proj_b"]
        q = qkv[..., :D] * scale
        k = qkv[..., D:2 * D]
        v = qkv[..., 2 * D:]
        heads = lambda t: t.reshape(B, S, nhead, hd).transpose(0, 2, 1, 3).astype(MXU_DTYPE)
        qh, kh, vh = heads(q), heads(k), heads(v)
        s = jnp.einsum('bhqd,bhkd->bhqk', qh, kh, preferred_element_type=f32)
        p = jax.nn.softmax(s, axis=-1)
        o = jnp.einsum('bhqk,bhkd->bhqd', p.astype(MXU_DTYPE), vh,
                       preferred_element_type=f32)
        o = o.transpose(0, 2, 1, 3).reshape(B, S, D).astype(MXU_DTYPE)
        attn = jnp.einsum('bsd,de->bse', o, wc(lyr["out_proj_w"]),
                          preferred_element_type=f32) + lyr["out_proj_b"]
        h = _layernorm(h + attn, lyr["ln1_g"], lyr["ln1_b"])
        ff = jnp.einsum('bsd,df->bsf', bf(h), wc(lyr["ff1_w"]),
                        preferred_element_type=f32) + lyr["ff1_b"]
        ff = jnp.maximum(ff, 0.0).astype(MXU_DTYPE)
        f2 = jnp.einsum('bsf,fd->bsd', ff, wc(lyr["ff2_w"]),
                        preferred_element_type=f32) + lyr["ff2_b"]
        h = _layernorm(h + f2, lyr["ln2_g"], lyr["ln2_b"])
    pooled = h[:, -1]
    y = jnp.maximum(jnp.dot(bf(pooled), wc(params["head1_w"]),
                            preferred_element_type=f32) + params["head1_b"], 0.0)
    y = jnp.dot(bf(y), wc(params["head2_w"]),
                preferred_element_type=f32) + params["head2_b"]
    return y[:, 0]


# ---------------------------------------------------------------------------
# Main
# ---------------------------------------------------------------------------

if __name__ == "__main__":
    B, S, F = 2, 8, 5
    D, NHEAD, NLAYERS, DFF = 128, 4, 2, 256   # module-default widths, 2 layers

    key = jax.random.PRNGKey(0)
    kx, kp = jax.random.split(key)
    x = jax.random.normal(kx, (B, S, F), jnp.float32)
    params = init_params(kp, feature_dim=F, d_model=D, nhead=NHEAD,
                         num_layers=NLAYERS, dim_ff=DFF)

    out = stock_transformer_forward(x, params, nhead=NHEAD)
    out = jax.block_until_ready(out)
    assert out.shape == (B,), out.shape
    assert bool(jnp.all(jnp.isfinite(out)))

    # Tolerance check against a pure-JAX reference using the same mixed
    # precision (bf16 weights/operands, f32 accumulation/LayerNorm); only the
    # approx reciprocal and accumulation order differ.
    ref = jax.block_until_ready(reference_forward(x, params, NHEAD))
    np.testing.assert_allclose(np.asarray(out), np.asarray(ref),
                               rtol=2e-2, atol=2e-2)
    print("KERNEL_OK")
</pallas_src>

<mosaic_0001>
module attributes {stable_mosaic.version = 11 : i64} {
  func.func @_fused_forward_kernel(%arg0: i32, %arg1: memref<1x2x8x128xf32, #tpu.memory_space<vmem>>, %arg2: memref<128x2432xbf16, #tpu.memory_space<vmem>>, %arg3: memref<26x384xf32, #tpu.memory_space<vmem>>, %arg4: memref<1x2x128xf32, #tpu.memory_space<vmem>>) attributes {dimension_semantics = [#tpu.dimension_semantics<parallel>], iteration_bounds = array<i64: 1>, scalar_prefetch = 0 : i64, scratch_operands = 0 : i64, tpu.core_type = #tpu.core_type<tc>, window_params = [{transform_indices = @transform_0, window_bounds = array<i64: 1, 2, 8, 128>}, {pipeline_mode = #tpu.pipeline_mode<synchronous>, transform_indices = @transform_1, window_bounds = array<i64: 128, 2432>}, {pipeline_mode = #tpu.pipeline_mode<synchronous>, transform_indices = @transform_2, window_bounds = array<i64: 26, 384>}, {transform_indices = @transform_3, window_bounds = array<i64: 1, 2, 128>}]} {
    %c0 = arith.constant 0 : index
    %c0_0 = arith.constant 0 : index
    %c0_1 = arith.constant 0 : index
    %c0_2 = arith.constant 0 : index
    %0 = vector.load %arg1[%c0, %c0_0, %c0_1, %c0_2] : memref<1x2x8x128xf32, #tpu.memory_space<vmem>>, vector<1x2x8x128xf32>
    %1 = vector.shape_cast %0 : vector<1x2x8x128xf32> to vector<2x8x128xf32>
    %2 = vector.shape_cast %1 : vector<2x8x128xf32> to vector<16x128xf32>
    %3 = arith.truncf %2 : vector<16x128xf32> to vector<16x128xbf16>
    %c0_3 = arith.constant 0 : index
    %c0_4 = arith.constant 0 : index
    %4 = vector.load %arg2[%c0_3, %c0_4] : memref<128x2432xbf16, #tpu.memory_space<vmem>>, vector<128x128xbf16>
    %cst = arith.constant dense<0.000000e+00> : vector<16x128xf32>
    %5 = tpu.matmul %3, %4, %cst {dimension_numbers = #tpu.dot_dimension_numbers<[1], [0], [0], [1], [0, 0, 1, 1], [], []>} : vector<16x128xbf16>, vector<128x128xbf16>, vector<16x128xf32> -> vector<16x128xf32>
    %c0_5 = arith.constant 0 : index
    %c0_6 = arith.constant 0 : index
    %6 = vector.load %arg3[%c0_5, %c0_6] : memref<26x384xf32, #tpu.memory_space<vmem>>, vector<8x128xf32>
    %7 = vector.shape_cast %5 : vector<16x128xf32> to vector<2x8x128xf32>
    %8 = vector.shape_cast %6 : vector<8x128xf32> to vector<1x8x128xf32>
    %9 = vector.broadcast %8 : vector<1x8x128xf32> to vector<2x8x128xf32>
    %10 = arith.addf %7, %9 : vector<2x8x128xf32>
    %11 = vector.shape_cast %10 : vector<2x8x128xf32> to vector<16x128xf32>
    %c0_7 = arith.constant 0 : index
    %c128 = arith.constant 128 : index
    %12 = vector.load %arg2[%c0_7, %c128] : memref<128x2432xbf16, #tpu.memory_space<vmem>>, vector<128x384xbf16>
    %c0_8 = arith.constant 0 : index
    %c512 = arith.constant 512 : index
    %13 = vector.load %arg2[%c0_8, %c512] : memref<128x2432xbf16, #tpu.memory_space<vmem>>, vector<128x128xbf16>
    %c0_9 = arith.constant 0 : index
    %c640 = arith.constant 640 : index
    %14 = vector.load %arg2[%c0_9, %c640] : memref<128x2432xbf16, #tpu.memory_space<vmem>>, vector<128x256xbf16>
    %c8 = arith.constant 8 : index
    %c0_10 = arith.constant 0 : index
    %15 = vector.load %arg3[%c8, %c0_10] : memref<26x384xf32, #tpu.memory_space<vmem>>, vector<1x384xf32>
    %c9 = arith.constant 9 : index
    %c0_11 = arith.constant 0 : index
    %16 = vector.load %arg3[%c9, %c0_11] : memref<26x384xf32, #tpu.memory_space<vmem>>, vector<1x128xf32>
    %c10 = arith.constant 10 : index
    %c0_12 = arith.constant 0 : index
    %17 = vector.load %arg3[%c10, %c0_12] : memref<26x384xf32, #tpu.memory_space<vmem>>, vector<1x128xf32>
    %c11 = arith.constant 11 : index
    %c0_13 = arith.constant 0 : index
    %18 = vector.load %arg3[%c11, %c0_13] : memref<26x384xf32, #tpu.memory_space<vmem>>, vector<1x128xf32>
    %c12 = arith.constant 12 : index
    %c0_14 = arith.constant 0 : index
    %19 = vector.load %arg3[%c12, %c0_14] : memref<26x384xf32, #tpu.memory_space<vmem>>, vector<1x256xf32>
    %c13 = arith.constant 13 : index
    %c0_15 = arith.constant 0 : index
    %20 = vector.load %arg3[%c13, %c0_15] : memref<26x384xf32, #tpu.memory_space<vmem>>, vector<1x128xf32>
    %c14 = arith.constant 14 : index
    %c0_16 = arith.constant 0 : index
    %21 = vector.load %arg3[%c14, %c0_16] : memref<26x384xf32, #tpu.memory_space<vmem>>, vector<1x128xf32>
    %c15 = arith.constant 15 : index
    %c0_17 = arith.constant 0 : index
    %22 = vector.load %arg3[%c15, %c0_17] : memref<26x384xf32, #tpu.memory_space<vmem>>, vector<1x128xf32>
    %23 = arith.truncf %11 : vector<16x128xf32> to vector<16x128xbf16>
    %cst_18 = arith.constant dense<0.000000e+00> : vector<16x384xf32>
    %24 = tpu.matmul %23, %12, %cst_18 {dimension_numbers = #tpu.dot_dimension_numbers<[1], [0], [0], [1], [0, 0, 1, 1], [], []>} : vector<16x128xbf16>, vector<128x384xbf16>, vector<16x384xf32> -> vector<16x384xf32>
    %25 = vector.broadcast %15 : vector<1x384xf32> to vector<16x384xf32>
    %26 = arith.addf %24, %25 : vector<16x384xf32>
    %27 = vector.extract_strided_slice %26 {offsets = [0, 0], sizes = [16, 128], strides = [1, 1]} : vector<16x384xf32> to vector<16x128xf32>
    %cst_19 = arith.constant 0.176776692 : f32
    %28 = vector.broadcast %cst_19 : f32 to vector<16x128xf32>
    %29 = arith.mulf %27, %28 : vector<16x128xf32>
    %30 = vector.extract_strided_slice %26 {offsets = [0, 128], sizes = [16, 128], strides = [1, 1]} : vector<16x384xf32> to vector<16x128xf32>
    %31 = vector.extract_strided_slice %26 {offsets = [0, 256], sizes = [16, 128], strides = [1, 1]} : vector<16x384xf32> to vector<16x128xf32>
    %32 = vector.shape_cast %29 : vector<16x128xf32> to vector<2x8x128xf32>
    %33 = vector.extract_strided_slice %32 {offsets = [0, 0, 0], sizes = [2, 8, 32], strides = [1, 1, 1]} : vector<2x8x128xf32> to vector<2x8x32xf32>
    %34 = vector.extract_strided_slice %32 {offsets = [0, 0, 32], sizes = [2, 8, 32], strides = [1, 1, 1]} : vector<2x8x128xf32> to vector<2x8x32xf32>
    %35 = vector.extract_strided_slice %32 {offsets = [0, 0, 64], sizes = [2, 8, 32], strides = [1, 1, 1]} : vector<2x8x128xf32> to vector<2x8x32xf32>
    %36 = vector.extract_strided_slice %32 {offsets = [0, 0, 96], sizes = [2, 8, 32], strides = [1, 1, 1]} : vector<2x8x128xf32> to vector<2x8x32xf32>
    %37 = tpu.concatenate %33, %34, %35, %36 in 0 : vector<2x8x32xf32>, vector<2x8x32xf32>, vector<2x8x32xf32>, vector<2x8x32xf32> -> vector<8x8x32xf32>
    %38 = arith.truncf %37 : vector<8x8x32xf32> to vector<8x8x32xbf16>
    %39 = vector.shape_cast %30 : vector<16x128xf32> to vector<2x8x128xf32>
    %40 = vector.extract_strided_slice %39 {offsets = [0, 0, 0], sizes = [2, 8, 32], strides = [1, 1, 1]} : vector<2x8x128xf32> to vector<2x8x32xf32>
    %41 = vector.extract_strided_slice %39 {offsets = [0, 0, 32], sizes = [2, 8, 32], strides = [1, 1, 1]} : vector<2x8x128xf32> to vector<2x8x32xf32>
    %42 = vector.extract_strided_slice %39 {offsets = [0, 0, 64], sizes = [2, 8, 32], strides = [1, 1, 1]} : vector<2x8x128xf32> to vector<2x8x32xf32>
    %43 = vector.extract_strided_slice %39 {offsets = [0, 0, 96], sizes = [2, 8, 32], strides = [1, 1, 1]} : vector<2x8x128xf32> to vector<2x8x32xf32>
    %44 = tpu.concatenate %40, %41, %42, %43 in 0 : vector<2x8x32xf32>, vector<2x8x32xf32>, vector<2x8x32xf32>, vector<2x8x32xf32> -> vector<8x8x32xf32>
    %45 = arith.truncf %44 : vector<8x8x32xf32> to vector<8x8x32xbf16>
    %46 = vector.shape_cast %31 : vector<16x128xf32> to vector<2x8x128xf32>
    %47 = vector.extract_strided_slice %46 {offsets = [0, 0, 0], sizes = [2, 8, 32], strides = [1, 1, 1]} : vector<2x8x128xf32> to vector<2x8x32xf32>
    %48 = vector.extract_strided_slice %46 {offsets = [0, 0, 32], sizes = [2, 8, 32], strides = [1, 1, 1]} : vector<2x8x128xf32> to vector<2x8x32xf32>
    %49 = vector.extract_strided_slice %46 {offsets = [0, 0, 64], sizes = [2, 8, 32], strides = [1, 1, 1]} : vector<2x8x128xf32> to vector<2x8x32xf32>
    %50 = vector.extract_strided_slice %46 {offsets = [0, 0, 96], sizes = [2, 8, 32], strides = [1, 1, 1]} : vector<2x8x128xf32> to vector<2x8x32xf32>
    %51 = tpu.concatenate %47, %48, %49, %50 in 0 : vector<2x8x32xf32>, vector<2x8x32xf32>, vector<2x8x32xf32>, vector<2x8x32xf32> -> vector<8x8x32xf32>
    %52 = arith.truncf %51 : vector<8x8x32xf32> to vector<8x8x32xbf16>
    "tpu.trace_start"() <{level = 10 : i32, message = "bqd,bkd->bqk"}> : () -> ()
    %cst_20 = arith.constant dense<0.000000e+00> : vector<8x8x8xf32>
    %53 = tpu.matmul %38, %45, %cst_20 {dimension_numbers = #tpu.dot_dimension_numbers<[2], [2], [1], [1], [0, 0, 0, 1, 1, 1], [0], [0]>} : vector<8x8x32xbf16>, vector<8x8x32xbf16>, vector<8x8x8xf32> -> vector<8x8x8xf32>
    "tpu.trace_stop"() : () -> ()
    %cst_21 = arith.constant dense<0xFF800000> : vector<8x8xf32>
    %54 = vector.multi_reduction <maximumf>, %53, %cst_21 [2] : vector<8x8x8xf32> to vector<8x8xf32>
    %55 = vector.shape_cast %54 : vector<8x8xf32> to vector<8x8x1xf32>
    %56 = vector.broadcast %55 : vector<8x8x1xf32> to vector<8x8x8xf32>
    %57 = arith.subf %53, %56 : vector<8x8x8xf32>
    %58 = math.exp %57 : vector<8x8x8xf32>
    %cst_22 = arith.constant dense<0.000000e+00> : vector<8x8xf32>
    %59 = vector.multi_reduction <add>, %58, %cst_22 [2] : vector<8x8x8xf32> to vector<8x8xf32>
    %60 = vector.shape_cast %59 : vector<8x8xf32> to vector<8x8x1xf32>
    %61 = tpu.reciprocal %60 {approx = true} : vector<8x8x1xf32> -> vector<8x8x1xf32>
    %62 = vector.broadcast %61 : vector<8x8x1xf32> to vector<8x8x8xf32>
    %63 = arith.mulf %58, %62 : vector<8x8x8xf32>
    %64 = arith.truncf %63 : vector<8x8x8xf32> to vector<8x8x8xbf16>
    "tpu.trace_start"() <{level = 10 : i32, message = "bqk,bkd->bqd"}> : () -> ()
    %cst_23 = arith.constant dense<0.000000e+00> : vector<8x8x32xf32>
    %65 = tpu.matmul %64, %52, %cst_23 {dimension_numbers = #tpu.dot_dimension_numbers<[2], [1], [1], [2], [0, 0, 0, 1, 1, 2], [0], [0]>} : vector<8x8x8xbf16>, vector<8x8x32xbf16>, vector<8x8x32xf32> -> vector<8x8x32xf32>
    "tpu.trace_stop"() : () -> ()
    %66 = vector.extract_strided_slice %65 {offsets = [0, 0, 0], sizes = [2, 8, 32], strides = [1, 1, 1]} : vector<8x8x32xf32> to vector<2x8x32xf32>
    %67 = vector.extract_strided_slice %65 {offsets = [2, 0, 0], sizes = [2, 8, 32], strides = [1, 1, 1]} : vector<8x8x32xf32> to vector<2x8x32xf32>
    %68 = vector.extract_strided_slice %65 {offsets = [4, 0, 0], sizes = [2, 8, 32], strides = [1, 1, 1]} : vector<8x8x32xf32> to vector<2x8x32xf32>
    %69 = vector.extract_strided_slice %65 {offsets = [6, 0, 0], sizes = [2, 8, 32], strides = [1, 1, 1]} : vector<8x8x32xf32> to vector<2x8x32xf32>
    %70 = tpu.concatenate %66, %67, %68, %69 in 2 : vector<2x8x32xf32>, vector<2x8x32xf32>, vector<2x8x32xf32>, vector<2x8x32xf32> -> vector<2x8x128xf32>
    %71 = vector.shape_cast %70 : vector<2x8x128xf32> to vector<16x128xf32>
    %72 = arith.truncf %71 : vector<16x128xf32> to vector<16x128xbf16>
    %cst_24 = arith.constant dense<0.000000e+00> : vector<16x128xf32>
    %73 = tpu.matmul %72, %13, %cst_24 {dimension_numbers = #tpu.dot_dimension_numbers<[1], [0], [0], [1], [0, 0, 1, 1], [], []>} : vector<16x128xbf16>, vector<128x128xbf16>, vector<16x128xf32> -> vector<16x128xf32>
    %74 = vector.broadcast %16 : vector<1x128xf32> to vector<16x128xf32>
    %75 = arith.addf %73, %74 : vector<16x128xf32>
    %76 = arith.addf %11, %75 : vector<16x128xf32>
    %cst_25 = arith.constant dense<0.000000e+00> : vector<16xf32>
    %77 = vector.multi_reduction <add>, %76, %cst_25 [1] : vector<16x128xf32> to vector<16xf32>
    %78 = vector.shape_cast %77 : vector<16xf32> to vector<16x1xf32>
    %cst_26 = arith.constant 1.280000e+02 : f32
    %79 = vector.broadcast %cst_26 : f32 to vector<16x1xf32>
    %80 = arith.divf %78, %79 : vector<16x1xf32>
    %81 = vector.broadcast %80 : vector<16x1xf32> to vector<16x128xf32>
    %82 = arith.subf %76, %81 : vector<16x128xf32>
    %83 = arith.mulf %82, %82 : vector<16x128xf32>
    %cst_27 = arith.constant dense<0.000000e+00> : vector<16xf32>
    %84 = vector.multi_reduction <add>, %83, %cst_27 [1] : vector<16x128xf32> to vector<16xf32>
    %85 = vector.shape_cast %84 : vector<16xf32> to vector<16x1xf32>
    %cst_28 = arith.constant 1.280000e+02 : f32
    %86 = vector.broadcast %cst_28 : f32 to vector<16x1xf32>
    %87 = arith.divf %85, %86 : vector<16x1xf32>
    %cst_29 = arith.constant 9.99999974E-6 : f32
    %88 = vector.broadcast %cst_29 : f32 to vector<16x1xf32>
    %89 = arith.addf %87, %88 : vector<16x1xf32>
    %90 = math.rsqrt %89 : vector<16x1xf32>
    %91 = vector.broadcast %90 : vector<16x1xf32> to vector<16x128xf32>
    %92 = arith.mulf %82, %91 : vector<16x128xf32>
    %93 = vector.broadcast %17 : vector<1x128xf32> to vector<16x128xf32>
    %94 = arith.mulf %92, %93 : vector<16x128xf32>
    %95 = vector.broadcast %18 : vector<1x128xf32> to vector<16x128xf32>
    %96 = arith.addf %94, %95 : vector<16x128xf32>
    %97 = arith.truncf %96 : vector<16x128xf32> to vector<16x128xbf16>
    %cst_30 = arith.constant dense<0.000000e+00> : vector<16x256xf32>
    %98 = tpu.matmul %97, %14, %cst_30 {dimension_numbers = #tpu.dot_dimension_numbers<[1], [0], [0], [1], [0, 0, 1, 1], [], []>} : vector<16x128xbf16>, vector<128x256xbf16>, vector<16x256xf32> -> vector<16x256xf32>
    %99 = vector.broadcast %19 : vector<1x256xf32> to vector<16x256xf32>
    %100 = arith.addf %98, %99 : vector<16x256xf32>
    %cst_31 = arith.constant 0.000000e+00 : f32
    %101 = vector.broadcast %cst_31 : f32 to vector<16x256xf32>
    %102 = arith.maximumf %100, %101 : vector<16x256xf32>
    %103 = arith.truncf %102 : vector<16x256xf32> to vector<16x256xbf16>
    %104 = vector.extract_strided_slice %103 {offsets = [0, 0], sizes = [16, 128], strides = [1, 1]} : vector<16x256xbf16> to vector<16x128xbf16>
    %c0_32 = arith.constant 0 : index
    %c896 = arith.constant 896 : index
    %105 = vector.load %arg2[%c0_32, %c896] : memref<128x2432xbf16, #tpu.memory_space<vmem>>, vector<128x128xbf16>
    %cst_33 = arith.constant dense<0.000000e+00> : vector<16x128xf32>
    %106 = tpu.matmul %104, %105, %cst_33 {dimension_numbers = #tpu.dot_dimension_numbers<[1], [0], [0], [1], [0, 0, 1, 1], [], []>} : vector<16x128xbf16>, vector<128x128xbf16>, vector<16x128xf32> -> vector<16x128xf32>
    %107 = vector.broadcast %20 : vector<1x128xf32> to vector<16x128xf32>
    %108 = arith.addf %107, %106 : vector<16x128xf32>
    %109 = vector.extract_strided_slice %103 {offsets = [0, 128], sizes = [16, 128], strides = [1, 1]} : vector<16x256xbf16> to vector<16x128xbf16>
    %c0_34 = arith.constant 0 : index
    %c1024 = arith.constant 1024 : index
    %110 = vector.load %arg2[%c0_34, %c1024] : memref<128x2432xbf16, #tpu.memory_space<vmem>>, vector<128x128xbf16>
    %cst_35 = arith.constant dense<0.000000e+00> : vector<16x128xf32>
    %111 = tpu.matmul %109, %110, %cst_35 {dimension_numbers = #tpu.dot_dimension_numbers<[1], [0], [0], [1], [0, 0, 1, 1], [], []>} : vector<16x128xbf16>, vector<128x128xbf16>, vector<16x128xf32> -> vector<16x128xf32>
    %112 = arith.addf %108, %111 : vector<16x128xf32>
    %113 = arith.addf %96, %112 : vector<16x128xf32>
    %cst_36 = arith.constant dense<0.000000e+00> : vector<16xf32>
    %114 = vector.multi_reduction <add>, %113, %cst_36 [1] : vector<16x128xf32> to vector<16xf32>
    %115 = vector.shape_cast %114 : vector<16xf32> to vector<16x1xf32>
    %cst_37 = arith.constant 1.280000e+02 : f32
    %116 = vector.broadcast %cst_37 : f32 to vector<16x1xf32>
    %117 = arith.divf %115, %116 : vector<16x1xf32>
    %118 = vector.broadcast %117 : vector<16x1xf32> to vector<16x128xf32>
    %119 = arith.subf %113, %118 : vector<16x128xf32>
    %120 = arith.mulf %119, %119 : vector<16x128xf32>
    %cst_38 = arith.constant dense<0.000000e+00> : vector<16xf32>
    %121 = vector.multi_reduction <add>, %120, %cst_38 [1] : vector<16x128xf32> to vector<16xf32>
    %122 = vector.shape_cast %121 : vector<16xf32> to vector<16x1xf32>
    %cst_39 = arith.constant 1.280000e+02 : f32
    %123 = vector.broadcast %cst_39 : f32 to vector<16x1xf32>
    %124 = arith.divf %122, %123 : vector<16x1xf32>
    %cst_40 = arith.constant 9.99999974E-6 : f32
    %125 = vector.broadcast %cst_40 : f32 to vector<16x1xf32>
    %126 = arith.addf %124, %125 : vector<16x1xf32>
    %127 = math.rsqrt %126 : vector<16x1xf32>
    %128 = vector.broadcast %127 : vector<16x1xf32> to vector<16x128xf32>
    %129 = arith.mulf %119, %128 : vector<16x128xf32>
    %130 = vector.broadcast %21 : vector<1x128xf32> to vector<16x128xf32>
    %131 = arith.mulf %129, %130 : vector<16x128xf32>
    %132 = vector.broadcast %22 : vector<1x128xf32> to vector<16x128xf32>
    %133 = arith.addf %131, %132 : vector<16x128xf32>
    %c0_41 = arith.constant 0 : index
    %c1152 = arith.constant 1152 : index
    %134 = vector.load %arg2[%c0_41, %c1152] : memref<128x2432xbf16, #tpu.memory_space<vmem>>, vector<128x384xbf16>
    %c0_42 = arith.constant 0 : index
    %c1536 = arith.constant 1536 : index
    %135 = vector.load %arg2[%c0_42, %c1536] : memref<128x2432xbf16, #tpu.memory_space<vmem>>, vector<128x128xbf16>
    %c0_43 = arith.constant 0 : index
    %c1664 = arith.constant 1664 : index
    %136 = vector.load %arg2[%c0_43, %c1664] : memref<128x2432xbf16, #tpu.memory_space<vmem>>, vector<128x256xbf16>
    %c16 = arith.constant 16 : index
    %c0_44 = arith.constant 0 : index
    %137 = vector.load %arg3[%c16, %c0_44] : memref<26x384xf32, #tpu.memory_space<vmem>>, vector<1x384xf32>
    %c17 = arith.constant 17 : index
    %c0_45 = arith.constant 0 : index
    %138 = vector.load %arg3[%c17, %c0_45] : memref<26x384xf32, #tpu.memory_space<vmem>>, vector<1x128xf32>
    %c18 = arith.constant 18 : index
    %c0_46 = arith.constant 0 : index
    %139 = vector.load %arg3[%c18, %c0_46] : memref<26x384xf32, #tpu.memory_space<vmem>>, vector<1x128xf32>
    %c19 = arith.constant 19 : index
    %c0_47 = arith.constant 0 : index
    %140 = vector.load %arg3[%c19, %c0_47] : memref<26x384xf32, #tpu.memory_space<vmem>>, vector<1x128xf32>
    %c20 = arith.constant 20 : index
    %c0_48 = arith.constant 0 : index
    %141 = vector.load %arg3[%c20, %c0_48] : memref<26x384xf32, #tpu.memory_space<vmem>>, vector<1x256xf32>
    %c21 = arith.constant 21 : index
    %c0_49 = arith.constant 0 : index
    %142 = vector.load %arg3[%c21, %c0_49] : memref<26x384xf32, #tpu.memory_space<vmem>>, vector<1x128xf32>
    %c22 = arith.constant 22 : index
    %c0_50 = arith.constant 0 : index
    %143 = vector.load %arg3[%c22, %c0_50] : memref<26x384xf32, #tpu.memory_space<vmem>>, vector<1x128xf32>
    %c23 = arith.constant 23 : index
    %c0_51 = arith.constant 0 : index
    %144 = vector.load %arg3[%c23, %c0_51] : memref<26x384xf32, #tpu.memory_space<vmem>>, vector<1x128xf32>
    %145 = arith.truncf %133 : vector<16x128xf32> to vector<16x128xbf16>
    %cst_52 = arith.constant dense<0.000000e+00> : vector<16x384xf32>
    %146 = tpu.matmul %145, %134, %cst_52 {dimension_numbers = #tpu.dot_dimension_numbers<[1], [0], [0], [1], [0, 0, 1, 1], [], []>} : vector<16x128xbf16>, vector<128x384xbf16>, vector<16x384xf32> -> vector<16x384xf32>
    %147 = vector.broadcast %137 : vector<1x384xf32> to vector<16x384xf32>
    %148 = arith.addf %146, %147 : vector<16x384xf32>
    %149 = vector.extract_strided_slice %148 {offsets = [0, 0], sizes = [16, 128], strides = [1, 1]} : vector<16x384xf32> to vector<16x128xf32>
    %cst_53 = arith.constant 0.176776692 : f32
    %150 = vector.broadcast %cst_53 : f32 to vector<16x128xf32>
    %151 = arith.mulf %149, %150 : vector<16x128xf32>
    %152 = vector.extract_strided_slice %148 {offsets = [0, 128], sizes = [16, 128], strides = [1, 1]} : vector<16x384xf32> to vector<16x128xf32>
    %153 = vector.extract_strided_slice %148 {offsets = [0, 256], sizes = [16, 128], strides = [1, 1]} : vector<16x384xf32> to vector<16x128xf32>
    %154 = vector.shape_cast %151 : vector<16x128xf32> to vector<2x8x128xf32>
    %155 = vector.extract_strided_slice %154 {offsets = [0, 0, 0], sizes = [2, 8, 32], strides = [1, 1, 1]} : vector<2x8x128xf32> to vector<2x8x32xf32>
    %156 = vector.extract_strided_slice %154 {offsets = [0, 0, 32], sizes = [2, 8, 32], strides = [1, 1, 1]} : vector<2x8x128xf32> to vector<2x8x32xf32>
    %157 = vector.extract_strided_slice %154 {offsets = [0, 0, 64], sizes = [2, 8, 32], strides = [1, 1, 1]} : vector<2x8x128xf32> to vector<2x8x32xf32>
    %158 = vector.extract_strided_slice %154 {offsets = [0, 0, 96], sizes = [2, 8, 32], strides = [1, 1, 1]} : vector<2x8x128xf32> to vector<2x8x32xf32>
    %159 = tpu.concatenate %155, %156, %157, %158 in 0 : vector<2x8x32xf32>, vector<2x8x32xf32>, vector<2x8x32xf32>, vector<2x8x32xf32> -> vector<8x8x32xf32>
    %160 = arith.truncf %159 : vector<8x8x32xf32> to vector<8x8x32xbf16>
    %161 = vector.shape_cast %152 : vector<16x128xf32> to vector<2x8x128xf32>
    %162 = vector.extract_strided_slice %161 {offsets = [0, 0, 0], sizes = [2, 8, 32], strides = [1, 1, 1]} : vector<2x8x128xf32> to vector<2x8x32xf32>
    %163 = vector.extract_strided_slice %161 {offsets = [0, 0, 32], sizes = [2, 8, 32], strides = [1, 1, 1]} : vector<2x8x128xf32> to vector<2x8x32xf32>
    %164 = vector.extract_strided_slice %161 {offsets = [0, 0, 64], sizes = [2, 8, 32], strides = [1, 1, 1]} : vector<2x8x128xf32> to vector<2x8x32xf32>
    %165 = vector.extract_strided_slice %161 {offsets = [0, 0, 96], sizes = [2, 8, 32], strides = [1, 1, 1]} : vector<2x8x128xf32> to vector<2x8x32xf32>
    %166 = tpu.concatenate %162, %163, %164, %165 in 0 : vector<2x8x32xf32>, vector<2x8x32xf32>, vector<2x8x32xf32>, vector<2x8x32xf32> -> vector<8x8x32xf32>
    %167 = arith.truncf %166 : vector<8x8x32xf32> to vector<8x8x32xbf16>
    %168 = vector.shape_cast %153 : vector<16x128xf32> to vector<2x8x128xf32>
    %169 = vector.extract_strided_slice %168 {offsets = [0, 0, 0], sizes = [2, 8, 32], strides = [1, 1, 1]} : vector<2x8x128xf32> to vector<2x8x32xf32>
    %170 = vector.extract_strided_slice %168 {offsets = [0, 0, 32], sizes = [2, 8, 32], strides = [1, 1, 1]} : vector<2x8x128xf32> to vector<2x8x32xf32>
    %171 = vector.extract_strided_slice %168 {offsets = [0, 0, 64], sizes = [2, 8, 32], strides = [1, 1, 1]} : vector<2x8x128xf32> to vector<2x8x32xf32>
    %172 = vector.extract_strided_slice %168 {offsets = [0, 0, 96], sizes = [2, 8, 32], strides = [1, 1, 1]} : vector<2x8x128xf32> to vector<2x8x32xf32>
    %173 = tpu.concatenate %169, %170, %171, %172 in 0 : vector<2x8x32xf32>, vector<2x8x32xf32>, vector<2x8x32xf32>, vector<2x8x32xf32> -> vector<8x8x32xf32>
    %174 = arith.truncf %173 : vector<8x8x32xf32> to vector<8x8x32xbf16>
    "tpu.trace_start"() <{level = 10 : i32, message = "bqd,bkd->bqk"}> : () -> ()
    %cst_54 = arith.constant dense<0.000000e+00> : vector<8x8x8xf32>
    %175 = tpu.matmul %160, %167, %cst_54 {dimension_numbers = #tpu.dot_dimension_numbers<[2], [2], [1], [1], [0, 0, 0, 1, 1, 1], [0], [0]>} : vector<8x8x32xbf16>, vector<8x8x32xbf16>, vector<8x8x8xf32> -> vector<8x8x8xf32>
    "tpu.trace_stop"() : () -> ()
    %cst_55 = arith.constant dense<0xFF800000> : vector<8x8xf32>
    %176 = vector.multi_reduction <maximumf>, %175, %cst_55 [2] : vector<8x8x8xf32> to vector<8x8xf32>
    %177 = vector.shape_cast %176 : vector<8x8xf32> to vector<8x8x1xf32>
    %178 = vector.broadcast %177 : vector<8x8x1xf32> to vector<8x8x8xf32>
    %179 = arith.subf %175, %178 : vector<8x8x8xf32>
    %180 = math.exp %179 : vector<8x8x8xf32>
    %cst_56 = arith.constant dense<0.000000e+00> : vector<8x8xf32>
    %181 = vector.multi_reduction <add>, %180, %cst_56 [2] : vector<8x8x8xf32> to vector<8x8xf32>
    %182 = vector.shape_cast %181 : vector<8x8xf32> to vector<8x8x1xf32>
    %183 = tpu.reciprocal %182 {approx = true} : vector<8x8x1xf32> -> vector<8x8x1xf32>
    %184 = vector.broadcast %183 : vector<8x8x1xf32> to vector<8x8x8xf32>
    %185 = arith.mulf %180, %184 : vector<8x8x8xf32>
    %186 = arith.truncf %185 : vector<8x8x8xf32> to vector<8x8x8xbf16>
    "tpu.trace_start"() <{level = 10 : i32, message = "bqk,bkd->bqd"}> : () -> ()
    %cst_57 = arith.constant dense<0.000000e+00> : vector<8x8x32xf32>
    %187 = tpu.matmul %186, %174, %cst_57 {dimension_numbers = #tpu.dot_dimension_numbers<[2], [1], [1], [2], [0, 0, 0, 1, 1, 2], [0], [0]>} : vector<8x8x8xbf16>, vector<8x8x32xbf16>, vector<8x8x32xf32> -> vector<8x8x32xf32>
    "tpu.trace_stop"() : () -> ()
    %188 = vector.extract_strided_slice %187 {offsets = [0, 0, 0], sizes = [2, 8, 32], strides = [1, 1, 1]} : vector<8x8x32xf32> to vector<2x8x32xf32>
    %189 = vector.extract_strided_slice %187 {offsets = [2, 0, 0], sizes = [2, 8, 32], strides = [1, 1, 1]} : vector<8x8x32xf32> to vector<2x8x32xf32>
    %190 = vector.extract_strided_slice %187 {offsets = [4, 0, 0], sizes = [2, 8, 32], strides = [1, 1, 1]} : vector<8x8x32xf32> to vector<2x8x32xf32>
    %191 = vector.extract_strided_slice %187 {offsets = [6, 0, 0], sizes = [2, 8, 32], strides = [1, 1, 1]} : vector<8x8x32xf32> to vector<2x8x32xf32>
    %192 = tpu.concatenate %188, %189, %190, %191 in 2 : vector<2x8x32xf32>, vector<2x8x32xf32>, vector<2x8x32xf32>, vector<2x8x32xf32> -> vector<2x8x128xf32>
    %193 = vector.shape_cast %192 : vector<2x8x128xf32> to vector<16x128xf32>
    %194 = arith.truncf %193 : vector<16x128xf32> to vector<16x128xbf16>
    %cst_58 = arith.constant dense<0.000000e+00> : vector<16x128xf32>
    %195 = tpu.matmul %194, %135, %cst_58 {dimension_numbers = #tpu.dot_dimension_numbers<[1], [0], [0], [1], [0, 0, 1, 1], [], []>} : vector<16x128xbf16>, vector<128x128xbf16>, vector<16x128xf32> -> vector<16x128xf32>
    %196 = vector.broadcast %138 : vector<1x128xf32> to vector<16x128xf32>
    %197 = arith.addf %195, %196 : vector<16x128xf32>
    %198 = arith.addf %133, %197 : vector<16x128xf32>
    %cst_59 = arith.constant dense<0.000000e+00> : vector<16xf32>
    %199 = vector.multi_reduction <add>, %198, %cst_59 [1] : vector<16x128xf32> to vector<16xf32>
    %200 = vector.shape_cast %199 : vector<16xf32> to vector<16x1xf32>
    %cst_60 = arith.constant 1.280000e+02 : f32
    %201 = vector.broadcast %cst_60 : f32 to vector<16x1xf32>
    %202 = arith.divf %200, %201 : vector<16x1xf32>
    %203 = vector.broadcast %202 : vector<16x1xf32> to vector<16x128xf32>
    %204 = arith.subf %198, %203 : vector<16x128xf32>
    %205 = arith.mulf %204, %204 : vector<16x128xf32>
    %cst_61 = arith.constant dense<0.000000e+00> : vector<16xf32>
    %206 = vector.multi_reduction <add>, %205, %cst_61 [1] : vector<16x128xf32> to vector<16xf32>
    %207 = vector.shape_cast %206 : vector<16xf32> to vector<16x1xf32>
    %cst_62 = arith.constant 1.280000e+02 : f32
    %208 = vector.broadcast %cst_62 : f32 to vector<16x1xf32>
    %209 = arith.divf %207, %208 : vector<16x1xf32>
    %cst_63 = arith.constant 9.99999974E-6 : f32
    %210 = vector.broadcast %cst_63 : f32 to vector<16x1xf32>
    %211 = arith.addf %209, %210 : vector<16x1xf32>
    %212 = math.rsqrt %211 : vector<16x1xf32>
    %213 = vector.broadcast %212 : vector<16x1xf32> to vector<16x128xf32>
    %214 = arith.mulf %204, %213 : vector<16x128xf32>
    %215 = vector.broadcast %139 : vector<1x128xf32> to vector<16x128xf32>
    %216 = arith.mulf %214, %215 : vector<16x128xf32>
    %217 = vector.broadcast %140 : vector<1x128xf32> to vector<16x128xf32>
    %218 = arith.addf %216, %217 : vector<16x128xf32>
    %219 = arith.truncf %218 : vector<16x128xf32> to vector<16x128xbf16>
    %cst_64 = arith.constant dense<0.000000e+00> : vector<16x256xf32>
    %220 = tpu.matmul %219, %136, %cst_64 {dimension_numbers = #tpu.dot_dimension_numbers<[1], [0], [0], [1], [0, 0, 1, 1], [], []>} : vector<16x128xbf16>, vector<128x256xbf16>, vector<16x256xf32> -> vector<16x256xf32>
    %221 = vector.broadcast %141 : vector<1x256xf32> to vector<16x256xf32>
    %222 = arith.addf %220, %221 : vector<16x256xf32>
    %cst_65 = arith.constant 0.000000e+00 : f32
    %223 = vector.broadcast %cst_65 : f32 to vector<16x256xf32>
    %224 = arith.maximumf %222, %223 : vector<16x256xf32>
    %225 = arith.truncf %224 : vector<16x256xf32> to vector<16x256xbf16>
    %226 = vector.extract_strided_slice %225 {offsets = [0, 0], sizes = [16, 128], strides = [1, 1]} : vector<16x256xbf16> to vector<16x128xbf16>
    %c0_66 = arith.constant 0 : index
    %c1920 = arith.constant 1920 : index
    %227 = vector.load %arg2[%c0_66, %c1920] : memref<128x2432xbf16, #tpu.memory_space<vmem>>, vector<128x128xbf16>
    %cst_67 = arith.constant dense<0.000000e+00> : vector<16x128xf32>
    %228 = tpu.matmul %226, %227, %cst_67 {dimension_numbers = #tpu.dot_dimension_numbers<[1], [0], [0], [1], [0, 0, 1, 1], [], []>} : vector<16x128xbf16>, vector<128x128xbf16>, vector<16x128xf32> -> vector<16x128xf32>
    %229 = vector.broadcast %142 : vector<1x128xf32> to vector<16x128xf32>
    %230 = arith.addf %229, %228 : vector<16x128xf32>
    %231 = vector.extract_strided_slice %225 {offsets = [0, 128], sizes = [16, 128], strides = [1, 1]} : vector<16x256xbf16> to vector<16x128xbf16>
    %c0_68 = arith.constant 0 : index
    %c2048 = arith.constant 2048 : index
    %232 = vector.load %arg2[%c0_68, %c2048] : memref<128x2432xbf16, #tpu.memory_space<vmem>>, vector<128x128xbf16>
    %cst_69 = arith.constant dense<0.000000e+00> : vector<16x128xf32>
    %233 = tpu.matmul %231, %232, %cst_69 {dimension_numbers = #tpu.dot_dimension_numbers<[1], [0], [0], [1], [0, 0, 1, 1], [], []>} : vector<16x128xbf16>, vector<128x128xbf16>, vector<16x128xf32> -> vector<16x128xf32>
    %234 = arith.addf %230, %233 : vector<16x128xf32>
    %235 = arith.addf %218, %234 : vector<16x128xf32>
    %cst_70 = arith.constant dense<0.000000e+00> : vector<16xf32>
    %236 = vector.multi_reduction <add>, %235, %cst_70 [1] : vector<16x128xf32> to vector<16xf32>
    %237 = vector.shape_cast %236 : vector<16xf32> to vector<16x1xf32>
    %cst_71 = arith.constant 1.280000e+02 : f32
    %238 = vector.broadcast %cst_71 : f32 to vector<16x1xf32>
    %239 = arith.divf %237, %238 : vector<16x1xf32>
    %240 = vector.broadcast %239 : vector<16x1xf32> to vector<16x128xf32>
    %241 = arith.subf %235, %240 : vector<16x128xf32>
    %242 = arith.mulf %241, %241 : vector<16x128xf32>
    %cst_72 = arith.constant dense<0.000000e+00> : vector<16xf32>
    %243 = vector.multi_reduction <add>, %242, %cst_72 [1] : vector<16x128xf32> to vector<16xf32>
    %244 = vector.shape_cast %243 : vector<16xf32> to vector<16x1xf32>
    %cst_73 = arith.constant 1.280000e+02 : f32
    %245 = vector.broadcast %cst_73 : f32 to vector<16x1xf32>
    %246 = arith.divf %244, %245 : vector<16x1xf32>
    %cst_74 = arith.constant 9.99999974E-6 : f32
    %247 = vector.broadcast %cst_74 : f32 to vector<16x1xf32>
    %248 = arith.addf %246, %247 : vector<16x1xf32>
    %249 = math.rsqrt %248 : vector<16x1xf32>
    %250 = vector.broadcast %249 : vector<16x1xf32> to vector<16x128xf32>
    %251 = arith.mulf %241, %250 : vector<16x128xf32>
    %252 = vector.broadcast %143 : vector<1x128xf32> to vector<16x128xf32>
    %253 = arith.mulf %251, %252 : vector<16x128xf32>
    %254 = vector.broadcast %144 : vector<1x128xf32> to vector<16x128xf32>
    %255 = arith.addf %253, %254 : vector<16x128xf32>
    %256 = vector.extract_strided_slice %255 {offsets = [7, 0], sizes = [1, 128], strides = [1, 1]} : vector<16x128xf32> to vector<1x128xf32>
    %257 = vector.extract_strided_slice %255 {offsets = [15, 0], sizes = [1, 128], strides = [1, 1]} : vector<16x128xf32> to vector<1x128xf32>
    %258 = tpu.concatenate %256, %257 in 0 : vector<1x128xf32>, vector<1x128xf32> -> vector<2x128xf32>
    %259 = arith.truncf %258 : vector<2x128xf32> to vector<2x128xbf16>
    %c0_75 = arith.constant 0 : index
    %c2176 = arith.constant 2176 : index
    %260 = vector.load %arg2[%c0_75, %c2176] : memref<128x2432xbf16, #tpu.memory_space<vmem>>, vector<128x128xbf16>
    %cst_76 = arith.constant dense<0.000000e+00> : vector<2x128xf32>
    %261 = tpu.matmul %259, %260, %cst_76 {dimension_numbers = #tpu.dot_dimension_numbers<[1], [0], [0], [1], [0, 0, 1, 1], [], []>} : vector<2x128xbf16>, vector<128x128xbf16>, vector<2x128xf32> -> vector<2x128xf32>
    %c24 = arith.constant 24 : index
    %c0_77 = arith.constant 0 : index
    %262 = vector.load %arg3[%c24, %c0_77] : memref<26x384xf32, #tpu.memory_space<vmem>>, vector<1x128xf32>
    %263 = vector.broadcast %262 : vector<1x128xf32> to vector<2x128xf32>
    %264 = arith.addf %261, %263 : vector<2x128xf32>
    %cst_78 = arith.constant 0.000000e+00 : f32
    %265 = vector.broadcast %cst_78 : f32 to vector<2x128xf32>
    %266 = arith.maximumf %264, %265 : vector<2x128xf32>
    %267 = arith.truncf %266 : vector<2x128xf32> to vector<2x128xbf16>
    %c0_79 = arith.constant 0 : index
    %c2304 = arith.constant 2304 : index
    %268 = vector.load %arg2[%c0_79, %c2304] : memref<128x2432xbf16, #tpu.memory_space<vmem>>, vector<128x128xbf16>
    %cst_80 = arith.constant dense<0.000000e+00> : vector<2x128xf32>
    %269 = tpu.matmul %267, %268, %cst_80 {dimension_numbers = #tpu.dot_dimension_numbers<[1], [0], [0], [1], [0, 0, 1, 1], [], []>} : vector<2x128xbf16>, vector<128x128xbf16>, vector<2x128xf32> -> vector<2x128xf32>
    %c25 = arith.constant 25 : index
    %c0_81 = arith.constant 0 : index
    %270 = vector.load %arg3[%c25, %c0_81] : memref<26x384xf32, #tpu.memory_space<vmem>>, vector<1x128xf32>
    %271 = vector.broadcast %270 : vector<1x128xf32> to vector<2x128xf32>
    %272 = arith.addf %269, %271 : vector<2x128xf32>
    %c0_82 = arith.constant 0 : index
    %c0_83 = arith.constant 0 : index
    %c0_84 = arith.constant 0 : index
    %273 = vector.load %arg4[%c0_82, %c0_83, %c0_84] : memref<1x2x128xf32, #tpu.memory_space<vmem>>, vector<1x2x128xf32>
    %274 = vector.shape_cast %273 : vector<1x2x128xf32> to vector<2x128xf32>
    %275 = vector.shape_cast %272 : vector<2x128xf32> to vector<1x2x128xf32>
    tpu.vector_store %arg4[%c0_82, %c0_83, %c0_84], %275 {strides = array<i32>} : memref<1x2x128xf32, #tpu.memory_space<vmem>>, vector<1x2x128xf32>,
    return
  }
  func.func @transform_0(%arg0: i32) -> (i32, i32, i32, i32) {
    %c0_i32 = arith.constant 0 : i32
    %c0_i32_0 = arith.constant 0 : i32
    %c0_i32_1 = arith.constant 0 : i32
    %c0_i32_2 = arith.constant 0 : i32
    return %arg0, %c0_i32, %c0_i32_0, %c0_i32_1 : i32, i32, i32, i32
  }
  func.func @transform_1(%arg0: i32) -> (i32, i32) {
    %c0_i32 = arith.constant 0 : i32
    %c0_i32_0 = arith.constant 0 : i32
    %c0_i32_1 = arith.constant 0 : i32
    return %c0_i32, %c0_i32_0 : i32, i32
  }
  func.func @transform_2(%arg0: i32) -> (i32, i32) {
    %c0_i32 = arith.constant 0 : i32
    %c0_i32_0 = arith.constant 0 : i32
    %c0_i32_1 = arith.constant 0 : i32
    return %c0_i32, %c0_i32_0 : i32, i32
  }
  func.func @transform_3(%arg0: i32) -> (i32, i32, i32) {
    %c0_i32 = arith.constant 0 : i32
    %c0_i32_0 = arith.constant 0 : i32
    %c0_i32_1 = arith.constant 0 : i32
    return %arg0, %c0_i32, %c0_i32_0 : i32, i32, i32
  }
}

</mosaic_0001>

<bundles_post_ra>
// kernel: tpu_custom_call.1
= control target key start
LH: loop header
LB: loop body
LE: loop exit
PB: predicated region body
PF: predicated region fallthrough
CT: control target
= control target key end

     0   :  { %8 = vsyncpa [#allocation3], 0  ;;  %s4195_s0 = inlined_call_operand.hbm [shape: f32[1,2,8,128], index: 0, kind: input, shape index: {}]   ;;  %s4196_s1 = inlined_call_operand.hbm [shape: bf16[128,2432], index: 1, kind: input, shape index: {}]   ;;  %s4197_s2 = inlined_call_operand.hbm [shape: f32[26,384], index: 2, kind: input, shape index: {}]   ;;  %s4198_s3 = inlined_call_operand.hbm [shape: f32[1,2,128], index: 3, kind: output, shape index: {}]  }
   0x1   :  { %9 = vsyncpa [#allocation6], 0  ;;  %s28_s14 = sshll.u32 %s4196_s1, 4  ;;  %s29_s14 = int_to_ptr.hbm [resolvable:$true] %s28_s14 }
   0x2   :  { %10 = vsyncpa [#allocation4], 0  ;;  %s3881_s15 = smov [#allocation5]   ;;  %s15_s19 = sshll.u32 %s4195_s0, 4  ;;  %s16_s19 = int_to_ptr.hbm [resolvable:$true] %s15_s19 }
   0x3   :  { %s30_s16 = sshll.u32 %s3881_s15, 4  ;;  %s3882_s20 = smov 1216   ;;  %s31_s16 = int_to_ptr.vmem [resolvable:$true] %s30_s16 }
   0x4   :  { %s3883_s21 = smov 76   ;;  %s3884_s22 = smov [#allocation2]  }
   0x5   :  { %36 = dma.hbm_to_vmem [thread:$0]  %s29_s14, 19456, %s31_s16, [#allocation6], %s3882_s20, %s3882_s20, %s3883_s21  }
   0x6   :  { %s17_s23 = sshll.u32 %s3884_s22, 4  ;;  %s3885_s24 = smov 128   ;;  %s18_s23 = int_to_ptr.vmem [resolvable:$true] %s17_s23 }
   0x7   :  { %s3886_s25 = smov 8   ;;  %s41_s27 = sshll.u32 %s4197_s2, 4  ;;  %s42_s27 = int_to_ptr.hbm [resolvable:$true] %s41_s27 }
   0x8   :  { %23 = dma.hbm_to_vmem [thread:$0]  %s16_s19, 256, %s18_s23, [#allocation3], %s3885_s24, %s3885_s24, %s3886_s25  }
   0x9   :  { %s3887_s28 = smov [#allocation7]   ;;  %s3888_s30 = smov 384  }
   0xa   :  { %s43_s29 = sshll.u32 %s3887_s28, 4  ;;  %s3889_s0 = smov 24   ;;  %s44_s29 = int_to_ptr.vmem [resolvable:$true] %s43_s29 }
   0xb   :  { %49 = dma.hbm_to_vmem [thread:$0]  %s42_s27, 1536, %s44_s29, [#allocation6], %s3888_s30, %s3888_s30, %s3889_s0  }
   0xc   :  { %3875 = dma.done.wait [#allocation3], 256  }
   0xd   :  { %3876 = vsyncadd [#allocation3], 4294967040 }
   0xe   :  { %3877 = dma.done.wait [#allocation6], 20992  }
   0xf   :  { %3878 = vsyncadd [#allocation6], 4294946304  ;;  %v2801_v0 = vld [vmem:[#allocation5 + $0x428] sm:$0xf]  ;;  %v3418_v1 = vld [vmem:[#allocation5 + $0x470] sm:$0xf0] }
  0x10   :  { %v2797_v2 = vld [vmem:[#allocation5 + $0x390] sm:$0xf]  ;;  %v2802_v3 = vor.u32 %v3418_v1, %v2801_v0  ;;  %v3417_v4 = vld [vmem:[#allocation5 + $0x3d8] sm:$0xf0]  ;;  %v2793_v6 = vld [vmem:[#allocation5 + $0x2f8] sm:$0xf] }
  0x11   :  { %v2798_v5 = vor.u32 %v3417_v4, %v2797_v2  ;;  %v3416_v7 = vld [vmem:[#allocation5 + $0x340] sm:$0xf0]  ;;  %v2789_v8 = vld [vmem:[#allocation5 + $0x260] sm:$0xf]  ;;  %v3415_v9 = vld [vmem:[#allocation5 + $0x2a8] sm:$0xf0] }
  0x12   :  { %130 = vmatpush.bf16.msra.mxu0 %v2802_v3  ;;  %v2889_v10 = vld [vmem:[#allocation5 + $0x42c] sm:$0xf]  ;;  %v3441_v11 = vld [vmem:[#allocation5 + $0x474] sm:$0xf0]  ;;  %v3440_v12 = vld [vmem:[#allocation5 + $0x430] sm:$0xf]  ;;  %v2794_v13 = vor.u32 %v3416_v7, %v2793_v6  ;;  %v2790_v32 = vor.u32 %v3415_v9, %v2789_v8 }
  0x13   :  { %v2890_v14 = vor.u32 %v3441_v11, %v2889_v10  ;;  %v2891_v15 = vld [vmem:[#allocation5 + $0x478] sm:$0xf0]  ;;  %v2897_v16 = vld [vmem:[#allocation5 + $0x434] sm:$0xf]  ;;  %v3442_v17 = vld [vmem:[#allocation5 + $0x47c] sm:$0xf0] }
  0x14   :  { %v2894_v18 = vor.u32 %v3440_v12, %v2891_v15  ;;  %v2898_v19 = vor.u32 %v3442_v17, %v2897_v16  ;;  %v2877_v20 = vld [vmem:[#allocation5 + $0x394] sm:$0xf]  ;;  %v3438_v21 = vld [vmem:[#allocation5 + $0x3dc] sm:$0xf0]  ;;  %v3437_v22 = vld [vmem:[#allocation5 + $0x398] sm:$0xf] }
  0x15   :  { %357 = vmatpush.bf16.msra.mxu1 %v2890_v14  ;;  %v2878_v23 = vor.u32 %v3438_v21, %v2877_v20  ;;  %v2879_v24 = vld [vmem:[#allocation5 + $0x3e0] sm:$0xf0]  ;;  %v2885_v25 = vld [vmem:[#allocation5 + $0x39c] sm:$0xf]  ;;  %v3439_v26 = vld [vmem:[#allocation5 + $0x3e4] sm:$0xf0] }
  0x16   :  { %131 = vmatpush.bf16.msra.mxu0 %v2798_v5  ;;  %371 = vmatpush.bf16.msra.mxu2 %v2894_v18  ;;  %v2882_v27 = vor.u32 %v3437_v22, %v2879_v24  ;;  %v2886_v28 = vor.u32 %v3439_v26, %v2885_v25  ;;  %v2865_v29 = vld [vmem:[#allocation5 + $0x2fc] sm:$0xf]  ;;  %v3435_v30 = vld [vmem:[#allocation5 + $0x344] sm:$0xf0]  ;;  %v3434_v31 = vld [vmem:[#allocation5 + $0x300] sm:$0xf] }
  0x17   :  { %385 = vmatpush.bf16.msra.mxu3 %v2898_v19  ;;  %v2867_v33 = vld [vmem:[#allocation5 + $0x348] sm:$0xf0]  ;;  %v2873_v34 = vld [vmem:[#allocation5 + $0x304] sm:$0xf]  ;;  %v3436_v35 = vld [vmem:[#allocation5 + $0x34c] sm:$0xf0]  ;;  %v2866_v38 = vor.u32 %v3435_v30, %v2865_v29 }
  0x18   :  { %v2785_v36 = vld [vmem:[#allocation5 + $0x1c8] sm:$0xf]  ;;  %v3414_v37 = vld [vmem:[#allocation5 + $0x210] sm:$0xf0]  ;;  %v2870_v39 = vor.u32 %v3434_v31, %v2867_v33  ;;  %v2874_v40 = vor.u32 %v3436_v35, %v2873_v34  ;;  %v2853_v41 = vld [vmem:[#allocation5 + $0x264] sm:$0xf] }
  0x19   :  { %358 = vmatpush.bf16.msra.mxu1 %v2878_v23  ;;  %v3432_v42 = vld [vmem:[#allocation5 + $0x2ac] sm:$0xf0]  ;;  %v3431_v43 = vld [vmem:[#allocation5 + $0x268] sm:$0xf]  ;;  %v2786_v44 = vor.u32 %v3414_v37, %v2785_v36  ;;  %v2855_v45 = vld [vmem:[#allocation5 + $0x2b0] sm:$0xf0] }
  0x1a   :  { %132 = vmatpush.bf16.msra.mxu0 %v2794_v13  ;;  %372 = vmatpush.bf16.msra.mxu2 %v2882_v27  ;;  %v2861_v46 = vld [vmem:[#allocation5 + $0x26c] sm:$0xf]  ;;  %v3433_v47 = vld [vmem:[#allocation5 + $0x2b4] sm:$0xf0]  ;;  %v2781_v48 = vld [vmem:[#allocation5 + $0x130] sm:$0xf]  ;;  %v2854_v50 = vor.u32 %v3432_v42, %v2853_v41  ;;  %v2858_v51 = vor.u32 %v3431_v43, %v2855_v45 }
  0x1b   :  { %386 = vmatpush.bf16.msra.mxu3 %v2886_v28  ;;  %v3413_v49 = vld [vmem:[#allocation5 + $0x178] sm:$0xf0]  ;;  %v2862_v52 = vor.u32 %v3433_v47, %v2861_v46  ;;  %v2841_v53 = vld [vmem:[#allocation5 + $0x1cc] sm:$0xf]  ;;  %v3429_v54 = vld [vmem:[#allocation5 + $0x214] sm:$0xf0] }
  0x1c   :  { %v3428_v55 = vld [vmem:[#allocation5 + $0x1d0] sm:$0xf]  ;;  %v2782_v56 = vor.u32 %v3413_v49, %v2781_v48  ;;  %v2843_v57 = vld [vmem:[#allocation5 + $0x218] sm:$0xf0]  ;;  %v2849_v58 = vld [vmem:[#allocation5 + $0x1d4] sm:$0xf]  ;;  %v2842_v62 = vor.u32 %v3429_v54, %v2841_v53 }
  0x1d   :  { %359 = vmatpush.bf16.msra.mxu1 %v2866_v38  ;;  %v3430_v59 = vld [vmem:[#allocation5 + $0x21c] sm:$0xf0]  ;;  %v2777_v60 = vld [vmem:[#allocation5 + $0x98] sm:$0xf]  ;;  %v3412_v61 = vld [vmem:[#allocation5 + $0xe0] sm:$0xf0]  ;;  %v2846_v63 = vor.u32 %v3428_v55, %v2843_v57 }
  0x1e   :  { %133 = vmatpush.bf16.msra.mxu0 %v2790_v32  ;;  %373 = vmatpush.bf16.msra.mxu2 %v2870_v39  ;;  %v2850_v0 = vor.u32 %v3430_v59, %v2849_v58  ;;  %v2778_v1 = vor.u32 %v3412_v61, %v2777_v60  ;;  %v2773_v2 = vld [vmem:[#allocation5] sm:$0xf]  ;;  %v3411_v3 = vld [vmem:[#allocation5 + $0x48] sm:$0xf0]  ;;  %v63_v5 = vld [vmem:[#allocation2] sm:$0xff]  ;;  %vm485_vm0 = vcmask 261120  }
  0x1f   :  { %387 = vmatpush.bf16.msra.mxu3 %v2874_v40  ;;  %v2774_v4 = vor.u32 %v3411_v3, %v2773_v2  ;;  %v64_v6 = vld [vmem:[#allocation2 + $0x8] sm:$0xff]  ;;  %v2829_v8 = vld [vmem:[#allocation5 + $0x134] sm:$0xf]  ;;  %v3426_v9 = vld [vmem:[#allocation5 + $0x17c] sm:$0xf0]  ;;  %s3890_s2 = smov 64  }
  0x20   :  { %v65_v7 = vpack.c.bf16 %v64_v6, %v63_v5  ;;  %v3425_v10 = vld [vmem:[#allocation5 + $0x138] sm:$0xf]  ;;  %v2830_v11 = vor.u32 %v3426_v9, %v2829_v8  ;;  %v2831_v12 = vld [vmem:[#allocation5 + $0x180] sm:$0xf0]  ;;  %v2837_v13 = vld [vmem:[#allocation5 + $0x13c] sm:$0xf] }
  0x21   :  { %360 = vmatpush.bf16.msra.mxu1 %v2854_v50  ;;  %v2834_v14 = vor.u32 %v3425_v10, %v2831_v12  ;;  %v3427_v15 = vld [vmem:[#allocation5 + $0x184] sm:$0xf0]  ;;  %v2817_v16 = vld [vmem:[#allocation5 + $0x9c] sm:$0xf]  ;;  %v3422_v20 = vld [vmem:[#allocation5 + $0xa0] sm:$0xf] }
  0x22   :  { %134 = vmatpush.bf16.msra.mxu0 %v2786_v44  ;;  %374 = vmatpush.bf16.msra.mxu2 %v2858_v51  ;;  %v3423_v17 = vld [vmem:[#allocation5 + $0xe4] sm:$0xf0]  ;;  %v2838_v18 = vor.u32 %v3427_v15, %v2837_v13  ;;  %v2819_v21 = vld [vmem:[#allocation5 + $0xe8] sm:$0xf0]  ;;  %v2825_v22 = vld [vmem:[#allocation5 + $0xa4] sm:$0xf] }
  0x23   :  { %388 = vmatpush.bf16.msra.mxu3 %v2862_v52  ;;  %v2818_v19 = vor.u32 %v3423_v17, %v2817_v16  ;;  %v2822_v23 = vor.u32 %v3422_v20, %v2819_v21  ;;  %v3424_v24 = vld [vmem:[#allocation5 + $0xec] sm:$0xf0]  ;;  %v2805_v26 = vld [vmem:[#allocation5 + $0x4] sm:$0xf]  ;;  %v3419_v28 = vld [vmem:[#allocation5 + $0x8] sm:$0xf] }
  0x24   :  { %v2826_v25 = vor.u32 %v3424_v24, %v2825_v22  ;;  %v3420_v27 = vld [vmem:[#allocation5 + $0x4c] sm:$0xf0]  ;;  %v2807_v30 = vld [vmem:[#allocation5 + $0x50] sm:$0xf0]  ;;  %v2813_v31 = vld [vmem:[#allocation5 + $0xc] sm:$0xf] }
  0x25   :  { %361 = vmatpush.bf16.msra.mxu1 %v2842_v62  ;;  %v2806_v29 = vor.u32 %v3420_v27, %v2805_v26  ;;  %v3421_v32 = vld [vmem:[#allocation5 + $0x54] sm:$0xf0]  ;;  %v2810_v33 = vor.u32 %v3419_v28, %v2807_v30  ;;  %v144_v36 = vld [vmem:[#allocation7] sm:$0xff]  ;;  %s3891_s4 = smov 32   ;;  %s3892_s5 = smov 96   ;;  %vm738_vm1 = vcmask 1043456  }
  0x26   :  { %135 = vmatpush.bf16.msra.mxu0 %v2782_v56  ;;  %375 = vmatpush.bf16.msra.mxu2 %v2846_v63  ;;  %v2814_v34 = vor.u32 %v3421_v32, %v2813_v31  ;;  %v212_v41 = vld [vmem:[#allocation7 + $0x18] ss:$8 sm:$0x7]  ;;  %vm638_vm2 = vcmask 64512   ;;  %vm914_vm3 = vcmask 523264   ;;  %vm917_vm4 = vcmask 785408  }
  0x27   :  { %389 = vmatpush.bf16.msra.mxu3 %v2850_v0  ;;  %v224_v43 = vperm.slane %v212_v41, 1  ;;  %v223_v44 = vperm.slane %v212_v41, 0  ;;  %v225_v51 = vperm.slane %v212_v41, 2  ;;  %s3894_s6 = smov [#allocation8]   ;;  %s2760_s10 = sshll.u32 %s4198_s3, 4  ;;  %s2761_s10 = int_to_ptr.hbm [resolvable:$true] %s2760_s10 }
  0x28   :  { %s2758_s7 = sshll.u32 %s3894_s6, 4  ;;  %s2759_s7 = int_to_ptr.vmem [resolvable:$true] %s2758_s7 }
  0x29   :  { %362 = vmatpush.bf16.msra.mxu1 %v2830_v11 }
  0x2a   :  { %136 = vmatpush.bf16.msra.mxu0 %v2778_v1  ;;  %376 = vmatpush.bf16.msra.mxu2 %v2834_v14 }
  0x2b   :  { %390 = vmatpush.bf16.msra.mxu3 %v2838_v18 }
  0x2d   :  { %363 = vmatpush.bf16.msra.mxu1 %v2818_v19 }
  0x2e   :  { %137 = vmatpush.bf16.msra.mxu0 %v2774_v4  ;;  %377 = vmatpush.bf16.msra.mxu2 %v2822_v23 }
  0x2f   :  { %391 = vmatpush.bf16.msra.mxu3 %v2826_v25 }
  0x31   :  { %138 = vmatmul.bf16.vlgmr.msra.gmra.mxu0 %v65_v7  ;;  %364 = vmatpush.bf16.msra.mxu1 %v2806_v29 }
  0x32   :  { %378 = vmatpush.bf16.msra.mxu2 %v2810_v33 }
  0x33   :  { %392 = vmatpush.bf16.msra.mxu3 %v2814_v34 }
  0xae   :  { %v139_v35 = vpop.f32.mrf.mxu0 }
  0xaf   :  { %v3924_v38 = vadd.f32 %v144_v36, %v139_v35 }
  0xb6   :  { %v141_v37 = vpop.f32.mrf.mxu0 }
  0xb7   :  { %v3926_v39 = vadd.f32 %v144_v36, %v141_v37 }
  0xb9   :  { %v221_v40 = vpack.c.bf16 %v3926_v39, %v3924_v38 }
  0xbb   :  { %365 = vmatmul.bf16.vlgmr.msra.gmra.mxu1 %v221_v40  ;;  %379 = vmatmul.bf16.vlgmr.msra.gmra.mxu2 %v221_v40 }
  0xbc   :  { %393 = vmatmul.bf16.vlgmr.msra.gmra.mxu3 %v221_v40 }
 0x138   :  { %v366_v42 = vpop.f32.mrf.mxu1 }
 0x139   :  { %v367_v49 = vadd.f32 %v366_v42, %v223_v44 }
 0x13b   :  { %v399_v53 = vmul.f32 0.17677669, %v367_v49 }
 0x13d   :  { %v421_v62 = vpack.c.bf16 %v399_v53, %v399_v53 }
 0x13e   :  { %v380_v45 = vpop.f32.mrf.mxu2 }
 0x13f   :  { %v381_v46 = vadd.f32 %v380_v45, %v224_v43  ;;  %v394_v47 = vpop.f32.mrf.mxu3 }
 0x140   :  { %v368_v52 = vpop.f32.mrf.mxu1  ;;  %v395_v57 = vadd.f32 %v394_v47, %v225_v51 }
 0x141   :  { %v449_v48 = vpack.c.bf16 %v381_v46, %v381_v46  ;;  %v369_v58 = vadd.f32 %v368_v52, %v223_v44 }
 0x142   :  { %v477_v7 = vpack.c.bf16 %v395_v57, %v395_v57 }
 0x143   :  { %v490_v50 = vsel %vm485_vm0, %v449_v48, 0  ;;  %v400_v1 = vmul.f32 0.17677669, %v369_v58 }
 0x144   :  { %499 = vmatpush.bf16.xpose.msrb.mxu3 %v490_v50  ;;  %v740_v13 = vsel %vm738_vm1, %v477_v7, 0 }
 0x145   :  { %v3602_v2 = vpack.i.bf16 %v400_v1, %v399_v53  ;;  %v422_v3 = vpack.c.bf16 %v400_v1, %v400_v1 }
 0x146   :  { %v382_v54 = vpop.f32.mrf.mxu2 }
 0x147   :  { %v383_v55 = vadd.f32 %v382_v54, %v224_v43  ;;  %v396_v56 = vpop.f32.mrf.mxu3 }
 0x148   :  { %v397_v59 = vadd.f32 %v396_v56, %v225_v51 }
 0x149   :  { %v3597_v60 = vpack.i.bf16 %v383_v55, %v381_v46  ;;  %v450_v61 = vpack.c.bf16 %v383_v55, %v383_v55 }
 0x14a   :  { %v3931_v63 = vpack.i.bf16 %v397_v59, %v395_v57  ;;  %v478_v8 = vpack.c.bf16 %v397_v59, %v397_v59 }
 0x14b   :  { %3598 = vrot.lane.b32.xlu2 %v3597_v60, %s3890_s2  ;;  %3588 = vrot.lane.b32.xlu1 %v3597_v60, %s3891_s4  ;;  %v509_v0 = vsel %vm485_vm0, %v450_v61, 0 }
 0x14c   :  { %3578 = vrot.lane.b32.xlu0 %v3597_v60, %s3892_s5  ;;  %2899 = vmatmul.msk.bf16.vlgmr.msrb.gmra.mxu3 %vm485_vm0, %v421_v62  ;;  %v759_v14 = vsel %vm738_vm1, %v478_v8, 0 }
 0x14d   :  { %518 = vmatpush.bf16.xpose.msrb.mxu1 %v509_v0 }
 0x153   :  { %3603 = vrot.lane.b32.xlu2 %v3602_v2, %s3890_s2  ;;  %3593 = vrot.lane.b32.xlu1 %v3602_v2, %s3891_s4 }
 0x154   :  { %2900 = vmatmul.msk.bf16.vlgmr.msrb.gmra.mxu1 %vm485_vm0, %v422_v3  ;;  %3583 = vrot.lane.b32.xlu0 %v3602_v2, %s3892_s5 }
 0x1a5   :  { %v3599_v4 = vpop.permute.xlu2 %3598 }
 0x1a6   :  { %v3601_v5 = vunpack.i.h.bf16 %v3599_v4  ;;  %v3600_v6 = vunpack.i.l.bf16 %v3599_v4 }
 0x1a8   :  { %v454_v9 = vpack.c.bf16 %v3601_v5, %v3601_v5  ;;  %v453_v10 = vpack.c.bf16 %v3600_v6, %v3600_v6 }
 0x1aa   :  { %v566_v11 = vsel %vm485_vm0, %v453_v10, 0  ;;  %v585_v12 = vsel %vm485_vm0, %v454_v9, 0 }
 0x1ab   :  { %575 = vmatpush.bf16.xpose.msrb.mxu0 %v566_v11  ;;  %594 = vmatpush.bf16.xpose.msra.mxu1 %v585_v12 }
 0x1ad   :  { %v3604_v15 = vpop.permute.xlu2 %3603 }
 0x1ae   :  { %v3606_v16 = vunpack.i.h.bf16 %v3604_v15  ;;  %v3605_v17 = vunpack.i.l.bf16 %v3604_v15 }
 0x1b0   :  { %v426_v18 = vpack.c.bf16 %v3606_v16, %v3606_v16  ;;  %v425_v19 = vpack.c.bf16 %v3605_v17, %v3605_v17 }
 0x1b2   :  { %2903 = vmatmul.msk.bf16.vlgmr.msrb.gmra.mxu0 %vm485_vm0, %v425_v19  ;;  %2904 = vmatmul.msk.bf16.vlgmr.msra.gmra.mxu1 %vm485_vm0, %v426_v18 }
 0x1b3   :  { %749 = vmatpush.bf16.msra.mxu0 %v740_v13  ;;  %768 = vmatpush.bf16.msrb.mxu1 %v759_v14 }
 0x1bd   :  { %v3589_v20 = vpop.permute.xlu1 %3588 }
 0x1be   :  { %v3591_v21 = vunpack.i.h.bf16 %v3589_v20  ;;  %v3590_v22 = vunpack.i.l.bf16 %v3589_v20  ;;  %v3579_v23 = vpop.permute.xlu0 %3578 }
 0x1bf   :  { %v3581_v24 = vunpack.i.h.bf16 %v3579_v23  ;;  %v3580_v25 = vunpack.i.l.bf16 %v3579_v23 }
 0x1c0   :  { %v456_v26 = vpack.c.bf16 %v3591_v21, %v3591_v21  ;;  %v455_v27 = vpack.c.bf16 %v3590_v22, %v3590_v22 }
 0x1c1   :  { %v452_v28 = vpack.c.bf16 %v3581_v24, %v3581_v24  ;;  %v451_v29 = vpack.c.bf16 %v3580_v25, %v3580_v25 }
 0x1c2   :  { %v604_v30 = vsel %vm485_vm0, %v455_v27, 0  ;;  %v623_v31 = vsel %vm485_vm0, %v456_v26, 0 }
 0x1c3   :  { %v528_v32 = vsel %vm485_vm0, %v451_v29, 0  ;;  %v547_v33 = vsel %vm485_vm0, %v452_v28, 0 }
 0x1c4   :  { %537 = vmatpush.bf16.xpose.msrb.mxu2 %v528_v32  ;;  %556 = vmatpush.bf16.xpose.msra.mxu3 %v547_v33 }
 0x1c5   :  { %v3594_v44 = vpop.permute.xlu1 %3593 }
 0x1c6   :  { %v3584_v34 = vpop.permute.xlu0 %3583  ;;  %v3596_v45 = vunpack.i.h.bf16 %v3594_v44  ;;  %v3595_v46 = vunpack.i.l.bf16 %v3594_v44 }
 0x1c7   :  { %v3586_v35 = vunpack.i.h.bf16 %v3584_v34  ;;  %v3585_v36 = vunpack.i.l.bf16 %v3584_v34 }
 0x1c8   :  { %v428_v49 = vpack.c.bf16 %v3596_v45, %v3596_v45  ;;  %v427_v50 = vpack.c.bf16 %v3595_v46, %v3595_v46 }
 0x1c9   :  { %v424_v37 = vpack.c.bf16 %v3586_v35, %v3586_v35  ;;  %v423_v40 = vpack.c.bf16 %v3585_v36, %v3585_v36 }
 0x1cb   :  { %2901 = vmatmul.msk.bf16.vlgmr.msrb.gmra.mxu2 %vm485_vm0, %v423_v40  ;;  %2902 = vmatmul.msk.bf16.vlgmr.msra.gmra.mxu3 %vm485_vm0, %v424_v37 }
 0x1cc   :  { %613 = vmatpush.bf16.xpose.msra.mxu2 %v604_v30  ;;  %632 = vmatpush.bf16.xpose.msrb.mxu3 %v623_v31 }
 0x1cf   :  { %v501_v41 = vpop.f32.mrf.mxu3 }
 0x1d0   :  { %v639_v42 = vsel %vm638_vm2, %v501_v41, -inf }
 0x1d1   :  { %v520_v43 = vpop.f32.mrf.mxu1  ;;  %640 = vmax.xlane.f32.xlu2 %v639_v42 }
 0x1d2   :  { %v642_v48 = vsel %vm638_vm2, %v520_v43, -inf }
 0x1d7   :  { %v503_v47 = vpop.f32.mrf.mxu3 }
 0x1d9   :  { %v522_v51 = vpop.f32.mrf.mxu1  ;;  %643 = vmax.xlane.f32.xlu2 %v642_v48 }
 0x1db   :  { %2905 = vmatmul.msk.bf16.vlgmr.msra.gmra.mxu2 %vm485_vm0, %v427_v50  ;;  %2906 = vmatmul.msk.bf16.vlgmr.msrb.gmra.mxu3 %vm485_vm0, %v428_v49 }
 0x22f   :  { %v577_v52 = vpop.f32.mrf.mxu0  ;;  %v596_v53 = vpop.f32.mrf.mxu1 }
 0x230   :  { %v651_v54 = vsel %vm638_vm2, %v577_v52, -inf  ;;  %v654_v7 = vsel %vm638_vm2, %v596_v53, -inf }
 0x231   :  { %652 = vmax.xlane.f32.xlu2 %v651_v54 }
 0x237   :  { %v579_v55 = vpop.f32.mrf.mxu0  ;;  %v598_v56 = vpop.f32.mrf.mxu1 }
 0x244   :  { %v641_v57 = vpop.xlane.xlu2 %640 }
 0x245   :  { %v663_v60 = vsub.f32 %v501_v41, %v641_v57 }
 0x247   :  { %v671_v3 = vmul.f32 1.442695, %v663_v60 }
 0x24c   :  { %v644_v58 = vpop.xlane.xlu2 %643 }
 0x24d   :  { %v664_v59 = vsub.f32 %v520_v43, %v644_v58 }
 0x24e   :  { %v539_v61 = vpop.f32.mrf.mxu2  ;;  %v558_v62 = vpop.f32.mrf.mxu3 }
 0x24f   :  { %v673_v0 = vmul.f32 1.442695, %v664_v59  ;;  %v645_v1 = vsel %vm638_vm2, %v539_v61, -inf  ;;  %v648_v2 = vsel %vm638_vm2, %v558_v62, -inf }
 0x250   :  { %646 = vmax.xlane.f32.xlu0 %v645_v1  ;;  %649 = vmax.xlane.f32.xlu1 %v648_v2 }
 0x251   :  { %3697 = vpow2.f32 %v673_v0 }
 0x252   :  { %3699 = vpow2.f32 %v671_v3 }
 0x256   :  { %v541_v4 = vpop.f32.mrf.mxu2  ;;  %v560_v5 = vpop.f32.mrf.mxu3 }
 0x257   :  { %v3698_v6 = vpop.eup %3697 }
 0x258   :  { %655 = vmax.xlane.f32.xlu0 %v654_v7  ;;  %v690_v8 = vsel %vm638_vm2, %v3698_v6, 0.0  ;;  %v3700_v9 = vpop.eup %3699 }
 0x259   :  { %691 = vadd.xlane.f32.xlu1 %v690_v8  ;;  %v687_v12 = vsel %vm638_vm2, %v3700_v9, 0.0 }
 0x25e   :  { %v615_v10 = vpop.f32.mrf.mxu2  ;;  %v634_v11 = vpop.f32.mrf.mxu3 }
 0x25f   :  { %v660_v13 = vsel %vm638_vm2, %v634_v11, -inf  ;;  %v657_v16 = vsel %vm638_vm2, %v615_v10, -inf }
 0x260   :  { %688 = vadd.xlane.f32.xlu0 %v687_v12 }
 0x261   :  { %661 = vmax.xlane.f32.xlu1 %v660_v13 }
 0x266   :  { %v617_v14 = vpop.f32.mrf.mxu2  ;;  %v636_v15 = vpop.f32.mrf.mxu3 }
 0x268   :  { %658 = vmax.xlane.f32.xlu0 %v657_v16 }
 0x2a4   :  { %v653_v17 = vpop.xlane.xlu2 %652 }
 0x2a5   :  { %v667_v18 = vsub.f32 %v577_v52, %v653_v17 }
 0x2a7   :  { %v679_v19 = vmul.f32 1.442695, %v667_v18 }
 0x2a9   :  { %3701 = vpow2.f32 %v679_v19 }
 0x2af   :  { %v3966_v20 = vpop.eup %3701 }
 0x2b0   :  { %v699_v21 = vsel %vm638_vm2, %v3966_v20, 0.0 }
 0x2b1   :  { %700 = vadd.xlane.f32.xlu0 %v699_v21 }
 0x2c3   :  { %v647_v22 = vpop.xlane.xlu0 %646  ;;  %v650_v23 = vpop.xlane.xlu1 %649 }
 0x2c4   :  { %v665_v24 = vsub.f32 %v539_v61, %v647_v22  ;;  %v666_v25 = vsub.f32 %v558_v62, %v650_v23 }
 0x2c6   :  { %v675_v26 = vmul.f32 1.442695, %v665_v24  ;;  %v677_v27 = vmul.f32 1.442695, %v666_v25 }
 0x2c8   :  { %3703 = vpow2.f32 %v675_v26 }
 0x2c9   :  { %3705 = vpow2.f32 %v677_v27 }
 0x2cb   :  { %v656_v28 = vpop.xlane.xlu0 %655 }
 0x2cc   :  { %v668_v29 = vsub.f32 %v596_v53, %v656_v28  ;;  %v692_v30 = vpop.xlane.xlu1 %691 }
 0x2cd   :  { %3707 = vrcp.f32 %v692_v30 }
 0x2ce   :  { %v3704_v31 = vpop.eup %3703  ;;  %v681_v32 = vmul.f32 1.442695, %v668_v29 }
 0x2cf   :  { %v3706_v33 = vpop.eup %3705  ;;  %v693_v34 = vsel %vm638_vm2, %v3704_v31, 0.0 }
 0x2d0   :  { %3709 = vpow2.f32 %v681_v32  ;;  %v696_v35 = vsel %vm638_vm2, %v3706_v33, 0.0  ;;  %694 = vadd.xlane.f32.xlu1 %v693_v34 }
 0x2d1   :  { %697 = vadd.xlane.f32.xlu2 %v696_v35 }
 0x2d3   :  { %v3708_v36 = vpop.eup %3707  ;;  %v689_v37 = vpop.xlane.xlu0 %688 }
 0x2d4   :  { %v720_v40 = vmul.f32 %v3708_v36, %v3698_v6  ;;  %3711 = vrcp.f32 %v689_v37  ;;  %v662_v41 = vpop.xlane.xlu1 %661 }
 0x2d5   :  { %v670_v42 = vsub.f32 %v634_v11, %v662_v41 }
 0x2d6   :  { %v3972_v43 = vpop.eup %3709  ;;  %v728_v44 = vpack.c.bf16 %v720_v40, %v720_v40 }
 0x2d7   :  { %v685_v45 = vmul.f32 1.442695, %v670_v42  ;;  %v702_v46 = vsel %vm638_vm2, %v3972_v43, 0.0 }
 0x2d8   :  { %2908 = vmatmul.msk.bf16.vlgmr.msrb.gmra.mxu1 %vm638_vm2, %v728_v44  ;;  %703 = vadd.xlane.f32.xlu1 %v702_v46 }
 0x2d9   :  { %3713 = vpow2.f32 %v685_v45 }
 0x2da   :  { %v3712_v47 = vpop.eup %3711 }
 0x2db   :  { %v719_v48 = vmul.f32 %v3712_v47, %v3700_v9  ;;  %v659_v49 = vpop.xlane.xlu0 %658 }
 0x2dc   :  { %v669_v50 = vsub.f32 %v615_v10, %v659_v49 }
 0x2dd   :  { %v727_v51 = vpack.c.bf16 %v719_v48, %v719_v48 }
 0x2de   :  { %v683_v52 = vmul.f32 1.442695, %v669_v50 }
 0x2df   :  { %v3714_v53 = vpop.eup %3713  ;;  %2907 = vmatmul.msk.bf16.vlgmr.msra.gmra.mxu0 %vm638_vm2, %v727_v51 }
 0x2e0   :  { %3715 = vpow2.f32 %v683_v52  ;;  %v708_v54 = vsel %vm638_vm2, %v3714_v53, 0.0 }
 0x2e1   :  { %709 = vadd.xlane.f32.xlu1 %v708_v54 }
 0x2e6   :  { %v3716_v55 = vpop.eup %3715 }
 0x2e7   :  { %v705_v56 = vsel %vm638_vm2, %v3716_v55, 0.0 }
 0x2e8   :  { %706 = vadd.xlane.f32.xlu0 %v705_v56 }
 0x2e9   :  { %3608 = vrot.lane.b32.xlu2 %v3931_v63, %s3892_s5 }
 0x2fa   :  { %3618 = vrot.lane.b32.xlu1 %v3931_v63, %s3890_s2 }
 0x2fc   :  { %3613 = vrot.lane.b32.xlu0 %v3931_v63, %s3891_s4 }
 0x324   :  { %v701_v10 = vpop.xlane.xlu0 %700 }
 0x343   :  { %v695_v57 = vpop.xlane.xlu1 %694 }
 0x344   :  { %v698_v58 = vpop.xlane.xlu2 %697  ;;  %3717 = vrcp.f32 %v695_v57 }
 0x345   :  { %3719 = vrcp.f32 %v698_v58 }
 0x346   :  { %3721 = vrcp.f32 %v701_v10 }
 0x34a   :  { %v3718_v59 = vpop.eup %3717 }
 0x34b   :  { %v3720_v60 = vpop.eup %3719  ;;  %v721_v2 = vmul.f32 %v3718_v59, %v3704_v31  ;;  %v704_v9 = vpop.xlane.xlu1 %703  ;;  %v2945_v59 = vld [vmem:[#allocation5 + $0x438] sm:$0xf] }
 0x34c   :  { %v3609_v61 = vpop.permute.xlu2 %3608  ;;  %v722_v1 = vmul.f32 %v3720_v60, %v3706_v33  ;;  %3723 = vrcp.f32 %v704_v9  ;;  %v3722_v16 = vpop.eup %3721  ;;  %v3450_v60 = vld [vmem:[#allocation5 + $0x480] sm:$0xf0] }
 0x34d   :  { %v3611_v62 = vunpack.i.h.bf16 %v3609_v61  ;;  %v3610_v0 = vunpack.i.l.bf16 %v3609_v61  ;;  %v729_v7 = vpack.c.bf16 %v721_v2, %v721_v2  ;;  %v723_v24 = vmul.f32 %v3722_v16, %v3966_v20  ;;  %v2941_v61 = vld [vmem:[#allocation5 + $0x3a0] sm:$0xf]  ;;  %v2937_v2 = vld [vmem:[#allocation5 + $0x308] sm:$0xf]  ;;  %v3446_v9 = vld [vmem:[#allocation5 + $0x220] sm:$0xf0] }
 0x34e   :  { %v730_v63 = vpack.c.bf16 %v722_v1, %v722_v1  ;;  %v3444_v16 = vld [vmem:[#allocation5 + $0xf0] sm:$0xf0] }
 0x34f   :  { %v480_v3 = vpack.c.bf16 %v3611_v62, %v3611_v62  ;;  %v479_v4 = vpack.c.bf16 %v3610_v0, %v3610_v0  ;;  %v731_v37 = vpack.c.bf16 %v723_v24, %v723_v24  ;;  %v2946_v62 = vor.u32 %v3450_v60, %v2945_v59  ;;  %v3449_v0 = vld [vmem:[#allocation5 + $0x3e8] sm:$0xf0]  ;;  %v3465_v59 = vld [vmem:[#allocation5 + $0x440] sm:$0xf] }
 0x350   :  { %v2942_v1 = vor.u32 %v3449_v0, %v2941_v61  ;;  %v3007_v61 = vld [vmem:[#allocation5 + $0x488] sm:$0xf0]  ;;  %v2997_v0 = vld [vmem:[#allocation5 + $0x3a4] sm:$0xf] }
 0x351   :  { %v778_v5 = vsel %vm738_vm1, %v479_v4, 0  ;;  %v797_v6 = vsel %vm738_vm1, %v480_v3, 0  ;;  %v3448_v3 = vld [vmem:[#allocation5 + $0x350] sm:$0xf0] }
 0x352   :  { %787 = vmatpush.bf16.msrb.mxu2 %v778_v5  ;;  %806 = vmatpush.bf16.msra.mxu3 %v797_v6  ;;  %v3724_v17 = vpop.eup %3723  ;;  %v2938_v4 = vor.u32 %v3448_v3, %v2937_v2  ;;  %v2933_v5 = vld [vmem:[#allocation5 + $0x270] sm:$0xf]  ;;  %v3447_v6 = vld [vmem:[#allocation5 + $0x2b8] sm:$0xf0]  ;;  %v3463_v2 = vld [vmem:[#allocation5 + $0x3a8] sm:$0xf] }
 0x353   :  { %v724_v25 = vmul.f32 %v3724_v17, %v3972_v43 }
 0x354   :  { %v710_v13 = vpop.xlane.xlu1 %709 }
 0x355   :  { %2909 = vmatmul.msk.bf16.vlgmr.msrb.gmra.mxu2 %vm638_vm2, %v729_v7  ;;  %2910 = vmatmul.msk.bf16.vlgmr.msra.gmra.mxu3 %vm638_vm2, %v730_v63  ;;  %v3990_v8 = vpop.f32.mrf.mxu1  ;;  %3725 = vrcp.f32 %v710_v13  ;;  %v732_v40 = vpack.c.bf16 %v724_v25, %v724_v25  ;;  %v2934_v63 = vor.u32 %v3447_v6, %v2933_v5  ;;  %v2929_v7 = vld [vmem:[#allocation5 + $0x1d8] sm:$0xf]  ;;  %v3445_v13 = vld [vmem:[#allocation5 + $0x188] sm:$0xf0] }
 0x356   :  { %v2930_v10 = vor.u32 %v3446_v9, %v2929_v7  ;;  %v2989_v6 = vld [vmem:[#allocation5 + $0x30c] sm:$0xf]  ;;  %v3461_v7 = vld [vmem:[#allocation5 + $0x310] sm:$0xf] }
 0x35b   :  { %v707_v14 = vpop.xlane.xlu0 %706  ;;  %v3726_v18 = vpop.eup %3725 }
 0x35c   :  { %v3992_v11 = vpop.f32.mrf.mxu0  ;;  %3727 = vrcp.f32 %v707_v14  ;;  %v726_v31 = vmul.f32 %v3726_v18, %v3714_v53  ;;  %v2917_v18 = vld [vmem:[#allocation5 + $0x10] sm:$0xf] }
 0x35d   :  { %v772_v12 = vpop.f32.mrf.mxu1 }
 0x35e   :  { %v734_v42 = vpack.c.bf16 %v726_v31, %v726_v31  ;;  %v2925_v12 = vld [vmem:[#allocation5 + $0x140] sm:$0xf] }
 0x35f   :  { %v2926_v14 = vor.u32 %v3445_v13, %v2925_v12  ;;  %v2981_v13 = vld [vmem:[#allocation5 + $0x274] sm:$0xf] }
 0x362   :  { %v3728_v21 = vpop.eup %3727 }
 0x363   :  { %v725_v32 = vmul.f32 %v3728_v21, %v3716_v55 }
 0x364   :  { %v753_v15 = vpop.f32.mrf.mxu0 }
 0x365   :  { %v733_v43 = vpack.c.bf16 %v725_v32, %v725_v32  ;;  %v2921_v15 = vld [vmem:[#allocation5 + $0xa8] sm:$0xf] }
 0x366   :  { %v2922_v17 = vor.u32 %v3444_v16, %v2921_v15  ;;  %v3459_v15 = vld [vmem:[#allocation5 + $0x278] sm:$0xf] }
 0x36c   :  { %v3619_v19 = vpop.permute.xlu1 %3618 }
 0x36d   :  { %v3621_v22 = vunpack.i.h.bf16 %v3619_v19  ;;  %v3620_v23 = vunpack.i.l.bf16 %v3619_v19  ;;  %v3443_v19 = vld [vmem:[#allocation5 + $0x58] sm:$0xf0] }
 0x36e   :  { %v3614_v26 = vpop.permute.xlu0 %3613  ;;  %v2918_v21 = vor.u32 %v3443_v19, %v2917_v18  ;;  %v2973_v19 = vld [vmem:[#allocation5 + $0x1dc] sm:$0xf] }
 0x36f   :  { %v482_v27 = vpack.c.bf16 %v3621_v22, %v3621_v22  ;;  %v481_v28 = vpack.c.bf16 %v3620_v23, %v3620_v23  ;;  %v3616_v29 = vunpack.i.h.bf16 %v3614_v26  ;;  %v3615_v30 = vunpack.i.l.bf16 %v3614_v26 }
 0x371   :  { %v484_v33 = vpack.c.bf16 %v3616_v29, %v3616_v29  ;;  %v483_v34 = vpack.c.bf16 %v3615_v30, %v3615_v30  ;;  %v816_v35 = vsel %vm738_vm1, %v481_v28, 0  ;;  %v835_v36 = vsel %vm738_vm1, %v482_v27, 0 }
 0x372   :  { %825 = vmatpush.bf16.msrb.mxu0 %v816_v35  ;;  %844 = vmatpush.bf16.msra.mxu1 %v835_v36 }
 0x373   :  { %v854_v20 = vsel %vm738_vm1, %v483_v34, 0  ;;  %v873_v41 = vsel %vm738_vm1, %v484_v33, 0 }
 0x374   :  { %863 = vmatpush.bf16.msra.mxu2 %v854_v20  ;;  %882 = vmatpush.bf16.msrb.mxu3 %v873_v41 }
 0x375   :  { %2911 = vmatmul.msk.bf16.vlgmr.msrb.gmra.mxu0 %vm638_vm2, %v731_v37  ;;  %2912 = vmatmul.msk.bf16.vlgmr.msra.gmra.mxu1 %vm638_vm2, %v732_v40  ;;  %v213_v40 = vld [vmem:[#allocation7 + $0x19] ss:$0 sm:$0xff] }
 0x376   :  { %969 = vmatpush.bf16.msra.mxu0 %v2946_v62  ;;  %v3010_v62 = vor.u32 %v3465_v59, %v3007_v61 }
 0x377   :  { %2913 = vmatmul.msk.bf16.vlgmr.msra.gmra.mxu2 %vm638_vm2, %v733_v43  ;;  %2914 = vmatmul.msk.bf16.vlgmr.msrb.gmra.mxu3 %vm638_vm2, %v734_v42 }
 0x378   :  { %1136 = vmatpush.bf16.msrb.mxu2 %v3010_v62 }
 0x37a   :  { %970 = vmatpush.bf16.msra.mxu0 %v2942_v1  ;;  %v3464_v1 = vld [vmem:[#allocation5 + $0x3ec] sm:$0xf0] }
 0x37b   :  { %v2998_v3 = vor.u32 %v3464_v1, %v2997_v0 }
 0x37e   :  { %971 = vmatpush.bf16.msra.mxu0 %v2938_v4  ;;  %v2999_v4 = vld [vmem:[#allocation5 + $0x3f0] sm:$0xf0] }
 0x37f   :  { %v3002_v5 = vor.u32 %v3463_v2, %v2999_v4 }
 0x381   :  { %1137 = vmatpush.bf16.msrb.mxu2 %v3002_v5 }
 0x382   :  { %972 = vmatpush.bf16.msra.mxu0 %v2934_v63  ;;  %v3462_v63 = vld [vmem:[#allocation5 + $0x354] sm:$0xf0] }
 0x383   :  { %v2990_v9 = vor.u32 %v3462_v63, %v2989_v6 }
 0x386   :  { %973 = vmatpush.bf16.msra.mxu0 %v2930_v10  ;;  %v2991_v10 = vld [vmem:[#allocation5 + $0x358] sm:$0xf0] }
 0x387   :  { %v2994_v12 = vor.u32 %v3461_v7, %v2991_v10 }
 0x389   :  { %1138 = vmatpush.bf16.msrb.mxu2 %v2994_v12 }
 0x38a   :  { %974 = vmatpush.bf16.msra.mxu0 %v2926_v14  ;;  %v3460_v14 = vld [vmem:[#allocation5 + $0x2bc] sm:$0xf0] }
 0x38b   :  { %v2982_v16 = vor.u32 %v3460_v14, %v2981_v13  ;;  %v214_v14 = vld [vmem:[#allocation7 + $0x1a] ss:$0 sm:$0xff] }
 0x38e   :  { %975 = vmatpush.bf16.msra.mxu0 %v2922_v17  ;;  %v2983_v17 = vld [vmem:[#allocation5 + $0x2c0] sm:$0xf0] }
 0x38f   :  { %v2986_v18 = vor.u32 %v3459_v15, %v2983_v17 }
 0x391   :  { %1139 = vmatpush.bf16.msrb.mxu2 %v2986_v18  ;;  %v215_v18 = vld [vmem:[#allocation7 + $0x1b] ss:$0 sm:$0xff] }
 0x392   :  { %976 = vmatpush.bf16.msra.mxu0 %v2918_v21  ;;  %v3458_v21 = vld [vmem:[#allocation5 + $0x224] sm:$0xf0] }
 0x3d8   :  { %v789_v44 = vpop.f32.mrf.mxu2  ;;  %v808_v45 = vpop.f32.mrf.mxu3 }
 0x3d9   :  { %v3622_v46 = vpack.i.bf16 %v808_v45, %v789_v44  ;;  %v3893_v44 = vmov 128.0  }
 0x3da   :  { %3729 = vrcp.f32 %v3893_v44 }
 0x3db   :  { %3623 = vrot.lane.b32.xlu2 %v3622_v46, %s3891_s4 }
 0x3e0   :  { %v791_v47 = vpop.f32.mrf.mxu2  ;;  %v810_v48 = vpop.f32.mrf.mxu3 }
 0x3e1   :  { %v3730_v45 = vpop.eup %3729 }
 0x3e2   :  { %v990_v46 = vmul.f32 128.0, %v3730_v45  ;;  %vm994_vm5 = vweird.f32 %v3730_v45 }
 0x3e4   :  { %v991_v47 = vsub.f32 1.0, %v990_v46  ;;  %v3041_v46 = vld [vmem:[#allocation5 + $0x444] sm:$0xf] }
 0x3e6   :  { %v992_v48 = vmul.f32 %v3730_v45, %v991_v47  ;;  %v3474_v47 = vld [vmem:[#allocation5 + $0x48c] sm:$0xf0] }
 0x3f2   :  { %v827_v49 = vpop.f32.mrf.mxu0  ;;  %v846_v50 = vpop.f32.mrf.mxu1 }
 0x3f3   :  { %v3627_v51 = vpack.i.bf16 %v846_v50, %v827_v49  ;;  %v993_v49 = vadd.f32 %v3730_v45, %v992_v48  ;;  %v3073_v48 = vld [vmem:[#allocation5 + $0x448] sm:$0xf] }
 0x3f5   :  { %3628 = vrot.lane.b32.xlu2 %v3627_v51, %s3890_s2  ;;  %v4017_v50 = vsel %vm994_vm5, %v3730_v45, %v993_v49 }
 0x3fa   :  { %v829_v52 = vpop.f32.mrf.mxu0  ;;  %v848_v53 = vpop.f32.mrf.mxu1 }
 0x3fb   :  { %v865_v54 = vpop.f32.mrf.mxu2  ;;  %v884_v55 = vpop.f32.mrf.mxu3 }
 0x3fc   :  { %v3632_v56 = vpack.i.bf16 %v884_v55, %v865_v54 }
 0x3fe   :  { %3633 = vrot.lane.b32.xlu0 %v3632_v56, %s3892_s5 }
 0x403   :  { %v867_v57 = vpop.f32.mrf.mxu2  ;;  %v886_v58 = vpop.f32.mrf.mxu3 }
 0x404   :  { %v3005_v57 = vld [vmem:[#allocation5 + $0x43c] sm:$0xf]  ;;  %v3466_v58 = vld [vmem:[#allocation5 + $0x484] sm:$0xf0] }
 0x405   :  { %v3006_v60 = vor.u32 %v3466_v58, %v3005_v57  ;;  %v3069_v57 = vld [vmem:[#allocation5 + $0x3b0] sm:$0xf]  ;;  %v3481_v58 = vld [vmem:[#allocation5 + $0x3f8] sm:$0xf0] }
 0x406   :  { %v3070_v62 = vor.u32 %v3481_v58, %v3069_v57 }
 0x407   :  { %1122 = vmatpush.bf16.msrb.mxu1 %v3006_v60 }
 0x40b   :  { %1123 = vmatpush.bf16.msrb.mxu1 %v2998_v3 }
 0x40f   :  { %1124 = vmatpush.bf16.msrb.mxu1 %v2990_v9 }
 0x413   :  { %1125 = vmatpush.bf16.msrb.mxu1 %v2982_v16 }
 0x435   :  { %v3624_v22 = vpop.permute.xlu2 %3623 }
 0x436   :  { %v3626_v24 = vunpack.i.h.bf16 %v3624_v22  ;;  %v3625_v25 = vunpack.i.l.bf16 %v3624_v22  ;;  %v3457_v22 = vld [vmem:[#allocation5 + $0x1e0] sm:$0xf] }
 0x438   :  { %v913_v29 = vsel %vm485_vm0, %v3990_v8, %v3626_v24  ;;  %v912_v30 = vsel %vm485_vm0, %v3992_v11, %v3625_v25  ;;  %v2975_v24 = vld [vmem:[#allocation5 + $0x228] sm:$0xf0] }
 0x439   :  { %v2978_v25 = vor.u32 %v3457_v22, %v2975_v24  ;;  %v3472_v24 = vld [vmem:[#allocation5 + $0x35c] sm:$0xf0] }
 0x43b   :  { %1140 = vmatpush.bf16.msrb.mxu2 %v2978_v25  ;;  %v3065_v25 = vld [vmem:[#allocation5 + $0x318] sm:$0xf] }
 0x44f   :  { %v3629_v23 = vpop.permute.xlu2 %3628 }
 0x450   :  { %v3631_v26 = vunpack.i.h.bf16 %v3629_v23  ;;  %v3630_v27 = vunpack.i.l.bf16 %v3629_v23  ;;  %v2974_v23 = vor.u32 %v3458_v21, %v2973_v19 }
 0x452   :  { %v915_v33 = vsel %vm914_vm3, %v912_v30, %v3630_v27  ;;  %v916_v34 = vsel %vm914_vm3, %v913_v29, %v3631_v26  ;;  %1126 = vmatpush.bf16.msrb.mxu1 %v2974_v23  ;;  %v2965_v26 = vld [vmem:[#allocation5 + $0x144] sm:$0xf]  ;;  %v3456_v27 = vld [vmem:[#allocation5 + $0x18c] sm:$0xf0]  ;;  %v2967_v30 = vld [vmem:[#allocation5 + $0x190] sm:$0xf0] }
 0x453   :  { %v2966_v29 = vor.u32 %v3456_v27, %v2965_v26  ;;  %v3480_v27 = vld [vmem:[#allocation5 + $0x360] sm:$0xf0] }
 0x456   :  { %1127 = vmatpush.bf16.msrb.mxu1 %v2966_v29  ;;  %v3471_v29 = vld [vmem:[#allocation5 + $0x2c4] sm:$0xf0] }
 0x470   :  { %v3634_v28 = vpop.permute.xlu0 %3633 }
 0x471   :  { %v3636_v31 = vunpack.i.h.bf16 %v3634_v28  ;;  %v3635_v32 = vunpack.i.l.bf16 %v3634_v28  ;;  %v3455_v28 = vld [vmem:[#allocation5 + $0x148] sm:$0xf] }
 0x473   :  { %v919_v35 = vsel %vm917_vm4, %v916_v34, %v3636_v31  ;;  %v918_v36 = vsel %vm917_vm4, %v915_v33, %v3635_v32  ;;  %v2970_v31 = vor.u32 %v3455_v28, %v2967_v30  ;;  %v2957_v32 = vld [vmem:[#allocation5 + $0xac] sm:$0xf]  ;;  %v3454_v33 = vld [vmem:[#allocation5 + $0xf4] sm:$0xf0]  ;;  %v3453_v34 = vld [vmem:[#allocation5 + $0xb0] sm:$0xf]  ;;  %v3066_v28 = vor.u32 %v3480_v27, %v3065_v25 }
 0x474   :  { %v920_v37 = vpack.c.bf16 %v919_v35, %v918_v36  ;;  %v2958_v35 = vor.u32 %v3454_v33, %v2957_v32  ;;  %v2959_v36 = vld [vmem:[#allocation5 + $0xf8] sm:$0xf0]  ;;  %v3479_v32 = vld [vmem:[#allocation5 + $0x2c8] sm:$0xf0] }
 0x475   :  { %1141 = vmatpush.bf16.msrb.mxu2 %v2970_v31  ;;  %v3061_v31 = vld [vmem:[#allocation5 + $0x280] sm:$0xf] }
 0x476   :  { %977 = vmatmul.bf16.vlgmr.msra.gmra.mxu0 %v920_v37  ;;  %v2962_v37 = vor.u32 %v3453_v34, %v2959_v36  ;;  %1128 = vmatpush.bf16.msrb.mxu1 %v2958_v35  ;;  %v3062_v33 = vor.u32 %v3479_v32, %v3061_v31  ;;  %v3025_v34 = vld [vmem:[#allocation5 + $0x1e4] sm:$0xf]  ;;  %v3470_v35 = vld [vmem:[#allocation5 + $0x22c] sm:$0xf0]  ;;  %v3057_v36 = vld [vmem:[#allocation5 + $0x1e8] sm:$0xf] }
 0x479   :  { %1142 = vmatpush.bf16.msrb.mxu2 %v2962_v37  ;;  %v3026_v37 = vor.u32 %v3470_v35, %v3025_v34 }
 0x4f3   :  { %v978_v20 = vpop.f32.mrf.mxu0 }
 0x4f4   :  { %v979_v41 = vadd.f32 %v978_v20, %v213_v40  ;;  %v3452_v20 = vld [vmem:[#allocation5 + $0x5c] sm:$0xf0] }
 0x4f6   :  { %v983_v8 = vadd.f32 %v979_v41, %v3924_v38  ;;  %v3451_v41 = vld [vmem:[#allocation5 + $0x18] sm:$0xf] }
 0x4f8   :  { %985 = vadd.xlane.f32.xlu2 %v983_v8 }
 0x4fb   :  { %v980_v42 = vpop.f32.mrf.mxu0 }
 0x4fc   :  { %v981_v11 = vadd.f32 %v980_v42, %v213_v40  ;;  %v2949_v40 = vld [vmem:[#allocation5 + $0x14] sm:$0xf] }
 0x4fd   :  { %v2950_v42 = vor.u32 %v3452_v20, %v2949_v40  ;;  %v3478_v40 = vld [vmem:[#allocation5 + $0x230] sm:$0xf0] }
 0x4fe   :  { %v984_v43 = vadd.f32 %v981_v11, %v3926_v39  ;;  %v2951_v11 = vld [vmem:[#allocation5 + $0x60] sm:$0xf0]  ;;  %v3058_v20 = vor.u32 %v3478_v40, %v3057_v36  ;;  %v3505_v40 = vld [vmem:[#allocation5 + $0x494] sm:$0xf0] }
 0x4ff   :  { %v2954_v44 = vor.u32 %v3451_v41, %v2951_v11  ;;  %1129 = vmatpush.bf16.msrb.mxu1 %v2950_v42  ;;  %v3021_v41 = vld [vmem:[#allocation5 + $0x14c] sm:$0xf]  ;;  %v3053_v42 = vld [vmem:[#allocation5 + $0x150] sm:$0xf] }
 0x500   :  { %987 = vadd.xlane.f32.xlu1 %v984_v43 }
 0x501   :  { %1143 = vmatpush.bf16.msrb.mxu2 %v2954_v44 }
 0x56b   :  { %v986_v51 = vpop.xlane.xlu2 %985 }
 0x56c   :  { %v996_v52 = vmul.f32 %v4017_v50, %v986_v51  ;;  %v3042_v51 = vor.u32 %v3474_v47, %v3041_v46  ;;  %v3468_v46 = vld [vmem:[#allocation5 + $0xfc] sm:$0xf0]  ;;  %v3049_v47 = vld [vmem:[#allocation5 + $0xb8] sm:$0xf] }
 0x56e   :  { %v4020_v38 = vsub.f32 %v983_v8, %v996_v52  ;;  %v3482_v52 = vld [vmem:[#allocation5 + $0x490] sm:$0xf0]  ;;  %1226 = vmatpush.bf16.msra.mxu3 %v3042_v51 }
 0x570   :  { %v1000_v53 = vmul.f32 %v4020_v38, %v4020_v38 }
 0x572   :  { %1002 = vadd.xlane.f32.xlu0 %v1000_v53  ;;  %v3037_v53 = vld [vmem:[#allocation5 + $0x3ac] sm:$0xf] }
 0x573   :  { %v988_v39 = vpop.xlane.xlu1 %987 }
 0x574   :  { %v997_v54 = vmul.f32 %v4017_v50, %v988_v39  ;;  %v3473_v39 = vld [vmem:[#allocation5 + $0x3f4] sm:$0xf0] }
 0x575   :  { %v3038_v59 = vor.u32 %v3473_v39, %v3037_v53  ;;  %v3467_v53 = vld [vmem:[#allocation5 + $0x64] sm:$0xf0]  ;;  %v3045_v39 = vld [vmem:[#allocation5 + $0x20] sm:$0xf] }
 0x576   :  { %v4025_v55 = vsub.f32 %v984_v43, %v997_v54 }
 0x577   :  { %1227 = vmatpush.bf16.msra.mxu3 %v3038_v59  ;;  %v217_v59 = vld [vmem:[#allocation7 + $0x1c] ss:$8 sm:$0x3] }
 0x578   :  { %v1001_v56 = vmul.f32 %v4025_v55, %v4025_v55 }
 0x57a   :  { %1004 = vadd.xlane.f32.xlu2 %v1001_v56  ;;  %v3074_v56 = vor.u32 %v3482_v52, %v3073_v48  ;;  %v3013_v52 = vld [vmem:[#allocation5 + $0x1c] sm:$0xf] }
 0x57c   :  { %1310 = vmatpush.bf16.msrb.mxu0 %v3074_v56  ;;  %v3475_v56 = vld [vmem:[#allocation5 + $0x68] sm:$0xf0] }
 0x57d   :  { %v3046_v57 = vor.u32 %v3475_v56, %v3045_v39  ;;  %v3499_v56 = vld [vmem:[#allocation5 + $0x364] sm:$0xf0] }
 0x580   :  { %1311 = vmatpush.bf16.msrb.mxu0 %v3070_v62  ;;  %v1038_v62 = vperm.slane %v217_v59, 0 }
 0x584   :  { %1312 = vmatpush.bf16.msrb.mxu0 %v3066_v28 }
 0x588   :  { %1313 = vmatpush.bf16.msrb.mxu0 %v3062_v33 }
 0x58c   :  { %1314 = vmatpush.bf16.msrb.mxu0 %v3058_v20  ;;  %v3504_v20 = vld [vmem:[#allocation5 + $0x450] sm:$0xf] }
 0x5e5   :  { %v1003_v8 = vpop.xlane.xlu0 %1002 }
 0x5e6   :  { %v1006_v43 = vmul.f32 %v1003_v8, %v4017_v50  ;;  %v3469_v8 = vld [vmem:[#allocation5 + $0x194] sm:$0xf0] }
 0x5e7   :  { %v3022_v11 = vor.u32 %v3469_v8, %v3021_v41  ;;  %v3163_v8 = vld [vmem:[#allocation5 + $0x498] sm:$0xf0] }
 0x5e8   :  { %v1008_v45 = vadd.f32 1e-05, %v1006_v43  ;;  %v3477_v43 = vld [vmem:[#allocation5 + $0x198] sm:$0xf0] }
 0x5e9   :  { %v3054_v44 = vor.u32 %v3477_v43, %v3053_v42  ;;  %v3169_v42 = vld [vmem:[#allocation5 + $0x454] sm:$0xf]  ;;  %v3166_v43 = vor.u32 %v3504_v20, %v3163_v8  ;;  %v3077_v20 = vld [vmem:[#allocation5 + $0x24] sm:$0xf]  ;;  %v3483_v8 = vld [vmem:[#allocation5 + $0x28] sm:$0xf] }
 0x5ea   :  { %3731 = vrsqrt.f32 %v1008_v45  ;;  %vm1016_vm7 = vweird.f32 %v1008_v45 }
 0x5eb   :  { %1315 = vmatpush.bf16.msrb.mxu0 %v3054_v44  ;;  %1596 = vmatpush.bf16.msra.mxu2 %v3166_v43  ;;  %v3079_v43 = vld [vmem:[#allocation5 + $0x70] sm:$0xf0] }
 0x5ed   :  { %v1005_v49 = vpop.xlane.xlu2 %1004 }
 0x5ee   :  { %v1007_v54 = vmul.f32 %v1005_v49, %v4017_v50  ;;  %v3476_v49 = vld [vmem:[#allocation5 + $0x100] sm:$0xf0] }
 0x5ef   :  { %v3050_v51 = vor.u32 %v3476_v49, %v3049_v47  ;;  %v3501_v47 = vld [vmem:[#allocation5 + $0x3b8] sm:$0xf]  ;;  %v3151_v49 = vld [vmem:[#allocation5 + $0x400] sm:$0xf0] }
 0x5f0   :  { %v3732_v60 = vpop.eup %3731  ;;  %v1009_v61 = vadd.f32 1e-05, %v1007_v54  ;;  %v3014_v54 = vor.u32 %v3467_v53, %v3013_v52  ;;  %v3503_v52 = vld [vmem:[#allocation5 + $0x404] sm:$0xf0]  ;;  %v3154_v53 = vor.u32 %v3501_v47, %v3151_v49  ;;  %v3082_v47 = vor.u32 %v3483_v8, %v3079_v43 }
 0x5f1   :  { %v1011_v0 = vmul.f32 %v3732_v60, %v1008_v45  ;;  %vm1017_vm6 = vweird.f32 %v3732_v60  ;;  %v3017_v45 = vld [vmem:[#allocation5 + $0xb4] sm:$0xf]  ;;  %1316 = vmatpush.bf16.msrb.mxu0 %v3050_v51  ;;  %v3157_v51 = vld [vmem:[#allocation5 + $0x3bc] sm:$0xf] }
 0x5f2   :  { %3733 = vrsqrt.f32 %v1009_v61  ;;  %vm1018_vm8 = vmor %vm1016_vm7, %vm1017_vm6  ;;  %vm1026_vm10 = vweird.f32 %v1009_v61  ;;  %v3018_v48 = vor.u32 %v3468_v46, %v3017_v45  ;;  %v3149_v45 = vld [vmem:[#allocation5 + $0x3b4] sm:$0xf]  ;;  %v3502_v46 = vld [vmem:[#allocation5 + $0x3fc] sm:$0xf0]  ;;  %v3158_v39 = vor.u32 %v3503_v52, %v3157_v51  ;;  %1597 = vmatpush.bf16.msra.mxu2 %v3154_v53 }
 0x5f3   :  { %v1012_v1 = vmul.f32 %v3732_v60, %v1011_v0 }
 0x5f5   :  { %v1013_v2 = vmul.f32 0.5, %v1012_v1  ;;  %1317 = vmatpush.bf16.msrb.mxu0 %v3046_v57  ;;  %v3498_v57 = vld [vmem:[#allocation5 + $0x320] sm:$0xf] }
 0x5f7   :  { %v1014_v3 = vsub.f32 1.5, %v1013_v2 }
 0x5f8   :  { %v3734_v4 = vpop.eup %3733 }
 0x5f9   :  { %v1015_v5 = vmul.f32 %v3732_v60, %v1014_v3  ;;  %v1021_v6 = vmul.f32 %v3734_v4, %v1009_v61  ;;  %vm1027_vm9 = vweird.f32 %v3734_v4 }
 0x5fa   :  { %vm1028_vm11 = vmor %vm1026_vm10, %vm1027_vm9 }
 0x5fb   :  { %v1022_v63 = vmul.f32 %v3734_v4, %v1021_v6  ;;  %v1019_v7 = vsel %vm1018_vm8, %v3732_v60, %v1015_v5  ;;  %v1039_v60 = vperm.slane %v217_v59, 1  ;;  %v3139_v59 = vld [vmem:[#allocation5 + $0x368] sm:$0xf0] }
 0x5fc   :  { %v1030_v12 = vmul.f32 %v1019_v7, %v4020_v38  ;;  %v3033_v38 = vld [vmem:[#allocation5 + $0x314] sm:$0xf] }
 0x5fd   :  { %v1023_v9 = vmul.f32 0.5, %v1022_v63  ;;  %v3034_v26 = vor.u32 %v3472_v24, %v3033_v38 }
 0x5fe   :  { %v1032_v17 = vmul.f32 %v1030_v12, %v214_v14 }
 0x5ff   :  { %v1024_v10 = vsub.f32 1.5, %v1023_v9  ;;  %1228 = vmatpush.bf16.msra.mxu3 %v3034_v26 }
 0x600   :  { %v4033_v21 = vadd.f32 %v1032_v17, %v215_v18 }
 0x601   :  { %v1025_v13 = vmul.f32 %v3734_v4, %v1024_v10 }
 0x603   :  { %v1029_v15 = vsel %vm1028_vm11, %v3734_v4, %v1025_v13 }
 0x604   :  { %v1031_v16 = vmul.f32 %v1029_v15, %v4025_v55  ;;  %v3029_v55 = vld [vmem:[#allocation5 + $0x27c] sm:$0xf] }
 0x605   :  { %v3030_v30 = vor.u32 %v3471_v29, %v3029_v55 }
 0x606   :  { %v1033_v19 = vmul.f32 %v1031_v16, %v214_v14 }
 0x607   :  { %1229 = vmatpush.bf16.msra.mxu3 %v3030_v30 }
 0x608   :  { %v4035_v22 = vadd.f32 %v1033_v19, %v215_v18  ;;  %v218_v19 = vld [vmem:[#allocation7 + $0x1d] ss:$0 sm:$0xff] }
 0x60a   :  { %v1036_v23 = vpack.c.bf16 %v4035_v22, %v4033_v21 }
 0x60b   :  { %1230 = vmatpush.bf16.msra.mxu3 %v3026_v37 }
 0x60c   :  { %1130 = vmatmul.bf16.vlgmr.msrb.gmra.mxu1 %v1036_v23  ;;  %1144 = vmatmul.bf16.vlgmr.msrb.gmra.mxu2 %v1036_v23 }
 0x60f   :  { %1231 = vmatpush.bf16.msra.mxu3 %v3022_v11  ;;  %v3506_v11 = vld [vmem:[#allocation5 + $0x49c] sm:$0xf0] }
 0x610   :  { %v3170_v44 = vor.u32 %v3506_v11, %v3169_v42 }
 0x613   :  { %1232 = vmatpush.bf16.msra.mxu3 %v3018_v48  ;;  %v3150_v48 = vor.u32 %v3502_v46, %v3149_v45  ;;  %v3485_v45 = vld [vmem:[#allocation5 + $0x74] sm:$0xf0] }
 0x617   :  { %1233 = vmatpush.bf16.msra.mxu3 %v3014_v54  ;;  %v3137_v54 = vld [vmem:[#allocation5 + $0x31c] sm:$0xf] }
 0x61b   :  { %1610 = vmatpush.bf16.msrb.mxu3 %v3170_v44  ;;  %v3085_v44 = vld [vmem:[#allocation5 + $0x2c] sm:$0xf] }
 0x61f   :  { %1611 = vmatpush.bf16.msrb.mxu3 %v3158_v39 }
 0x689   :  { %v1131_v58 = vpop.f32.mrf.mxu1 }
 0x68a   :  { %v1132_v2 = vadd.f32 %v1131_v58, %v1038_v62  ;;  %v3138_v58 = vor.u32 %v3499_v56, %v3137_v54 }
 0x68c   :  { %v1150_v6 = vmax.f32 %v1132_v2, 0.0  ;;  %v3496_v2 = vld [vmem:[#allocation5 + $0x2cc] sm:$0xf0] }
 0x68f   :  { %v1145_v61 = vpop.f32.mrf.mxu2 }
 0x690   :  { %v1146_v0 = vadd.f32 %v1145_v61, %v1039_v60  ;;  %v3500_v61 = vld [vmem:[#allocation5 + $0x36c] sm:$0xf0] }
 0x691   :  { %v1133_v1 = vpop.f32.mrf.mxu1 }
 0x692   :  { %v1151_v3 = vmax.f32 %v1146_v0, 0.0  ;;  %v1134_v4 = vadd.f32 %v1133_v1, %v1038_v62  ;;  %v3142_v62 = vor.u32 %v3498_v57, %v3139_v59  ;;  %v3125_v1 = vld [vmem:[#allocation5 + $0x284] sm:$0xf] }
 0x694   :  { %v1154_v7 = vpack.c.bf16 %v1151_v3, %v1150_v6  ;;  %v1152_v9 = vmax.f32 %v1134_v4, 0.0  ;;  %1598 = vmatpush.bf16.msra.mxu2 %v3142_v62  ;;  %v3495_v3 = vld [vmem:[#allocation5 + $0x288] sm:$0xf]  ;;  %v3126_v4 = vor.u32 %v3496_v2, %v3125_v1  ;;  %v3133_v6 = vld [vmem:[#allocation5 + $0x28c] sm:$0xf] }
 0x696   :  { %v1174_v13 = vunpack.c.l.b16 %v1154_v7  ;;  %v1258_v14 = vunpack.c.h.b16 %v1154_v7 }
 0x697   :  { %v1147_v5 = vpop.f32.mrf.mxu2 }
 0x698   :  { %v1148_v63 = vadd.f32 %v1147_v5, %v1039_v60  ;;  %v3145_v60 = vld [vmem:[#allocation5 + $0x324] sm:$0xf]  ;;  %v3127_v5 = vld [vmem:[#allocation5 + $0x2d0] sm:$0xf0] }
 0x699   :  { %v3146_v0 = vor.u32 %v3500_v61, %v3145_v60  ;;  %v3130_v7 = vor.u32 %v3495_v3, %v3127_v5  ;;  %v219_v5 = vld [vmem:[#allocation7 + $0x1e] ss:$0 sm:$0xff] }
 0x69a   :  { %v1153_v10 = vmax.f32 %v1148_v63, 0.0  ;;  %v3497_v63 = vld [vmem:[#allocation5 + $0x2d4] sm:$0xf0] }
 0x69b   :  { %1612 = vmatpush.bf16.msrb.mxu3 %v3146_v0  ;;  %1599 = vmatpush.bf16.msra.mxu2 %v3130_v7 }
 0x69c   :  { %v1155_v12 = vpack.c.bf16 %v1153_v10, %v1152_v9  ;;  %v3134_v9 = vor.u32 %v3497_v63, %v3133_v6  ;;  %v3113_v10 = vld [vmem:[#allocation5 + $0x1ec] sm:$0xf] }
 0x69e   :  { %v1175_v15 = vunpack.c.l.b16 %v1155_v12  ;;  %v1259_v16 = vunpack.c.h.b16 %v1155_v12  ;;  %v3493_v12 = vld [vmem:[#allocation5 + $0x234] sm:$0xf0] }
 0x69f   :  { %1613 = vmatpush.bf16.msrb.mxu3 %v3134_v9  ;;  %v220_v9 = vld [vmem:[#allocation7 + $0x1f] ss:$0 sm:$0xff] }
 0x6a0   :  { %v1176_v17 = vpack.c.b16 %v1175_v15, %v1174_v13  ;;  %v1260_v18 = vpack.c.b16 %v1259_v16, %v1258_v14  ;;  %v3492_v13 = vld [vmem:[#allocation5 + $0x1f0] sm:$0xf]  ;;  %v3114_v14 = vor.u32 %v3493_v12, %v3113_v10  ;;  %v3115_v15 = vld [vmem:[#allocation5 + $0x238] sm:$0xf0]  ;;  %v3121_v16 = vld [vmem:[#allocation5 + $0x1f4] sm:$0xf] }
 0x6a2   :  { %1234 = vmatmul.bf16.vlgmr.msra.gmra.mxu3 %v1176_v17  ;;  %1318 = vmatmul.bf16.vlgmr.msrb.gmra.mxu0 %v1260_v18  ;;  %v3494_v17 = vld [vmem:[#allocation5 + $0x23c] sm:$0xf0]  ;;  %v3118_v18 = vor.u32 %v3492_v13, %v3115_v15 }
 0x6a4   :  { %1600 = vmatpush.bf16.msra.mxu2 %v3118_v18 }
 0x71f   :  { %v1319_v23 = vpop.f32.mrf.mxu0 }
 0x725   :  { %v1235_v38 = vpop.f32.mrf.mxu3 }
 0x726   :  { %v1240_v24 = vadd.f32 %v1235_v38, %v218_v19  ;;  %v3490_v38 = vld [vmem:[#allocation5 + $0x19c] sm:$0xf0] }
 0x727   :  { %v1321_v55 = vpop.f32.mrf.mxu0 }
 0x728   :  { %v1324_v25 = vadd.f32 %v1319_v23, %v1240_v24  ;;  %v3101_v23 = vld [vmem:[#allocation5 + $0x154] sm:$0xf]  ;;  %v3489_v24 = vld [vmem:[#allocation5 + $0x158] sm:$0xf] }
 0x72a   :  { %v1326_v26 = vadd.f32 %v1324_v25, %v4033_v21  ;;  %v3102_v25 = vor.u32 %v3490_v38, %v3101_v23 }
 0x72c   :  { %1328 = vadd.xlane.f32.xlu1 %v1326_v26 }
 0x72d   :  { %v1237_v27 = vpop.f32.mrf.mxu3 }
 0x72e   :  { %v1241_v28 = vadd.f32 %v1237_v27, %v218_v19  ;;  %v3122_v19 = vor.u32 %v3494_v17, %v3121_v16  ;;  %v3109_v27 = vld [vmem:[#allocation5 + $0x15c] sm:$0xf] }
 0x730   :  { %v1325_v29 = vadd.f32 %v1321_v55, %v1241_v28  ;;  %1614 = vmatpush.bf16.msrb.mxu3 %v3122_v19  ;;  %v3491_v28 = vld [vmem:[#allocation5 + $0x1a4] sm:$0xf0] }
 0x732   :  { %v1327_v30 = vadd.f32 %v1325_v29, %v4035_v22  ;;  %v3161_v22 = vld [vmem:[#allocation5 + $0x44c] sm:$0xf]  ;;  %v3110_v29 = vor.u32 %v3491_v28, %v3109_v27 }
 0x733   :  { %v3162_v41 = vor.u32 %v3505_v40, %v3161_v22 }
 0x734   :  { %1330 = vadd.xlane.f32.xlu0 %v1327_v30  ;;  %1615 = vmatpush.bf16.msrb.mxu3 %v3110_v29 }
 0x735   :  { %1582 = vmatpush.bf16.msra.mxu1 %v3162_v41  ;;  %v3484_v41 = vld [vmem:[#allocation5 + $0x6c] sm:$0xf0] }
 0x736   :  { %v3078_v11 = vor.u32 %v3484_v41, %v3077_v20 }
 0x739   :  { %1583 = vmatpush.bf16.msra.mxu1 %v3150_v48  ;;  %v3086_v48 = vor.u32 %v3485_v45, %v3085_v44 }
 0x73d   :  { %1584 = vmatpush.bf16.msra.mxu1 %v3138_v58 }
 0x741   :  { %1585 = vmatpush.bf16.msra.mxu1 %v3126_v4 }
 0x745   :  { %1586 = vmatpush.bf16.msra.mxu1 %v3114_v14 }
 0x749   :  { %1587 = vmatpush.bf16.msra.mxu1 %v3102_v25 }
 0x79f   :  { %v1329_v31 = vpop.xlane.xlu1 %1328 }
 0x7a0   :  { %v1332_v32 = vmul.f32 %v1329_v31, %v4017_v50  ;;  %v3487_v31 = vld [vmem:[#allocation5 + $0x104] sm:$0xf0] }
 0x7a2   :  { %v4042_v33 = vsub.f32 %v1326_v26, %v1332_v32  ;;  %v3103_v26 = vld [vmem:[#allocation5 + $0x1a0] sm:$0xf0]  ;;  %v3486_v32 = vld [vmem:[#allocation5 + $0xc0] sm:$0xf] }
 0x7a3   :  { %v3106_v55 = vor.u32 %v3489_v24, %v3103_v26 }
 0x7a4   :  { %v1336_v34 = vmul.f32 %v4042_v33, %v4042_v33 }
 0x7a5   :  { %1601 = vmatpush.bf16.msra.mxu2 %v3106_v55 }
 0x7a6   :  { %1338 = vadd.xlane.f32.xlu2 %v1336_v34 }
 0x7a7   :  { %v1331_v35 = vpop.xlane.xlu0 %1330 }
 0x7a8   :  { %v1333_v21 = vmul.f32 %v1331_v35, %v4017_v50  ;;  %v3091_v35 = vld [vmem:[#allocation5 + $0x108] sm:$0xf0] }
 0x7a9   :  { %v3094_v22 = vor.u32 %v3486_v32, %v3091_v35 }
 0x7aa   :  { %v4047_v36 = vsub.f32 %v1327_v30, %v1333_v21  ;;  %v3089_v30 = vld [vmem:[#allocation5 + $0xbc] sm:$0xf]  ;;  %v3097_v21 = vld [vmem:[#allocation5 + $0xc4] sm:$0xf] }
 0x7ab   :  { %v3090_v34 = vor.u32 %v3487_v31, %v3089_v30  ;;  %1602 = vmatpush.bf16.msra.mxu2 %v3094_v22 }
 0x7ac   :  { %v1337_v37 = vmul.f32 %v4047_v36, %v4047_v36 }
 0x7ad   :  { %1588 = vmatpush.bf16.msra.mxu1 %v3090_v34 }
 0x7ae   :  { %1340 = vadd.xlane.f32.xlu1 %v1337_v37  ;;  %v3488_v37 = vld [vmem:[#allocation5 + $0x10c] sm:$0xf0] }
 0x7af   :  { %v3098_v40 = vor.u32 %v3488_v37, %v3097_v21  ;;  %1603 = vmatpush.bf16.msra.mxu2 %v3082_v47 }
 0x7b1   :  { %1616 = vmatpush.bf16.msrb.mxu3 %v3098_v40  ;;  %1589 = vmatpush.bf16.msra.mxu1 %v3078_v11 }
 0x7b5   :  { %1617 = vmatpush.bf16.msrb.mxu3 %v3086_v48 }
 0x819   :  { %v1339_v42 = vpop.xlane.xlu2 %1338 }
 0x81a   :  { %v1342_v46 = vmul.f32 %v1339_v42, %v4017_v50 }
 0x81c   :  { %v1344_v49 = vadd.f32 1e-05, %v1342_v46 }
 0x81e   :  { %3735 = vrsqrt.f32 %v1344_v49  ;;  %vm1352_vm13 = vweird.f32 %v1344_v49 }
 0x821   :  { %v1341_v51 = vpop.xlane.xlu1 %1340 }
 0x822   :  { %v1343_v52 = vmul.f32 %v1341_v51, %v4017_v50 }
 0x824   :  { %v3736_v53 = vpop.eup %3735  ;;  %v1345_v39 = vadd.f32 1e-05, %v1343_v52 }
 0x825   :  { %v1347_v54 = vmul.f32 %v3736_v53, %v1344_v49  ;;  %vm1353_vm12 = vweird.f32 %v3736_v53 }
 0x826   :  { %3737 = vrsqrt.f32 %v1345_v39  ;;  %vm1354_vm14 = vmor %vm1352_vm13, %vm1353_vm12  ;;  %vm1362_vm5 = vweird.f32 %v1345_v39 }
 0x827   :  { %v1348_v56 = vmul.f32 %v3736_v53, %v1347_v54 }
 0x829   :  { %v1349_v57 = vmul.f32 0.5, %v1348_v56 }
 0x82b   :  { %v1350_v58 = vsub.f32 1.5, %v1349_v57 }
 0x82c   :  { %v3738_v59 = vpop.eup %3737 }
 0x82d   :  { %v1351_v60 = vmul.f32 %v3736_v53, %v1350_v58  ;;  %v1357_v61 = vmul.f32 %v3738_v59, %v1345_v39  ;;  %vm1363_vm15 = vweird.f32 %v3738_v59 }
 0x82e   :  { %vm1364_vm6 = vmor %vm1362_vm5, %vm1363_vm15 }
 0x82f   :  { %v1358_v62 = vmul.f32 %v3738_v59, %v1357_v61  ;;  %v1355_v0 = vsel %vm1354_vm14, %v3736_v53, %v1351_v60  ;;  %vm2591_vm14 = vcmask 1040384  }
 0x830   :  { %v1366_v3 = vmul.f32 %v1355_v0, %v4042_v33  ;;  %v1437_v33 = vld [vmem:[#allocation7 + $0x30] ss:$8 sm:$0x7] }
 0x831   :  { %v1359_v1 = vmul.f32 0.5, %v1358_v62  ;;  %v1448_v16 = vperm.slane %v1437_v33, 0  ;;  %v1449_v17 = vperm.slane %v1437_v33, 1  ;;  %v1450_v55 = vperm.slane %v1437_v33, 2 }
 0x832   :  { %v1368_v7 = vmul.f32 %v1366_v3, %v219_v5 }
 0x833   :  { %v1360_v2 = vsub.f32 1.5, %v1359_v1 }
 0x834   :  { %v4055_v12 = vadd.f32 %v1368_v7, %v220_v9 }
 0x835   :  { %v1361_v4 = vmul.f32 %v3738_v59, %v1360_v2 }
 0x837   :  { %v1365_v6 = vsel %vm1364_vm6, %v3738_v59, %v1361_v4 }
 0x838   :  { %v1367_v63 = vmul.f32 %v1365_v6, %v4047_v36 }
 0x83a   :  { %v1369_v10 = vmul.f32 %v1367_v63, %v219_v5 }
 0x83c   :  { %v4057_v13 = vadd.f32 %v1369_v10, %v220_v9 }
 0x83e   :  { %v1446_v14 = vpack.c.bf16 %v4057_v13, %v4055_v12 }
 0x840   :  { %1590 = vmatmul.bf16.vlgmr.msra.gmra.mxu1 %v1446_v14  ;;  %1604 = vmatmul.bf16.vlgmr.msra.gmra.mxu2 %v1446_v14 }
 0x841   :  { %1618 = vmatmul.bf16.vlgmr.msrb.gmra.mxu3 %v1446_v14 }
 0x8bd   :  { %v1591_v15 = vpop.f32.mrf.mxu1 }
 0x8be   :  { %v1592_v19 = vadd.f32 %v1591_v15, %v1448_v16 }
 0x8c0   :  { %v1624_v26 = vmul.f32 0.17677669, %v1592_v19 }
 0x8c2   :  { %v1646_v22 = vpack.c.bf16 %v1624_v26, %v1624_v26 }
 0x8c3   :  { %v1605_v18 = vpop.f32.mrf.mxu2 }
 0x8c4   :  { %v1606_v36 = vadd.f32 %v1605_v18, %v1449_v17  ;;  %v1619_v23 = vpop.f32.mrf.mxu3 }
 0x8c5   :  { %v1593_v38 = vpop.f32.mrf.mxu1  ;;  %v1620_v34 = vadd.f32 %v1619_v23, %v1450_v55 }
 0x8c6   :  { %v1594_v24 = vadd.f32 %v1593_v38, %v1448_v16  ;;  %v1674_v25 = vpack.c.bf16 %v1606_v36, %v1606_v36 }
 0x8c7   :  { %v1702_v44 = vpack.c.bf16 %v1620_v34, %v1620_v34 }
 0x8c8   :  { %v1625_v27 = vmul.f32 0.17677669, %v1594_v24  ;;  %v1714_v28 = vsel %vm485_vm0, %v1674_v25, 0 }
 0x8c9   :  { %1723 = vmatpush.bf16.xpose.msra.mxu0 %v1714_v28  ;;  %v1962_v51 = vsel %vm738_vm1, %v1702_v44, 0 }
 0x8ca   :  { %v3642_v29 = vpack.i.bf16 %v1625_v27, %v1624_v26  ;;  %v1647_v41 = vpack.c.bf16 %v1625_v27, %v1625_v27 }
 0x8cb   :  { %v1607_v30 = vpop.f32.mrf.mxu2 }
 0x8cc   :  { %v1608_v31 = vadd.f32 %v1607_v30, %v1449_v17  ;;  %v1621_v32 = vpop.f32.mrf.mxu3  ;;  %3643 = vrot.lane.b32.xlu2 %v3642_v29, %s3892_s5 }
 0x8cd   :  { %v1622_v35 = vadd.f32 %v1621_v32, %v1450_v55 }
 0x8ce   :  { %v3647_v21 = vpack.i.bf16 %v1608_v31, %v1606_v36  ;;  %v1675_v37 = vpack.c.bf16 %v1608_v31, %v1608_v31 }
 0x8cf   :  { %v4063_v40 = vpack.i.bf16 %v1622_v35, %v1620_v34  ;;  %v1703_v45 = vpack.c.bf16 %v1622_v35, %v1622_v35 }
 0x8d0   :  { %3648 = vrot.lane.b32.xlu1 %v3647_v21, %s3891_s4  ;;  %3638 = vrot.lane.b32.xlu0 %v3647_v21, %s3892_s5  ;;  %v1733_v20 = vsel %vm485_vm0, %v1675_v37, 0 }
 0x8d1   :  { %3171 = vmatmul.msk.bf16.vlgmr.msra.gmra.mxu0 %vm485_vm0, %v1646_v22  ;;  %1742 = vmatpush.bf16.xpose.msrb.mxu1 %v1733_v20  ;;  %v1981_v52 = vsel %vm738_vm1, %v1703_v45, 0 }
 0x8d4   :  { %3658 = vrot.lane.b32.xlu2 %v3647_v21, %s3890_s2 }
 0x8d8   :  { %3172 = vmatmul.msk.bf16.vlgmr.msrb.gmra.mxu1 %vm485_vm0, %v1647_v41  ;;  %3653 = vrot.lane.b32.xlu0 %v3642_v29, %s3891_s4 }
 0x8e0   :  { %3663 = vrot.lane.b32.xlu0 %v3642_v29, %s3890_s2 }
 0x926   :  { %v3644_v8 = vpop.permute.xlu2 %3643 }
 0x927   :  { %v3646_v4 = vunpack.i.h.bf16 %v3644_v8  ;;  %v3645_v5 = vunpack.i.l.bf16 %v3644_v8 }
 0x929   :  { %v1649_v63 = vpack.c.bf16 %v3646_v4, %v3646_v4  ;;  %v1648_v7 = vpack.c.bf16 %v3645_v5, %v3645_v5 }
 0x92e   :  { %v3659_v42 = vpop.permute.xlu2 %3658 }
 0x92f   :  { %v3661_v11 = vunpack.i.h.bf16 %v3659_v42  ;;  %v3660_v43 = vunpack.i.l.bf16 %v3659_v42 }
 0x931   :  { %v1679_v46 = vpack.c.bf16 %v3661_v11, %v3661_v11  ;;  %v1678_v47 = vpack.c.bf16 %v3660_v43, %v3660_v43 }
 0x933   :  { %v1790_v48 = vsel %vm485_vm0, %v1678_v47, 0  ;;  %v1809_v49 = vsel %vm485_vm0, %v1679_v46, 0 }
 0x934   :  { %1799 = vmatpush.bf16.xpose.msrb.mxu0 %v1790_v48  ;;  %1818 = vmatpush.bf16.xpose.msra.mxu1 %v1809_v49 }
 0x93c   :  { %1971 = vmatpush.bf16.msra.mxu0 %v1962_v51  ;;  %1990 = vmatpush.bf16.msrb.mxu1 %v1981_v52 }
 0x942   :  { %v3649_v53 = vpop.permute.xlu1 %3648  ;;  %v3639_v39 = vpop.permute.xlu0 %3638 }
 0x943   :  { %v3651_v54 = vunpack.i.h.bf16 %v3649_v53  ;;  %v3650_v56 = vunpack.i.l.bf16 %v3649_v53  ;;  %v3641_v57 = vunpack.i.h.bf16 %v3639_v39  ;;  %v3640_v58 = vunpack.i.l.bf16 %v3639_v39 }
 0x945   :  { %v1681_v59 = vpack.c.bf16 %v3651_v54, %v3651_v54  ;;  %v1680_v60 = vpack.c.bf16 %v3650_v56, %v3650_v56  ;;  %v1677_v61 = vpack.c.bf16 %v3641_v57, %v3641_v57  ;;  %v1676_v62 = vpack.c.bf16 %v3640_v58, %v3640_v58 }
 0x947   :  { %v1752_v0 = vsel %vm485_vm0, %v1676_v62, 0  ;;  %v1771_v1 = vsel %vm485_vm0, %v1677_v61, 0  ;;  %v1828_v2 = vsel %vm485_vm0, %v1680_v60, 0  ;;  %v1847_v3 = vsel %vm485_vm0, %v1681_v59, 0 }
 0x948   :  { %1761 = vmatpush.bf16.xpose.msrb.mxu2 %v1752_v0  ;;  %1780 = vmatpush.bf16.xpose.msra.mxu3 %v1771_v1 }
 0x94a   :  { %v3654_v6 = vpop.permute.xlu0 %3653 }
 0x94b   :  { %v3656_v23 = vunpack.i.h.bf16 %v3654_v6  ;;  %v3655_v38 = vunpack.i.l.bf16 %v3654_v6 }
 0x94d   :  { %v1653_v24 = vpack.c.bf16 %v3656_v23, %v3656_v23  ;;  %v1652_v25 = vpack.c.bf16 %v3655_v38, %v3655_v38 }
 0x94e   :  { %v1725_v9 = vpop.f32.mrf.mxu0 }
 0x94f   :  { %3173 = vmatmul.msk.bf16.vlgmr.msrb.gmra.mxu2 %vm485_vm0, %v1648_v7  ;;  %3174 = vmatmul.msk.bf16.vlgmr.msra.gmra.mxu3 %vm485_vm0, %v1649_v63  ;;  %v1862_v10 = vsel %vm638_vm2, %v1725_v9, -inf }
 0x950   :  { %1837 = vmatpush.bf16.xpose.msra.mxu2 %v1828_v2  ;;  %1856 = vmatpush.bf16.xpose.msrb.mxu3 %v1847_v3 }
 0x951   :  { %1863 = vmax.xlane.f32.xlu0 %v1862_v10 }
 0x952   :  { %v3664_v14 = vpop.permute.xlu0 %3663 }
 0x953   :  { %v3666_v33 = vunpack.i.h.bf16 %v3664_v14  ;;  %v3665_v15 = vunpack.i.l.bf16 %v3664_v14 }
 0x955   :  { %v1651_v16 = vpack.c.bf16 %v3666_v33, %v3666_v33  ;;  %v1650_v17 = vpack.c.bf16 %v3665_v15, %v3665_v15  ;;  %v1744_v18 = vpop.f32.mrf.mxu1 }
 0x956   :  { %v1727_v19 = vpop.f32.mrf.mxu0  ;;  %v1865_v36 = vsel %vm638_vm2, %v1744_v18, -inf }
 0x957   :  { %1866 = vmax.xlane.f32.xlu1 %v1865_v36  ;;  %3175 = vmatmul.msk.bf16.vlgmr.msrb.gmra.mxu0 %vm485_vm0, %v1650_v17 }
 0x958   :  { %3176 = vmatmul.msk.bf16.vlgmr.msra.gmra.mxu1 %vm485_vm0, %v1651_v16 }
 0x95d   :  { %v1746_v26 = vpop.f32.mrf.mxu1 }
 0x95f   :  { %3177 = vmatmul.msk.bf16.vlgmr.msra.gmra.mxu2 %vm485_vm0, %v1652_v25  ;;  %3178 = vmatmul.msk.bf16.vlgmr.msrb.gmra.mxu3 %vm485_vm0, %v1653_v24 }
 0x9c4   :  { %v1864_v22 = vpop.xlane.xlu0 %1863 }
 0x9c5   :  { %v1886_v20 = vsub.f32 %v1725_v9, %v1864_v22 }
 0x9c7   :  { %v1894_v45 = vmul.f32 1.442695, %v1886_v20 }
 0x9ca   :  { %v1867_v27 = vpop.xlane.xlu1 %1866 }
 0x9cb   :  { %v1887_v28 = vsub.f32 %v1744_v18, %v1867_v27 }
 0x9cd   :  { %v1896_v55 = vmul.f32 1.442695, %v1887_v28 }
 0x9cf   :  { %3739 = vpow2.f32 %v1896_v55 }
 0x9d0   :  { %3741 = vpow2.f32 %v1894_v45 }
 0x9d2   :  { %v1763_v29 = vpop.f32.mrf.mxu2  ;;  %v1782_v30 = vpop.f32.mrf.mxu3 }
 0x9d3   :  { %v1871_v31 = vsel %vm638_vm2, %v1782_v30, -inf  ;;  %v1868_v32 = vsel %vm638_vm2, %v1763_v29, -inf }
 0x9d4   :  { %1872 = vmax.xlane.f32.xlu2 %v1871_v31  ;;  %1869 = vmax.xlane.f32.xlu1 %v1868_v32  ;;  %v1801_v34 = vpop.f32.mrf.mxu0 }
 0x9d5   :  { %v3740_v35 = vpop.eup %3739  ;;  %v1820_v21 = vpop.f32.mrf.mxu1  ;;  %v1874_v11 = vsel %vm638_vm2, %v1801_v34, -inf }
 0x9d6   :  { %v1913_v37 = vsel %vm638_vm2, %v3740_v35, 0.0  ;;  %v1877_v42 = vsel %vm638_vm2, %v1820_v21, -inf  ;;  %v3742_v51 = vpop.eup %3741 }
 0x9d7   :  { %1914 = vadd.xlane.f32.xlu0 %v1913_v37  ;;  %v1910_v39 = vsel %vm638_vm2, %v3742_v51, 0.0 }
 0x9da   :  { %v1765_v41 = vpop.f32.mrf.mxu2  ;;  %v1784_v8 = vpop.f32.mrf.mxu3 }
 0x9dc   :  { %1878 = vmax.xlane.f32.xlu2 %v1877_v42  ;;  %1875 = vmax.xlane.f32.xlu1 %v1874_v11  ;;  %v1803_v43 = vpop.f32.mrf.mxu0 }
 0x9dd   :  { %v1822_v44 = vpop.f32.mrf.mxu1 }
 0x9e2   :  { %v1839_v46 = vpop.f32.mrf.mxu2  ;;  %v1858_v47 = vpop.f32.mrf.mxu3 }
 0x9e3   :  { %v1880_v48 = vsel %vm638_vm2, %v1839_v46, -inf  ;;  %v1883_v49 = vsel %vm638_vm2, %v1858_v47, -inf }
 0x9e4   :  { %1881 = vmax.xlane.f32.xlu2 %v1880_v48  ;;  %1884 = vmax.xlane.f32.xlu0 %v1883_v49 }
 0x9ea   :  { %v1841_v52 = vpop.f32.mrf.mxu2  ;;  %v1860_v53 = vpop.f32.mrf.mxu3 }
 0x9ec   :  { %1911 = vadd.xlane.f32.xlu2 %v1910_v39 }
 0xa47   :  { %v1873_v54 = vpop.xlane.xlu2 %1872  ;;  %v1870_v56 = vpop.xlane.xlu1 %1869 }
 0xa48   :  { %v1889_v57 = vsub.f32 %v1782_v30, %v1873_v54  ;;  %v1888_v58 = vsub.f32 %v1763_v29, %v1870_v56 }
 0xa4a   :  { %v1900_v59 = vmul.f32 1.442695, %v1889_v57  ;;  %v1898_v60 = vmul.f32 1.442695, %v1888_v58  ;;  %v1915_v61 = vpop.xlane.xlu0 %1914 }
 0xa4b   :  { %3743 = vrcp.f32 %v1915_v61 }
 0xa4c   :  { %3745 = vpow2.f32 %v1900_v59 }
 0xa4d   :  { %3747 = vpow2.f32 %v1898_v60 }
 0xa4f   :  { %v1879_v62 = vpop.xlane.xlu2 %1878  ;;  %v1876_v0 = vpop.xlane.xlu1 %1875 }
 0xa50   :  { %v1891_v1 = vsub.f32 %v1820_v21, %v1879_v62  ;;  %v1890_v2 = vsub.f32 %v1801_v34, %v1876_v0 }
 0xa51   :  { %v3744_v3 = vpop.eup %3743 }
 0xa52   :  { %v3746_v4 = vpop.eup %3745  ;;  %v1943_v5 = vmul.f32 %v3744_v3, %v3740_v35  ;;  %v1904_v6 = vmul.f32 1.442695, %v1891_v1  ;;  %v1902_v63 = vmul.f32 1.442695, %v1890_v2 }
 0xa53   :  { %v3748_v7 = vpop.eup %3747  ;;  %v1919_v9 = vsel %vm638_vm2, %v3746_v4, 0.0 }
 0xa54   :  { %v1951_v10 = vpack.c.bf16 %v1943_v5, %v1943_v5  ;;  %3749 = vpow2.f32 %v1904_v6  ;;  %v1916_v14 = vsel %vm638_vm2, %v3748_v7, 0.0  ;;  %1920 = vadd.xlane.f32.xlu1 %v1919_v9 }
 0xa55   :  { %3751 = vpow2.f32 %v1902_v63  ;;  %1917 = vadd.xlane.f32.xlu0 %v1916_v14 }
 0xa56   :  { %3180 = vmatmul.msk.bf16.vlgmr.msrb.gmra.mxu1 %vm638_vm2, %v1951_v10 }
 0xa57   :  { %v1882_v33 = vpop.xlane.xlu2 %1881  ;;  %v1885_v15 = vpop.xlane.xlu0 %1884 }
 0xa58   :  { %v1892_v16 = vsub.f32 %v1839_v46, %v1882_v33  ;;  %v1893_v17 = vsub.f32 %v1858_v47, %v1885_v15 }
 0xa5a   :  { %v4100_v18 = vpop.eup %3749  ;;  %v1906_v19 = vmul.f32 1.442695, %v1892_v16  ;;  %v1908_v36 = vmul.f32 1.442695, %v1893_v17 }
 0xa5b   :  { %v4102_v23 = vpop.eup %3751  ;;  %v1925_v38 = vsel %vm638_vm2, %v4100_v18, 0.0 }
 0xa5c   :  { %3753 = vpow2.f32 %v1906_v19  ;;  %v1922_v24 = vsel %vm638_vm2, %v4102_v23, 0.0 }
 0xa5d   :  { %3755 = vpow2.f32 %v1908_v36  ;;  %1926 = vadd.xlane.f32.xlu0 %v1925_v38  ;;  %1923 = vadd.xlane.f32.xlu2 %v1922_v24  ;;  %v3217_v36 = vld [vmem:[#allocation5 + $0x458] sm:$0xf]  ;;  %v3213_v38 = vld [vmem:[#allocation5 + $0x3c0] sm:$0xf] }
 0xa5f   :  { %v1912_v25 = vpop.xlane.xlu2 %1911 }
 0xa60   :  { %3757 = vrcp.f32 %v1912_v25  ;;  %v3513_v25 = vld [vmem:[#allocation5 + $0x408] sm:$0xf0] }
 0xa62   :  { %v4108_v26 = vpop.eup %3753 }
 0xa63   :  { %v4110_v27 = vpop.eup %3755  ;;  %v1928_v28 = vsel %vm638_vm2, %v4108_v26, 0.0 }
 0xa64   :  { %v1931_v55 = vsel %vm638_vm2, %v4110_v27, 0.0 }
 0xa65   :  { %1932 = vadd.xlane.f32.xlu0 %v1931_v55  ;;  %1929 = vadd.xlane.f32.xlu2 %v1928_v28  ;;  %v3214_v28 = vor.u32 %v3513_v25, %v3213_v38  ;;  %v3512_v55 = vld [vmem:[#allocation5 + $0x370] sm:$0xf0] }
 0xa66   :  { %v3758_v29 = vpop.eup %3757 }
 0xa67   :  { %v1942_v30 = vmul.f32 %v3758_v29, %v3742_v51 }
 0xa69   :  { %v1950_v31 = vpack.c.bf16 %v1942_v30, %v1942_v30 }
 0xa6b   :  { %3179 = vmatmul.msk.bf16.vlgmr.msra.gmra.mxu0 %vm638_vm2, %v1950_v31 }
 0xa6d   :  { %3668 = vrot.lane.b32.xlu1 %v4063_v40, %s3892_s5 }
 0xa79   :  { %3678 = vrot.lane.b32.xlu0 %v4063_v40, %s3890_s2 }
 0xa7d   :  { %3673 = vrot.lane.b32.xlu2 %v4063_v40, %s3891_s4 }
 0xac7   :  { %v1921_v21 = vpop.xlane.xlu1 %1920 }
 0xac8   :  { %v1918_v32 = vpop.xlane.xlu0 %1917  ;;  %3759 = vrcp.f32 %v1921_v21 }
 0xac9   :  { %3761 = vrcp.f32 %v1918_v32 }
 0xace   :  { %v3760_v41 = vpop.eup %3759 }
 0xacf   :  { %v3762_v8 = vpop.eup %3761  ;;  %v1945_v40 = vmul.f32 %v3760_v41, %v3746_v4 }
 0xad0   :  { %v1924_v34 = vpop.xlane.xlu2 %1923  ;;  %v1927_v22 = vpop.xlane.xlu0 %1926  ;;  %v1944_v47 = vmul.f32 %v3762_v8, %v3748_v7 }
 0xad1   :  { %3763 = vrcp.f32 %v1927_v22  ;;  %v1953_v59 = vpack.c.bf16 %v1945_v40, %v1945_v40 }
 0xad2   :  { %3765 = vrcp.f32 %v1924_v34  ;;  %v1952_v58 = vpack.c.bf16 %v1944_v47, %v1944_v47  ;;  %v3201_v47 = vld [vmem:[#allocation5 + $0x1f8] sm:$0xf] }
 0xad3   :  { %v4123_v35 = vpop.f32.mrf.mxu1 }
 0xad7   :  { %v3764_v61 = vpop.eup %3763 }
 0xad8   :  { %v1930_v37 = vpop.xlane.xlu2 %1929  ;;  %v1933_v51 = vpop.xlane.xlu0 %1932  ;;  %v1947_v4 = vmul.f32 %v3764_v61, %v4100_v18 }
 0xad9   :  { %3767 = vrcp.f32 %v1933_v51  ;;  %v3766_v62 = vpop.eup %3765  ;;  %v3197_v51 = vld [vmem:[#allocation5 + $0x160] sm:$0xf] }
 0xada   :  { %3769 = vrcp.f32 %v1930_v37  ;;  %v1946_v5 = vmul.f32 %v3766_v62, %v4102_v23  ;;  %v1955_v33 = vpack.c.bf16 %v1947_v4, %v1947_v4  ;;  %v3514_v23 = vld [vmem:[#allocation5 + $0x4a0] sm:$0xf0] }
 0xadb   :  { %v1994_v20 = vpop.f32.mrf.mxu1  ;;  %v3218_v24 = vor.u32 %v3514_v23, %v3217_v36 }
 0xadc   :  { %v1954_v15 = vpack.c.bf16 %v1946_v5, %v1946_v5 }
 0xadf   :  { %v3669_v42 = vpop.permute.xlu1 %3668  ;;  %v3768_v3 = vpop.eup %3767 }
 0xae0   :  { %v3674_v11 = vpop.permute.xlu2 %3673  ;;  %v3671_v43 = vunpack.i.h.bf16 %v3669_v42  ;;  %v3670_v44 = vunpack.i.l.bf16 %v3669_v42  ;;  %v3770_v7 = vpop.eup %3769  ;;  %v1949_v16 = vmul.f32 %v3768_v3, %v4110_v27  ;;  %v3209_v27 = vld [vmem:[#allocation5 + $0x328] sm:$0xf] }
 0xae1   :  { %v3676_v45 = vunpack.i.h.bf16 %v3674_v11  ;;  %v3675_v46 = vunpack.i.l.bf16 %v3674_v11  ;;  %v1948_v17 = vmul.f32 %v3770_v7, %v4108_v26  ;;  %v3210_v30 = vor.u32 %v3512_v55, %v3209_v27 }
 0xae2   :  { %v1705_v48 = vpack.c.bf16 %v3671_v43, %v3671_v43  ;;  %v1704_v49 = vpack.c.bf16 %v3670_v44, %v3670_v44  ;;  %v1957_v18 = vpack.c.bf16 %v1949_v16, %v1949_v16  ;;  %v1438_v16 = vld [vmem:[#allocation7 + $0x31] ss:$0 sm:$0xff] }
 0xae3   :  { %v1709_v52 = vpack.c.bf16 %v3676_v45, %v3676_v45  ;;  %v1708_v53 = vpack.c.bf16 %v3675_v46, %v3675_v46  ;;  %v1956_v19 = vpack.c.bf16 %v1948_v17, %v1948_v17  ;;  %v3205_v45 = vld [vmem:[#allocation5 + $0x290] sm:$0xf]  ;;  %v3511_v46 = vld [vmem:[#allocation5 + $0x2d8] sm:$0xf0] }
 0xae4   :  { %v2000_v39 = vsel %vm738_vm1, %v1704_v49, 0  ;;  %v2019_v54 = vsel %vm738_vm1, %v1705_v48, 0  ;;  %v3206_v40 = vor.u32 %v3511_v46, %v3205_v45  ;;  %v3510_v48 = vld [vmem:[#allocation5 + $0x240] sm:$0xf0]  ;;  %v3253_v46 = vld [vmem:[#allocation5 + $0x294] sm:$0xf] }
 0xae5   :  { %2009 = vmatpush.bf16.msrb.mxu2 %v2000_v39  ;;  %2028 = vmatpush.bf16.msra.mxu3 %v2019_v54  ;;  %v2076_v56 = vsel %vm738_vm1, %v1708_v53, 0  ;;  %v2095_v57 = vsel %vm738_vm1, %v1709_v52, 0  ;;  %v3202_v49 = vor.u32 %v3510_v48, %v3201_v47  ;;  %v3509_v52 = vld [vmem:[#allocation5 + $0x1a8] sm:$0xf0]  ;;  %v3193_v39 = vld [vmem:[#allocation5 + $0xc8] sm:$0xf] }
 0xae6   :  { %v3198_v53 = vor.u32 %v3509_v52, %v3197_v51  ;;  %v3508_v54 = vld [vmem:[#allocation5 + $0x110] sm:$0xf0]  ;;  %v3524_v47 = vld [vmem:[#allocation5 + $0x2dc] sm:$0xf0]  ;;  %v3245_v52 = vld [vmem:[#allocation5 + $0x1fc] sm:$0xf] }
 0xae7   :  { %v3254_v48 = vor.u32 %v3524_v47, %v3253_v46  ;;  %v1439_v47 = vld [vmem:[#allocation7 + $0x32] ss:$0 sm:$0xff] }
 0xae8   :  { %v4129_v60 = vpop.f32.mrf.mxu0  ;;  %3181 = vmatmul.msk.bf16.vlgmr.msrb.gmra.mxu2 %vm638_vm2, %v1952_v58  ;;  %3182 = vmatmul.msk.bf16.vlgmr.msra.gmra.mxu3 %vm638_vm2, %v1953_v59  ;;  %v3507_v58 = vld [vmem:[#allocation5 + $0x78] sm:$0xf0] }
 0xae9   :  { %2085 = vmatpush.bf16.msra.mxu2 %v2076_v56  ;;  %2104 = vmatpush.bf16.msrb.mxu3 %v2095_v57  ;;  %v3194_v56 = vor.u32 %v3508_v54, %v3193_v39  ;;  %v3189_v57 = vld [vmem:[#allocation5 + $0x30] sm:$0xf]  ;;  %v3521_v39 = vld [vmem:[#allocation5 + $0x200] sm:$0xf] }
 0xaea   :  { %v3190_v59 = vor.u32 %v3507_v58, %v3189_v57  ;;  %v3237_v58 = vld [vmem:[#allocation5 + $0x164] sm:$0xf] }
 0xaeb   :  { %v3679_v0 = vpop.permute.xlu0 %3678 }
 0xaec   :  { %v3681_v1 = vunpack.i.h.bf16 %v3679_v0  ;;  %v3680_v2 = vunpack.i.l.bf16 %v3679_v0 }
 0xaee   :  { %v1707_v6 = vpack.c.bf16 %v3681_v1, %v3681_v1  ;;  %v1706_v63 = vpack.c.bf16 %v3680_v2, %v3680_v2 }
 0xaf0   :  { %v1975_v9 = vpop.f32.mrf.mxu0  ;;  %v2038_v10 = vsel %vm738_vm1, %v1706_v63, 0  ;;  %v2057_v14 = vsel %vm738_vm1, %v1707_v6, 0 }
 0xaf1   :  { %2047 = vmatpush.bf16.msrb.mxu0 %v2038_v10  ;;  %2066 = vmatpush.bf16.msra.mxu1 %v2057_v14 }
 0xaf4   :  { %3183 = vmatmul.msk.bf16.vlgmr.msrb.gmra.mxu0 %vm638_vm2, %v1954_v15  ;;  %3184 = vmatmul.msk.bf16.vlgmr.msra.gmra.mxu1 %vm638_vm2, %v1955_v33 }
 0xaf5   :  { %2189 = vmatpush.bf16.msra.mxu0 %v3218_v24 }
 0xaf8   :  { %3185 = vmatmul.msk.bf16.vlgmr.msra.gmra.mxu2 %vm638_vm2, %v1956_v19  ;;  %3186 = vmatmul.msk.bf16.vlgmr.msrb.gmra.mxu3 %vm638_vm2, %v1957_v18 }
 0xaf9   :  { %2190 = vmatpush.bf16.msra.mxu0 %v3214_v28 }
 0xafd   :  { %2191 = vmatpush.bf16.msra.mxu0 %v3210_v30 }
 0xb01   :  { %2192 = vmatpush.bf16.msra.mxu0 %v3206_v40  ;;  %v3523_v40 = vld [vmem:[#allocation5 + $0x298] sm:$0xf] }
 0xb05   :  { %2193 = vmatpush.bf16.msra.mxu0 %v3202_v49  ;;  %v3255_v49 = vld [vmem:[#allocation5 + $0x2e0] sm:$0xf0] }
 0xb06   :  { %v3258_v51 = vor.u32 %v3523_v40, %v3255_v49 }
 0xb09   :  { %2194 = vmatpush.bf16.msra.mxu0 %v3198_v53  ;;  %v3522_v53 = vld [vmem:[#allocation5 + $0x244] sm:$0xf0] }
 0xb0a   :  { %v3246_v54 = vor.u32 %v3522_v53, %v3245_v52 }
 0xb0d   :  { %2195 = vmatpush.bf16.msra.mxu0 %v3194_v56  ;;  %v3247_v56 = vld [vmem:[#allocation5 + $0x248] sm:$0xf0] }
 0xb0e   :  { %v3250_v57 = vor.u32 %v3521_v39, %v3247_v56  ;;  %v3536_v56 = vld [vmem:[#allocation5 + $0x37c] sm:$0xf0] }
 0xb11   :  { %2196 = vmatpush.bf16.msra.mxu0 %v3190_v59  ;;  %v3520_v59 = vld [vmem:[#allocation5 + $0x1ac] sm:$0xf0] }
 0xb6b   :  { %v2011_v26 = vpop.f32.mrf.mxu2  ;;  %v2030_v29 = vpop.f32.mrf.mxu3 }
 0xb6c   :  { %v3687_v41 = vpack.i.bf16 %v2030_v29, %v2011_v26  ;;  %v3530_v26 = vld [vmem:[#allocation5 + $0x4a4] sm:$0xf0]  ;;  %v3529_v29 = vld [vmem:[#allocation5 + $0x460] sm:$0xf] }
 0xb71   :  { %v2049_v31 = vpop.f32.mrf.mxu0  ;;  %v2068_v32 = vpop.f32.mrf.mxu1 }
 0xb72   :  { %v3682_v34 = vpack.i.bf16 %v2068_v32, %v2049_v31  ;;  %v3279_v31 = vld [vmem:[#allocation5 + $0x4a8] sm:$0xf0] }
 0xb73   :  { %v2013_v21 = vpop.f32.mrf.mxu2  ;;  %v2032_v37 = vpop.f32.mrf.mxu3  ;;  %v3282_v32 = vor.u32 %v3529_v29, %v3279_v31 }
 0xb74   :  { %3683 = vrot.lane.b32.xlu1 %v3682_v34, %s3890_s2  ;;  %v3269_v34 = vld [vmem:[#allocation5 + $0x3c4] sm:$0xf]  ;;  %v3528_v21 = vld [vmem:[#allocation5 + $0x40c] sm:$0xf0]  ;;  %v3527_v37 = vld [vmem:[#allocation5 + $0x3c8] sm:$0xf] }
 0xb75   :  { %2349 = vmatpush.bf16.msrb.mxu2 %v3282_v32 }
 0xb79   :  { %v2051_v22 = vpop.f32.mrf.mxu0  ;;  %v2070_v20 = vpop.f32.mrf.mxu1 }
 0xb7a   :  { %v3270_v22 = vor.u32 %v3528_v21, %v3269_v34  ;;  %v3271_v20 = vld [vmem:[#allocation5 + $0x410] sm:$0xf0] }
 0xb7b   :  { %v2087_v8 = vpop.f32.mrf.mxu2  ;;  %v2106_v42 = vpop.f32.mrf.mxu3 }
 0xb7c   :  { %3688 = vrot.lane.b32.xlu1 %v3687_v41, %s3891_s4  ;;  %v3692_v11 = vpack.i.bf16 %v2106_v42, %v2087_v8  ;;  %v3274_v41 = vor.u32 %v3527_v37, %v3271_v20  ;;  %v3261_v8 = vld [vmem:[#allocation5 + $0x32c] sm:$0xf]  ;;  %v3526_v42 = vld [vmem:[#allocation5 + $0x374] sm:$0xf0] }
 0xb7e   :  { %2350 = vmatpush.bf16.msrb.mxu2 %v3274_v41 }
 0xb83   :  { %v2089_v43 = vpop.f32.mrf.mxu2  ;;  %v2108_v44 = vpop.f32.mrf.mxu3 }
 0xb84   :  { %3693 = vrot.lane.b32.xlu1 %v3692_v11, %s3892_s5  ;;  %v3525_v11 = vld [vmem:[#allocation5 + $0x330] sm:$0xf]  ;;  %v3262_v43 = vor.u32 %v3526_v42, %v3261_v8  ;;  %v3263_v44 = vld [vmem:[#allocation5 + $0x378] sm:$0xf0] }
 0xb85   :  { %v3266_v45 = vor.u32 %v3525_v11, %v3263_v44 }
 0xb87   :  { %2351 = vmatpush.bf16.msrb.mxu2 %v3266_v45 }
 0xb8b   :  { %2352 = vmatpush.bf16.msrb.mxu2 %v3258_v51  ;;  %v1440_v51 = vld [vmem:[#allocation7 + $0x33] ss:$0 sm:$0xff] }
 0xb8f   :  { %2353 = vmatpush.bf16.msrb.mxu2 %v3250_v57  ;;  %v3337_v57 = vld [vmem:[#allocation5 + $0x338] sm:$0xf] }
 0xbe6   :  { %v3684_v61 = vpop.permute.xlu1 %3683 }
 0xbe7   :  { %v3686_v4 = vunpack.i.h.bf16 %v3684_v61  ;;  %v3685_v5 = vunpack.i.l.bf16 %v3684_v61  ;;  %v3519_v61 = vld [vmem:[#allocation5 + $0x168] sm:$0xf] }
 0xbee   :  { %v3689_v62 = vpop.permute.xlu1 %3688 }
 0xbef   :  { %v3691_v0 = vunpack.i.h.bf16 %v3689_v62  ;;  %v3690_v1 = vunpack.i.l.bf16 %v3689_v62  ;;  %v3238_v62 = vor.u32 %v3520_v59, %v3237_v58  ;;  %v3544_v59 = vld [vmem:[#allocation5 + $0x380] sm:$0xf0] }
 0xbf1   :  { %v2135_v2 = vsel %vm485_vm0, %v4123_v35, %v3691_v0  ;;  %v2134_v3 = vsel %vm485_vm0, %v4129_v60, %v3690_v1  ;;  %v3239_v0 = vld [vmem:[#allocation5 + $0x1b0] sm:$0xf0] }
 0xbf2   :  { %v2136_v9 = vsel %vm914_vm3, %v2134_v3, %v3685_v5  ;;  %v2137_v10 = vsel %vm914_vm3, %v2135_v2, %v3686_v4  ;;  %v3242_v1 = vor.u32 %v3519_v61, %v3239_v0  ;;  %v3229_v2 = vld [vmem:[#allocation5 + $0xcc] sm:$0xf]  ;;  %v3518_v3 = vld [vmem:[#allocation5 + $0x114] sm:$0xf0]  ;;  %v3517_v4 = vld [vmem:[#allocation5 + $0xd0] sm:$0xf]  ;;  %v3338_v61 = vor.u32 %v3544_v59, %v3337_v57 }
 0xbf3   :  { %v3230_v5 = vor.u32 %v3518_v3, %v3229_v2  ;;  %v3333_v0 = vld [vmem:[#allocation5 + $0x2a0] sm:$0xf]  ;;  %v3543_v2 = vld [vmem:[#allocation5 + $0x2e8] sm:$0xf0] }
 0xbf4   :  { %2354 = vmatpush.bf16.msrb.mxu2 %v3242_v1  ;;  %v3334_v3 = vor.u32 %v3543_v2, %v3333_v0 }
 0xbf6   :  { %v3694_v6 = vpop.permute.xlu1 %3693 }
 0xbf7   :  { %v3696_v63 = vunpack.i.h.bf16 %v3694_v6  ;;  %v3695_v7 = vunpack.i.l.bf16 %v3694_v6  ;;  %v3231_v6 = vld [vmem:[#allocation5 + $0x118] sm:$0xf0] }
 0xbf9   :  { %v2138_v14 = vsel %vm917_vm4, %v2136_v9, %v3695_v7  ;;  %v2139_v33 = vsel %vm917_vm4, %v2137_v10, %v3696_v63  ;;  %v3221_v63 = vld [vmem:[#allocation5 + $0x34] sm:$0xf]  ;;  %v3516_v7 = vld [vmem:[#allocation5 + $0x7c] sm:$0xf0]  ;;  %v3234_v10 = vor.u32 %v3517_v4, %v3231_v6  ;;  %v3297_v4 = vld [vmem:[#allocation5 + $0x204] sm:$0xf] }
 0xbfa   :  { %v2140_v15 = vpack.c.bf16 %v2139_v33, %v2138_v14  ;;  %v3515_v14 = vld [vmem:[#allocation5 + $0x38] sm:$0xf]  ;;  %v3223_v33 = vld [vmem:[#allocation5 + $0x80] sm:$0xf0]  ;;  %v3329_v6 = vld [vmem:[#allocation5 + $0x208] sm:$0xf] }
 0xbfb   :  { %2355 = vmatpush.bf16.msrb.mxu2 %v3234_v10  ;;  %v3293_v10 = vld [vmem:[#allocation5 + $0x16c] sm:$0xf] }
 0xbfc   :  { %2197 = vmatmul.bf16.vlgmr.msra.gmra.mxu0 %v2140_v15 }
 0xc79   :  { %v2198_v35 = vpop.f32.mrf.mxu0 }
 0xc7a   :  { %v2199_v17 = vadd.f32 %v2198_v35, %v1438_v16  ;;  %v3226_v35 = vor.u32 %v3515_v14, %v3223_v33  ;;  %v3533_v14 = vld [vmem:[#allocation5 + $0x1b4] sm:$0xf0]  ;;  %v3325_v33 = vld [vmem:[#allocation5 + $0x170] sm:$0xf] }
 0xc7c   :  { %v2203_v60 = vadd.f32 %v2199_v17, %v4055_v12  ;;  %2356 = vmatpush.bf16.msrb.mxu2 %v3226_v35 }
 0xc7e   :  { %2205 = vadd.xlane.f32.xlu0 %v2203_v60 }
 0xc81   :  { %v2200_v18 = vpop.f32.mrf.mxu0 }
 0xc82   :  { %v2201_v19 = vadd.f32 %v2200_v18, %v1438_v16  ;;  %v3222_v16 = vor.u32 %v3516_v7, %v3221_v63  ;;  %v3538_v18 = vld [vmem:[#allocation5 + $0x4ac] sm:$0xf0]  ;;  %v3542_v7 = vld [vmem:[#allocation5 + $0x250] sm:$0xf0] }
 0xc84   :  { %v2204_v36 = vadd.f32 %v2201_v19, %v4057_v13  ;;  %v3277_v13 = vld [vmem:[#allocation5 + $0x45c] sm:$0xf]  ;;  %v3345_v19 = vld [vmem:[#allocation5 + $0x468] sm:$0xf] }
 0xc85   :  { %v3278_v30 = vor.u32 %v3530_v26, %v3277_v13  ;;  %v3341_v13 = vld [vmem:[#allocation5 + $0x3d0] sm:$0xf]  ;;  %v3545_v26 = vld [vmem:[#allocation5 + $0x418] sm:$0xf0] }
 0xc86   :  { %2207 = vadd.xlane.f32.xlu2 %v2204_v36  ;;  %v3342_v32 = vor.u32 %v3545_v26, %v3341_v13 }
 0xc87   :  { %2335 = vmatpush.bf16.msrb.mxu1 %v3278_v30 }
 0xc8b   :  { %2336 = vmatpush.bf16.msrb.mxu1 %v3270_v22 }
 0xc8f   :  { %2337 = vmatpush.bf16.msrb.mxu1 %v3262_v43 }
 0xc93   :  { %2338 = vmatpush.bf16.msrb.mxu1 %v3254_v48 }
 0xc97   :  { %2339 = vmatpush.bf16.msrb.mxu1 %v3246_v54 }
 0xc9b   :  { %2340 = vmatpush.bf16.msrb.mxu1 %v3238_v62  ;;  %v3535_v62 = vld [vmem:[#allocation5 + $0x2e4] sm:$0xf0] }
 0xc9f   :  { %2341 = vmatpush.bf16.msrb.mxu1 %v3230_v5  ;;  %v3534_v5 = vld [vmem:[#allocation5 + $0x24c] sm:$0xf0] }
 0xca0   :  { %v3298_v63 = vor.u32 %v3534_v5, %v3297_v4 }
 0xca3   :  { %2342 = vmatpush.bf16.msrb.mxu1 %v3222_v16  ;;  %v3541_v16 = vld [vmem:[#allocation5 + $0x1b8] sm:$0xf0] }
 0xca4   :  { %v3326_v35 = vor.u32 %v3541_v16, %v3325_v33  ;;  %v3552_v16 = vld [vmem:[#allocation5 + $0x384] sm:$0xf0] }
 0xcf1   :  { %v2206_v23 = vpop.xlane.xlu0 %2205 }
 0xcf2   :  { %v2209_v38 = vmul.f32 %v2206_v23, %v4017_v50 }
 0xcf4   :  { %v4157_v24 = vsub.f32 %v2203_v60, %v2209_v38  ;;  %v3313_v60 = vld [vmem:[#allocation5 + $0x464] sm:$0xf]  ;;  %v3546_v38 = vld [vmem:[#allocation5 + $0x4b0] sm:$0xf0] }
 0xcf5   :  { %v3314_v23 = vor.u32 %v3538_v18, %v3313_v60  ;;  %v3532_v60 = vld [vmem:[#allocation5 + $0x11c] sm:$0xf0]  ;;  %v3321_v18 = vld [vmem:[#allocation5 + $0xd8] sm:$0xf] }
 0xcf6   :  { %v2213_v25 = vmul.f32 %v4157_v24, %v4157_v24 }
 0xcf7   :  { %2439 = vmatpush.bf16.msra.mxu3 %v3314_v23 }
 0xcf8   :  { %2215 = vadd.xlane.f32.xlu1 %v2213_v25  ;;  %v3309_v25 = vld [vmem:[#allocation5 + $0x3cc] sm:$0xf] }
 0xcf9   :  { %v2208_v28 = vpop.xlane.xlu2 %2207 }
 0xcfa   :  { %v2210_v27 = vmul.f32 %v2208_v28, %v4017_v50  ;;  %v3537_v28 = vld [vmem:[#allocation5 + $0x414] sm:$0xf0] }
 0xcfb   :  { %v3310_v29 = vor.u32 %v3537_v28, %v3309_v25  ;;  %v3531_v25 = vld [vmem:[#allocation5 + $0x84] sm:$0xf0]  ;;  %v3317_v28 = vld [vmem:[#allocation5 + $0x40] sm:$0xf] }
 0xcfc   :  { %v4162_v55 = vsub.f32 %v2204_v36, %v2210_v27 }
 0xcfd   :  { %2440 = vmatpush.bf16.msra.mxu3 %v3310_v29  ;;  %v1442_v29 = vld [vmem:[#allocation7 + $0x34] ss:$8 sm:$0x3] }
 0xcfe   :  { %v2214_v12 = vmul.f32 %v4162_v55, %v4162_v55 }
 0xd00   :  { %2217 = vadd.xlane.f32.xlu0 %v2214_v12  ;;  %v3346_v12 = vor.u32 %v3546_v38, %v3345_v19  ;;  %v3285_v38 = vld [vmem:[#allocation5 + $0x3c] sm:$0xf] }
 0xd02   :  { %2523 = vmatpush.bf16.msrb.mxu0 %v3346_v12  ;;  %v3539_v12 = vld [vmem:[#allocation5 + $0x88] sm:$0xf0] }
 0xd03   :  { %v3318_v13 = vor.u32 %v3539_v12, %v3317_v28 }
 0xd06   :  { %2524 = vmatpush.bf16.msrb.mxu0 %v3342_v32  ;;  %v2251_v32 = vperm.slane %v1442_v29, 0 }
 0xd0a   :  { %2525 = vmatpush.bf16.msrb.mxu0 %v3338_v61 }
 0xd0e   :  { %2526 = vmatpush.bf16.msrb.mxu0 %v3334_v3 }
 0xd6b   :  { %v2216_v9 = vpop.xlane.xlu1 %2215 }
 0xd6c   :  { %v2219_v15 = vmul.f32 %v2216_v9, %v4017_v50  ;;  %v3330_v9 = vor.u32 %v3542_v7, %v3329_v6  ;;  %v3554_v7 = vld [vmem:[#allocation5 + $0x4b4] sm:$0xf0] }
 0xd6e   :  { %v2221_v17 = vadd.f32 1e-05, %v2219_v15  ;;  %2527 = vmatpush.bf16.msrb.mxu0 %v3330_v9  ;;  %v3294_v15 = vor.u32 %v3533_v14, %v3293_v10  ;;  %v3373_v10 = vld [vmem:[#allocation5 + $0x3d4] sm:$0xf]  ;;  %v3553_v14 = vld [vmem:[#allocation5 + $0x41c] sm:$0xf0] }
 0xd6f   :  { %v3374_v33 = vor.u32 %v3553_v14, %v3373_v10 }
 0xd70   :  { %3771 = vrsqrt.f32 %v2221_v17  ;;  %vm2229_vm1 = vweird.f32 %v2221_v17 }
 0xd72   :  { %2528 = vmatpush.bf16.msrb.mxu0 %v3326_v35 }
 0xd73   :  { %v2218_v36 = vpop.xlane.xlu0 %2217 }
 0xd74   :  { %v2220_v27 = vmul.f32 %v2218_v36, %v4017_v50  ;;  %v3540_v36 = vld [vmem:[#allocation5 + $0x120] sm:$0xf0] }
 0xd75   :  { %v3322_v23 = vor.u32 %v3540_v36, %v3321_v18  ;;  %v3550_v36 = vld [vmem:[#allocation5 + $0x254] sm:$0xf0] }
 0xd76   :  { %v3772_v30 = vpop.eup %3771  ;;  %v2222_v31 = vadd.f32 1e-05, %v2220_v27  ;;  %v3286_v27 = vor.u32 %v3531_v25, %v3285_v38  ;;  %v3357_v38 = vld [vmem:[#allocation5 + $0x174] sm:$0xf]  ;;  %v3549_v25 = vld [vmem:[#allocation5 + $0x1bc] sm:$0xf0] }
 0xd77   :  { %v2224_v34 = vmul.f32 %v3772_v30, %v2221_v17  ;;  %vm2230_vm0 = vweird.f32 %v3772_v30  ;;  %v3289_v17 = vld [vmem:[#allocation5 + $0xd4] sm:$0xf]  ;;  %2529 = vmatpush.bf16.msrb.mxu0 %v3322_v23  ;;  %v3358_v28 = vor.u32 %v3549_v25, %v3357_v38 }
 0xd78   :  { %3773 = vrsqrt.f32 %v2222_v31  ;;  %vm2231_vm2 = vmor %vm2229_vm1, %vm2230_vm0  ;;  %vm2239_vm4 = vweird.f32 %v2222_v31  ;;  %v3290_v19 = vor.u32 %v3532_v60, %v3289_v17  ;;  %v3365_v17 = vld [vmem:[#allocation5 + $0x2a4] sm:$0xf]  ;;  %v3551_v60 = vld [vmem:[#allocation5 + $0x2ec] sm:$0xf0] }
 0xd79   :  { %v2225_v21 = vmul.f32 %v3772_v30, %v2224_v34  ;;  %v3366_v18 = vor.u32 %v3551_v60, %v3365_v17  ;;  %v3555_v38 = vld [vmem:[#allocation5 + $0x90] sm:$0xf0] }
 0xd7b   :  { %v2226_v37 = vmul.f32 0.5, %v2225_v21  ;;  %2530 = vmatpush.bf16.msrb.mxu0 %v3318_v13  ;;  %v3353_v13 = vld [vmem:[#allocation5 + $0xdc] sm:$0xf] }
 0xd7d   :  { %v2227_v22 = vsub.f32 1.5, %v2226_v37 }
 0xd7e   :  { %v3774_v20 = vpop.eup %3773 }
 0xd7f   :  { %v2228_v41 = vmul.f32 %v3772_v30, %v2227_v22  ;;  %v2234_v8 = vmul.f32 %v3774_v20, %v2222_v31  ;;  %vm2240_vm3 = vweird.f32 %v3774_v20 }
 0xd80   :  { %vm2241_vm7 = vmor %vm2239_vm4, %vm2240_vm3 }
 0xd81   :  { %v2235_v42 = vmul.f32 %v3774_v20, %v2234_v8  ;;  %v2232_v11 = vsel %vm2231_vm2, %v3772_v30, %v2228_v41  ;;  %v2252_v30 = vperm.slane %v1442_v29, 1 }
 0xd82   :  { %v2243_v45 = vmul.f32 %v2232_v11, %v4157_v24  ;;  %v3305_v24 = vld [vmem:[#allocation5 + $0x334] sm:$0xf] }
 0xd83   :  { %v2236_v43 = vmul.f32 0.5, %v2235_v42  ;;  %v3306_v58 = vor.u32 %v3536_v56, %v3305_v24 }
 0xd84   :  { %v2245_v49 = vmul.f32 %v2243_v45, %v1439_v47 }
 0xd85   :  { %v2237_v44 = vsub.f32 1.5, %v2236_v43  ;;  %2441 = vmatpush.bf16.msra.mxu3 %v3306_v58 }
 0xd86   :  { %v4170_v53 = vadd.f32 %v2245_v49, %v1440_v51 }
 0xd87   :  { %v2238_v46 = vmul.f32 %v3774_v20, %v2237_v44 }
 0xd89   :  { %v2242_v40 = vsel %vm2241_vm7, %v3774_v20, %v2238_v46 }
 0xd8a   :  { %v2244_v48 = vmul.f32 %v2242_v40, %v4162_v55  ;;  %v3301_v55 = vld [vmem:[#allocation5 + $0x29c] sm:$0xf] }
 0xd8b   :  { %v3302_v1 = vor.u32 %v3535_v62, %v3301_v55 }
 0xd8c   :  { %v2246_v52 = vmul.f32 %v2244_v48, %v1439_v47 }
 0xd8d   :  { %2442 = vmatpush.bf16.msra.mxu3 %v3302_v1 }
 0xd8e   :  { %v4172_v39 = vadd.f32 %v2246_v52, %v1440_v51  ;;  %v1443_v52 = vld [vmem:[#allocation7 + $0x35] ss:$0 sm:$0xff] }
 0xd90   :  { %v2249_v54 = vpack.c.bf16 %v4172_v39, %v4170_v53 }
 0xd91   :  { %2443 = vmatpush.bf16.msra.mxu3 %v3298_v63 }
 0xd92   :  { %2343 = vmatmul.bf16.vlgmr.msrb.gmra.mxu1 %v2249_v54  ;;  %2357 = vmatmul.bf16.vlgmr.msrb.gmra.mxu2 %v2249_v54 }
 0xd95   :  { %2444 = vmatpush.bf16.msra.mxu3 %v3294_v15  ;;  %v3369_v15 = vld [vmem:[#allocation5 + $0x33c] sm:$0xf] }
 0xd96   :  { %v3370_v35 = vor.u32 %v3552_v16, %v3369_v15 }
 0xd99   :  { %2445 = vmatpush.bf16.msra.mxu3 %v3290_v19  ;;  %v3361_v19 = vld [vmem:[#allocation5 + $0x20c] sm:$0xf] }
 0xd9a   :  { %v3362_v23 = vor.u32 %v3550_v36, %v3361_v19  ;;  %v3556_v19 = vld [vmem:[#allocation5 + $0x128] sm:$0xf0] }
 0xd9d   :  { %2446 = vmatpush.bf16.msra.mxu3 %v3286_v27 }
 0xe0f   :  { %v2344_v26 = vpop.f32.mrf.mxu1 }
 0xe10   :  { %v2345_v37 = vadd.f32 %v2344_v26, %v2251_v32  ;;  %v3548_v26 = vld [vmem:[#allocation5 + $0x124] sm:$0xf0] }
 0xe11   :  { %v3354_v29 = vor.u32 %v3548_v26, %v3353_v13 }
 0xe12   :  { %v2363_v8 = vmax.f32 %v2345_v37, 0.0 }
 0xe15   :  { %v2358_v31 = vpop.f32.mrf.mxu2 }
 0xe16   :  { %v2359_v34 = vadd.f32 %v2358_v31, %v2252_v30  ;;  %v3349_v31 = vld [vmem:[#allocation5 + $0x44] sm:$0xf] }
 0xe17   :  { %v2346_v21 = vpop.f32.mrf.mxu1 }
 0xe18   :  { %v2364_v22 = vmax.f32 %v2359_v34, 0.0  ;;  %v2347_v20 = vadd.f32 %v2346_v21, %v2251_v32  ;;  %v3547_v32 = vld [vmem:[#allocation5 + $0x8c] sm:$0xf0] }
 0xe19   :  { %v3350_v34 = vor.u32 %v3547_v32, %v3349_v31 }
 0xe1a   :  { %v2367_v11 = vpack.c.bf16 %v2364_v22, %v2363_v8  ;;  %v2365_v43 = vmax.f32 %v2347_v20, 0.0  ;;  %v3409_v22 = vld [vmem:[#allocation5 + $0x470] sm:$0xf]  ;;  %v3562_v20 = vld [vmem:[#allocation5 + $0x4b8] sm:$0xf0] }
 0xe1c   :  { %v2387_v46 = vunpack.c.l.b16 %v2367_v11  ;;  %v2471_v47 = vunpack.c.h.b16 %v2367_v11  ;;  %v3410_v11 = vor.u32 %v3562_v20, %v3409_v22 }
 0xe1d   :  { %v2360_v41 = vpop.f32.mrf.mxu2 }
 0xe1e   :  { %v2361_v42 = vadd.f32 %v2360_v41, %v2252_v30  ;;  %v3405_v41 = vld [vmem:[#allocation5 + $0x3d8] sm:$0xf]  ;;  %2739 = vmatpush.bf16.msra.mxu2 %v3410_v11 }
 0xe20   :  { %v2366_v44 = vmax.f32 %v2361_v42, 0.0 }
 0xe22   :  { %v2368_v45 = vpack.c.bf16 %v2366_v44, %v2365_v43  ;;  %v3561_v43 = vld [vmem:[#allocation5 + $0x420] sm:$0xf0] }
 0xe24   :  { %v2388_v40 = vunpack.c.l.b16 %v2368_v45  ;;  %v2472_v48 = vunpack.c.h.b16 %v2368_v45  ;;  %v3406_v45 = vor.u32 %v3561_v43, %v3405_v41 }
 0xe26   :  { %v2389_v49 = vpack.c.b16 %v2388_v40, %v2387_v46  ;;  %v2473_v51 = vpack.c.b16 %v2472_v48, %v2471_v47  ;;  %v3401_v47 = vld [vmem:[#allocation5 + $0x340] sm:$0xf]  ;;  %v3560_v40 = vld [vmem:[#allocation5 + $0x388] sm:$0xf0]  ;;  %2740 = vmatpush.bf16.msra.mxu2 %v3406_v45 }
 0xe28   :  { %2447 = vmatmul.bf16.vlgmr.msra.gmra.mxu3 %v2389_v49  ;;  %2531 = vmatmul.bf16.vlgmr.msrb.gmra.mxu0 %v2473_v51  ;;  %v3402_v49 = vor.u32 %v3560_v40, %v3401_v47 }
 0xe2a   :  { %2741 = vmatpush.bf16.msra.mxu2 %v3402_v49 }
 0xea5   :  { %v2532_v54 = vpop.f32.mrf.mxu0 }
 0xeab   :  { %v2448_v24 = vpop.f32.mrf.mxu3 }
 0xeac   :  { %v2453_v56 = vadd.f32 %v2448_v24, %v1443_v52 }
 0xead   :  { %v2534_v55 = vpop.f32.mrf.mxu0 }
 0xeae   :  { %v2537_v57 = vadd.f32 %v2532_v54, %v2453_v56 }
 0xeb0   :  { %v2539_v58 = vadd.f32 %v2537_v57, %v4170_v53 }
 0xeb2   :  { %2541 = vadd.xlane.f32.xlu2 %v2539_v58 }
 0xeb3   :  { %v2450_v59 = vpop.f32.mrf.mxu3 }
 0xeb4   :  { %v2454_v61 = vadd.f32 %v2450_v59, %v1443_v52  ;;  %v3559_v52 = vld [vmem:[#allocation5 + $0x2f0] sm:$0xf0] }
 0xeb6   :  { %v2538_v62 = vadd.f32 %v2534_v55, %v2454_v61  ;;  %v3393_v61 = vld [vmem:[#allocation5 + $0x210] sm:$0xf]  ;;  %v3558_v55 = vld [vmem:[#allocation5 + $0x258] sm:$0xf0] }
 0xeb8   :  { %v2540_v0 = vadd.f32 %v2538_v62, %v4172_v39  ;;  %v3377_v39 = vld [vmem:[#allocation5 + $0x46c] sm:$0xf] }
 0xeb9   :  { %v3378_v9 = vor.u32 %v3554_v7, %v3377_v39 }
 0xeba   :  { %2543 = vadd.xlane.f32.xlu1 %v2540_v0 }
 0xebb   :  { %2659 = vmatpush.bf16.msra.mxu1 %v3378_v9  ;;  %v1445_v9 = vld [vmem:[#allocation7 + $0x37] ss:$0 sm:$0xff] }
 0xebf   :  { %2660 = vmatpush.bf16.msra.mxu1 %v3374_v33 }
 0xec3   :  { %2661 = vmatpush.bf16.msra.mxu1 %v3370_v35 }
 0xec7   :  { %2662 = vmatpush.bf16.msra.mxu1 %v3366_v18  ;;  %v3385_v18 = vld [vmem:[#allocation5 + $0xe0] sm:$0xf] }
 0xec8   :  { %v3386_v36 = vor.u32 %v3556_v19, %v3385_v18 }
 0xecb   :  { %2663 = vmatpush.bf16.msra.mxu1 %v3362_v23  ;;  %v3381_v23 = vld [vmem:[#allocation5 + $0x48] sm:$0xf] }
 0xecc   :  { %v3382_v25 = vor.u32 %v3555_v38, %v3381_v23 }
 0xecf   :  { %2664 = vmatpush.bf16.msra.mxu1 %v3358_v28  ;;  %v2610_v28 = vld [vmem:[#allocation7 + $0x48] ss:$0 sm:$0xff] }
 0xed3   :  { %2665 = vmatpush.bf16.msra.mxu1 %v3354_v29  ;;  %v2690_v29 = vld [vmem:[#allocation7 + $0x49] ss:$0 sm:$0xff] }
 0xed7   :  { %2666 = vmatpush.bf16.msra.mxu1 %v3350_v34 }
 0xf25   :  { %v2542_v1 = vpop.xlane.xlu2 %2541 }
 0xf26   :  { %v2545_v2 = vmul.f32 %v2542_v1, %v4017_v50 }
 0xf28   :  { %v4179_v3 = vsub.f32 %v2539_v58, %v2545_v2  ;;  %v3394_v2 = vor.u32 %v3558_v55, %v3393_v61 }
 0xf2a   :  { %v2549_v4 = vmul.f32 %v4179_v3, %v4179_v3 }
 0xf2c   :  { %2551 = vadd.xlane.f32.xlu0 %v2549_v4 }
 0xf2d   :  { %v2544_v5 = vpop.xlane.xlu1 %2543 }
 0xf2e   :  { %v2546_v53 = vmul.f32 %v2544_v5, %v4017_v50  ;;  %v3389_v5 = vld [vmem:[#allocation5 + $0x178] sm:$0xf] }
 0xf30   :  { %v4184_v6 = vsub.f32 %v2540_v0, %v2546_v53  ;;  %v1444_v0 = vld [vmem:[#allocation7 + $0x36] ss:$0 sm:$0xff]  ;;  %v3557_v53 = vld [vmem:[#allocation5 + $0x1c0] sm:$0xf0] }
 0xf31   :  { %v3390_v7 = vor.u32 %v3557_v53, %v3389_v5 }
 0xf32   :  { %v2550_v63 = vmul.f32 %v4184_v6, %v4184_v6 }
 0xf34   :  { %2553 = vadd.xlane.f32.xlu2 %v2550_v63 }
 0xf9f   :  { %v2552_v27 = vpop.xlane.xlu0 %2551 }
 0xfa0   :  { %v2555_v12 = vmul.f32 %v2552_v27, %v4017_v50 }
 0xfa2   :  { %v2557_v30 = vadd.f32 1e-05, %v2555_v12 }
 0xfa4   :  { %3775 = vrsqrt.f32 %v2557_v30  ;;  %vm2565_vm9 = vweird.f32 %v2557_v30 }
 0xfa7   :  { %v2554_v21 = vpop.xlane.xlu2 %2553 }
 0xfa8   :  { %v2556_v37 = vmul.f32 %v2554_v21, %v4017_v50  ;;  %v3397_v50 = vld [vmem:[#allocation5 + $0x2a8] sm:$0xf] }
 0xfa9   :  { %v3398_v57 = vor.u32 %v3559_v52, %v3397_v50 }
 0xfaa   :  { %v3776_v8 = vpop.eup %3775  ;;  %v2558_v42 = vadd.f32 1e-05, %v2556_v37 }
 0xfab   :  { %v2560_v44 = vmul.f32 %v3776_v8, %v2557_v30  ;;  %vm2566_vm8 = vweird.f32 %v3776_v8  ;;  %2742 = vmatpush.bf16.msra.mxu2 %v3398_v57 }
 0xfac   :  { %3777 = vrsqrt.f32 %v2558_v42  ;;  %vm2567_vm10 = vmor %vm2565_vm9, %vm2566_vm8  ;;  %vm2575_vm12 = vweird.f32 %v2558_v42 }
 0xfad   :  { %v2561_v46 = vmul.f32 %v3776_v8, %v2560_v44 }
 0xfaf   :  { %v2562_v48 = vmul.f32 0.5, %v2561_v46  ;;  %2743 = vmatpush.bf16.msra.mxu2 %v3394_v2 }
 0xfb1   :  { %v2563_v51 = vsub.f32 1.5, %v2562_v48 }
 0xfb2   :  { %v3778_v54 = vpop.eup %3777 }
 0xfb3   :  { %v2564_v24 = vmul.f32 %v3776_v8, %v2563_v51  ;;  %v2570_v56 = vmul.f32 %v3778_v54, %v2558_v42  ;;  %vm2576_vm11 = vweird.f32 %v3778_v54  ;;  %2744 = vmatpush.bf16.msra.mxu2 %v3390_v7 }
 0xfb4   :  { %vm2577_vm13 = vmor %vm2575_vm12, %vm2576_vm11 }
 0xfb5   :  { %v2568_v58 = vsel %vm2567_vm10, %v3776_v8, %v2564_v24  ;;  %v2571_v59 = vmul.f32 %v3778_v54, %v2570_v56 }
 0xfb6   :  { %v2579_v1 = vmul.f32 %v2568_v58, %v4179_v3 }
 0xfb7   :  { %v2572_v62 = vmul.f32 0.5, %v2571_v59  ;;  %2745 = vmatpush.bf16.msra.mxu2 %v3386_v36 }
 0xfb8   :  { %v2581_v39 = vmul.f32 %v2579_v1, %v1444_v0 }
 0xfb9   :  { %v2573_v4 = vsub.f32 1.5, %v2572_v62 }
 0xfba   :  { %v2583_v33 = vadd.f32 %v2581_v39, %v1445_v9 }
 0xfbb   :  { %v2574_v63 = vmul.f32 %v3778_v54, %v2573_v4  ;;  %2746 = vmatpush.bf16.msra.mxu2 %v3382_v25 }
 0xfbc   :  { %v2586_v16 = vrot.slane %v2583_v33, 7 }
 0xfbd   :  { %v2578_v10 = vsel %vm2577_vm13, %v3778_v54, %v2574_v63 }
 0xfbe   :  { %v2580_v14 = vmul.f32 %v2578_v10, %v4184_v6 }
 0xfc0   :  { %v2582_v15 = vmul.f32 %v2580_v14, %v1444_v0 }
 0xfc2   :  { %v2584_v3 = vadd.f32 %v2582_v15, %v1445_v9 }
 0xfc4   :  { %v2589_v35 = vrot.slane %v2584_v3, 6 }
 0xfc6   :  { %v2592_v17 = vsel %vm2591_vm14, %v2586_v16, %v2589_v35 }
 0xfc7   :  { %v2593_v60 = vpack.c.bf16 %v2592_v17, %v2592_v17 }
 0xfc9   :  { %2667 = vmatmul.bf16.vlgmr.msra.gmra.mxu1 %v2593_v60 }
0x1046   :  { %v2668_v6 = vpop.f32.mrf.mxu1 }
0x1047   :  { %v2669_v27 = vadd.f32 %v2668_v6, %v2610_v28 }
0x1049   :  { %v2672_v12 = vmax.f32 %v2669_v27, 0.0 }
0x104b   :  { %v2673_v13 = vpack.c.bf16 %v2672_v12, %v2672_v12 }
0x104d   :  { %2747 = vmatmul.bf16.vlgmr.msra.gmra.mxu2 %v2673_v13 }
0x104e   :  { %v2670_v26 = vpop.f32.mrf.mxu1 }
0x10d0   :  { %v2748_v30 = vpop.f32.mrf.mxu2 }
0x10d1   :  { %v2749_v31 = vadd.f32 %v2748_v30, %v2690_v29 }
0x10d3   :  { %2752 = vst [vmem:[#allocation8] sm:$0x3] %v2749_v31 }
0x10d4   :  { %2763 = dma.vmem_to_hbm [thread:$0]  %s2759_s7, 32, %s2761_s10, [#allocation4]  }
0x10d8   :  { %v2750_v32 = vpop.f32.mrf.mxu2 }
0x10d9   :  { %3879 = dma.done.wait [#allocation4], 32  }
0x10da   :  { %3880 = vsyncadd [#allocation4], 4294967264 }
0x10db   :  { %2768 = vsyncpa [#allocation3], 1 }
0x10dc   :  { %2769 = vsyncpa [#allocation6], 1 }
0x10dd   :  { %2770 = vsyncpa [#allocation4], 1 }

</bundles_post_ra>
